<compile_context>
chip_gen: v7x
topology: tpu7x:2x2x1
jax: 0.10.0
libtpu: 0.0.40
codegen_flags: <defaults>
</compile_context>

<pallas_src>
import functools

import jax
import jax.numpy as jnp
from jax.experimental import pallas as pl
from jax.experimental.pallas import tpu as pltpu


def _round_up(x, m):
    return (x + m - 1) // m * m


def _vmem_capacity_bytes():
    try:
        info = pltpu.get_tpu_info()
        for attr in ("vmem_capacity_bytes", "vmem_size_bytes", "vmem_bytes"):
            v = getattr(info, attr, None)
            if isinstance(v, int) and v > 0:
                return v
    except Exception:
        pass
    return 64 << 20  # conservative fallback (v7x-sized)


def _default_n_split():
    # v7x has 2 TensorCores per chip, each with its own HBM slice: split the batch so both
    # cores work on the FC head. Single-TC chips keep 1 tile to avoid re-streaming fc1 weights.
    try:
        kind = jax.devices()[0].device_kind.lower()
    except Exception:
        return 1
    return 2 if "v7" in kind else 1


_SINGLE_BUF_OK = None


def _single_buffer_supported():
    """Probe (once) whether BlockSpec(pipeline_mode=pl.Buffered(1)) works end to end."""
    global _SINGLE_BUF_OK
    if _SINGLE_BUF_OK is None:
        try:
            def _probe(x_ref, o_ref):
                o_ref[...] = x_ref[...] + 1.0

            spec = pl.BlockSpec((8, 128), lambda i: (0, 0), pipeline_mode=pl.Buffered(1))
            y = pl.pallas_call(
                _probe,
                out_shape=jax.ShapeDtypeStruct((8, 128), jnp.float32),
                grid=(2,),
                in_specs=[spec],
                out_specs=pl.BlockSpec((8, 128), lambda i: (0, 0)),
            )(jnp.zeros((8, 128), jnp.float32))
            jax.block_until_ready(y)
            _SINGLE_BUF_OK = bool(jnp.all(y == 1.0))
        except Exception:
            _SINGLE_BUF_OK = False
    return _SINGLE_BUF_OK


# ----------------------------- kernel 1: global-context block ----------------------------- #
def gc_block_kernel(x_ref, wk_ref, bk_ref, wv1t_ref, bv1_ref,
                    lnw_ref, lnb_ref, wv2t_ref, bv2_ref, v2_ref, *, approx_recip):
    x = x_ref[...]                                            # (TN, S, C)  f32, C on lanes

    # conv_WK (1x1, C -> 1): VPU multiply + lane (C) reduction; keeps the MXU free.
    wk = wk_ref[...].reshape(1, 1, -1)                        # (1, 1, C)
    logits = jnp.sum(x * wk, axis=2) + bk_ref[...]            # (TN, S)

    # softmax over spatial positions; approx reciprocal goes to the (idle) EUP slot.
    m = jnp.max(logits, axis=-1, keepdims=True)
    e = jnp.exp(logits - m)
    denom = jnp.sum(e, axis=-1, keepdims=True)
    hm = e * pl.reciprocal(denom, approx=approx_recip)        # (TN, S)

    # global-context pooling: ctx[n, c] = sum_s x[n, s, c] * hm[n, s]  (sublane reduce over S)
    ctx = jnp.sum(x * hm[:, :, None], axis=1)                 # (TN, C), lane-dense

    # channel MLP, batched over the sample axis (lane-dense MXU shapes).
    v1 = jnp.dot(ctx, wv1t_ref[...], preferred_element_type=jnp.float32) + bv1_ref[...]

    # LayerNorm over [Cr, 1, 1] (biased variance, eps=1e-5, affine) + ReLU.
    # NOTE: zero-padded sample rows hit near-zero variance here; rsqrt(var + 1e-5) stays finite
    # and those rows are sliced off by the wrapper, so this path is benign -- do not "fix" it.
    mu = jnp.mean(v1, axis=1, keepdims=True)
    var = jnp.mean((v1 - mu) ** 2, axis=1, keepdims=True)
    v1 = (v1 - mu) * jax.lax.rsqrt(var + 1e-5) * lnw_ref[...] + lnb_ref[...]
    v1 = jnp.maximum(v1, 0.0)

    v2_ref[...] = (jnp.dot(v1, wv2t_ref[...], preferred_element_type=jnp.float32)
                   + bv2_ref[...])                            # (TN, C)


# --------------------- kernel 2: fused residual-fold + fc1 + fc2 (N x K tiled) -------------- #
def fc_fused_kernel(x_ref, w1_ref, v2_ref, w1f_ref, b1_ref, w2_ref, b2_ref, out_ref):
    k = pl.program_id(1)

    @pl.when(k == 0)
    def _():
        out_ref[...] = jnp.zeros_like(out_ref)

    # x_flat @ fc1_w streamed over the D0 (=S*C) contraction axis; the x tile is cast to the
    # weight streaming dtype in-kernel (avoids a second HBM copy of the activations).
    out_ref[...] += jnp.dot(x_ref[...].astype(w1_ref.dtype), w1_ref[...],
                            preferred_element_type=jnp.float32)

    @pl.when(k == pl.num_programs(1) - 1)
    def _():
        # Broadcast residual folded algebraically: (x + v2) @ W1 == x @ W1 + v2 @ W1_fold.
        h = (out_ref[...]
             + jnp.dot(v2_ref[...], w1f_ref[...], preferred_element_type=jnp.float32)
             + b1_ref[...])
        h = jnp.maximum(h, 0.0)
        o = jnp.dot(h.astype(w2_ref.dtype), w2_ref[...],
                    preferred_element_type=jnp.float32) + b2_ref[...]
        out_ref[...] = jnp.maximum(o, 0.0)


# ------------------------------------- wrapper --------------------------------------------- #
def gcnet_forward(x, params, *, tn_max=128, tk_max=2048,
                  fc_weight_dtype=jnp.bfloat16, approx_softmax=True, n_split=None):
    N, C, H, W = x.shape
    S = H * W
    D0 = S * C                                                 # S-major flattening order
    Cr = params["wv1"].shape[0]
    fc_dim = params["fc1_w"].shape[1]

    # ---- chip-aware budgets ----
    vmem_cap = _vmem_capacity_bytes()
    vmem_limit = int(min(vmem_cap * 3 // 4, 96 << 20))         # ~48 MiB on v7x, 96 MiB on 128 MiB parts
    if vmem_cap <= (64 << 20):
        tk_max = min(tk_max, 1024)                             # shrink K tile on 64 MiB-VMEM parts

    single_buf = _single_buffer_supported()

    # ---- tiling / padded sizes ----
    TN = tn_max if N >= tn_max else _round_up(N, 8)            # gc samples per grid step
    N_p = _round_up(N, TN)
    if N_p > 128:
        N_p = _round_up(N_p, 256)                              # 256-aligned M for the 2x256^2 MXUs
    F_p = _round_up(fc_dim, 128)                               # lane-dense FC width

    # K tile: prefer the largest 128-multiple divisor of D0 (keeps the x reshape free);
    # only pad D0 (one extra copy) when that would collapse to a tiny tile.
    cap = max(128, (min(tk_max, _round_up(D0, 128)) // 128) * 128)
    tk_div = 128
    for cand in range(cap, 127, -128):
        if D0 % cand == 0:
            tk_div = cand
            break
    if tk_div >= min(cap, 512) or tk_div == D0:
        TK, D0_p = tk_div, D0
    else:
        TK = cap
        D0_p = _round_up(D0, TK)
    num_k = D0_p // TK

    # batch split across TensorCores (v7x only by default)
    num_n = n_split if n_split is not None else _default_n_split()
    num_n = max(1, min(int(num_n), N_p // 8))
    while num_n > 1 and (N_p % num_n != 0 or (N_p // num_n) % 8 != 0):
        num_n -= 1
    TN2 = N_p // num_n

    # ---- activations: single layout op (pad N + transpose to (N, S, C)); shared by both kernels.
    x_sc = jnp.transpose(x.reshape(N, C, S).astype(jnp.float32), (0, 2, 1))   # (N, S, C)
    if N_p != N:
        x_sc = jnp.pad(x_sc, ((0, N_p - N), (0, 0), (0, 0)))
    x_flat = x_sc.reshape(N_p, D0)                              # free reshape (row-major)
    if D0_p != D0:
        x_flat = jnp.pad(x_flat, ((0, 0), (0, D0_p - D0)))      # only for unfriendly D0

    # ---- parameter plumbing (one-time / cacheable): layouts, padding, residual fold ----
    wk_row = params["wk"].reshape(1, C)
    bk = params["bk"].reshape(1, 1)
    wv1_t = params["wv1"].T                                     # (C, Cr)
    bv1 = params["bv1"].reshape(1, Cr)
    ln_w = params["ln_w"].reshape(1, Cr)
    ln_b = params["ln_b"].reshape(1, Cr)
    wv2_t = params["wv2"].T                                     # (Cr, C)
    bv2 = params["bv2"].reshape(1, C)

    fc1_w = params["fc1_w"]                                     # (C*S, fc_dim), C-major rows
    w1_fold = fc1_w.reshape(C, S, fc_dim).sum(axis=1)           # (C, fc_dim), kept f32
    fc1_w_sc = fc1_w.reshape(C, S, fc_dim).transpose(1, 0, 2).reshape(S * C, fc_dim)
    fc1_w_p = jnp.pad(fc1_w_sc, ((0, D0_p - D0), (0, F_p - fc_dim))).astype(fc_weight_dtype)
    fc2_w_p = jnp.pad(params["fc2_w"], ((0, F_p - fc_dim), (0, F_p - fc_dim))).astype(fc_weight_dtype)
    w1_fold_p = jnp.pad(w1_fold, ((0, 0), (0, F_p - fc_dim)))
    fc1_b_p = jnp.pad(params["fc1_b"].reshape(1, fc_dim), ((0, 0), (0, F_p - fc_dim)))
    fc2_b_p = jnp.pad(params["fc2_b"].reshape(1, fc_dim), ((0, 0), (0, F_p - fc_dim)))

    def _const_spec(shape):
        # Constant block index: single-buffer it when supported (halves VMEM for these operands).
        idx = lambda *_: (0,) * len(shape)
        if single_buf:
            return pl.BlockSpec(shape, idx, pipeline_mode=pl.Buffered(1))
        return pl.BlockSpec(shape, idx)

    # ---- kernel 1: global-context block -> v2 (N_p, C) ----
    v2 = pl.pallas_call(
        functools.partial(gc_block_kernel, approx_recip=approx_softmax),
        out_shape=jax.ShapeDtypeStruct((N_p, C), jnp.float32),
        grid=(N_p // TN,),
        in_specs=[
            pl.BlockSpec((TN, S, C), lambda i: (i, 0, 0)),       # x, C-last (lane-dense)
            _const_spec((1, C)), _const_spec((1, 1)),            # conv_WK w, b
            _const_spec((C, Cr)), _const_spec((1, Cr)),          # conv_WV1 w^T, b
            _const_spec((1, Cr)), _const_spec((1, Cr)),          # LayerNorm gamma, beta
            _const_spec((Cr, C)), _const_spec((1, C)),           # conv_WV2 w^T, b
        ],
        out_specs=pl.BlockSpec((TN, C), lambda i: (i, 0)),
        compiler_params=pltpu.CompilerParams(
            dimension_semantics=("parallel",),
            vmem_limit_bytes=vmem_limit,
        ),
    )(x_sc, wk_row, bk, wv1_t, bv1, ln_w, ln_b, wv2_t, bv2)

    # ---- kernel 2: fused residual-fold + fc1 + relu + fc2 + relu, (N, K)-tiled ----
    out_p = pl.pallas_call(
        fc_fused_kernel,
        out_shape=jax.ShapeDtypeStruct((N_p, F_p), jnp.float32),
        grid=(num_n, num_k),
        in_specs=[
            pl.BlockSpec((TN2, TK), lambda n, k: (n, k)),        # flattened x, (N, K) tile
            pl.BlockSpec((TK, F_p), lambda n, k: (k, 0)),        # fc1_w K tile (double-buffered)
            pl.BlockSpec((TN2, C), lambda n, k: (n, 0)),         # v2 (constant over K)
            _const_spec((C, F_p)),                               # W1_fold
            _const_spec((1, F_p)),                               # fc1_b
            _const_spec((F_p, F_p)),                             # fc2_w
            _const_spec((1, F_p)),                               # fc2_b
        ],
        out_specs=pl.BlockSpec((TN2, F_p), lambda n, k: (n, 0)),  # VMEM-resident accumulator
        compiler_params=pltpu.CompilerParams(
            dimension_semantics=("parallel", "arbitrary"),
            vmem_limit_bytes=vmem_limit,
        ),
    )(x_flat, fc1_w_p, v2, w1_fold_p, fc1_b_p, fc2_w_p, fc2_b_p)

    return out_p[:N, :fc_dim]


# --------------------------------- plain-JAX reference ------------------------------------- #
def ref_forward(x, params):
    N, C, H, W = x.shape
    S = H * W
    xc = x.reshape(N, C, S)
    logits = jnp.einsum("ncs,c->ns", xc, params["wk"][0]) + params["bk"][0, 0]
    hm = jax.nn.softmax(logits, axis=1)
    ctx = jnp.einsum("ncs,ns->nc", xc, hm)
    v1 = ctx @ params["wv1"].T + params["bv1"]
    mu = v1.mean(axis=1, keepdims=True)
    var = ((v1 - mu) ** 2).mean(axis=1, keepdims=True)
    v1 = (v1 - mu) / jnp.sqrt(var + 1e-5) * params["ln_w"] + params["ln_b"]
    v1 = jnp.maximum(v1, 0.0)
    v2 = v1 @ params["wv2"].T + params["bv2"]
    y = (xc + v2[:, :, None]).reshape(N, C * S)
    y = jnp.maximum(y @ params["fc1_w"] + params["fc1_b"], 0.0)
    y = jnp.maximum(y @ params["fc2_w"] + params["fc2_b"], 0.0)
    return y


# -------------------------------------- params --------------------------------------------- #
def init_params(key, C, Cr, D0, fc_dim):
    ks = jax.random.split(key, 10)
    rn = lambda k, shp, s: jax.random.normal(k, shp, jnp.float32) * s
    return dict(
        wk=rn(ks[0], (1, C), 1.0 / jnp.sqrt(C)),
        bk=rn(ks[1], (1, 1), 0.1),
        wv1=rn(ks[2], (Cr, C), 1.0 / jnp.sqrt(C)),
        bv1=rn(ks[3], (Cr,), 0.1),
        ln_w=jnp.ones((Cr,), jnp.float32),
        ln_b=jnp.zeros((Cr,), jnp.float32),
        wv2=rn(ks[4], (C, Cr), 1.0 / jnp.sqrt(Cr)),
        bv2=rn(ks[5], (C,), 0.1),
        fc1_w=rn(ks[6], (D0, fc_dim), 1.0 / jnp.sqrt(D0)),
        fc1_b=rn(ks[7], (fc_dim,), 0.1),
        fc2_w=rn(ks[8], (fc_dim, fc_dim), 1.0 / jnp.sqrt(fc_dim)),
        fc2_b=rn(ks[9], (fc_dim,), 0.1),
    )


if __name__ == "__main__":
    # NUM_FC=2, FC_DIM=64, reduction=16 -> C=32 gives Cr = 2.
    N, C, H, W = 2, 32, 8, 8
    reduction = 16
    Cr = C // reduction
    fc_dim = 64
    D0 = C * H * W

    key = jax.random.PRNGKey(0)
    kx, kp = jax.random.split(key)
    x = jax.random.normal(kx, (N, C, H, W), jnp.float32)
    params = init_params(kp, C, Cr, D0, fc_dim)

    ref = ref_forward(x, params)

    # Strict numeric check: f32 FC streaming + exact softmax reciprocal (bit-for-bit-ish path).
    fwd_f32 = jax.jit(functools.partial(gcnet_forward,
                                        fc_weight_dtype=jnp.float32,
                                        approx_softmax=False))
    out_f32 = jax.block_until_ready(fwd_f32(x, params))
    assert out_f32.shape == (N, fc_dim), out_f32.shape
    err_f32 = float(jnp.max(jnp.abs(out_f32 - ref)))
    assert err_f32 < 5e-3, err_f32

    # Default (performance) path: bf16 weight/activation streaming with f32 MXU accumulation.
    fwd = jax.jit(gcnet_forward)
    out_bf16 = jax.block_until_ready(fwd(x, params))
    assert out_bf16.shape == (N, fc_dim), out_bf16.shape
    err_bf16 = float(jnp.max(jnp.abs(out_bf16 - ref)))
    tol_bf16 = 5e-2 + 5e-2 * float(jnp.max(jnp.abs(ref)))   # bf16 rounding over a 2048-term dot
    assert err_bf16 < tol_bf16, (err_bf16, tol_bf16)

    print("KERNEL_OK")
</pallas_src>

<mosaic_0001>
module attributes {stable_mosaic.version = 11 : i64} {
  func.func @gc_block_kernel(%arg0: i32, %arg1: memref<8x64x32xf32, #tpu.memory_space<vmem>>, %arg2: memref<1x32xf32, #tpu.memory_space<vmem>>, %arg3: memref<1x1xf32, #tpu.memory_space<vmem>>, %arg4: memref<32x2xf32, #tpu.memory_space<vmem>>, %arg5: memref<1x2xf32, #tpu.memory_space<vmem>>, %arg6: memref<1x2xf32, #tpu.memory_space<vmem>>, %arg7: memref<1x2xf32, #tpu.memory_space<vmem>>, %arg8: memref<2x32xf32, #tpu.memory_space<vmem>>, %arg9: memref<1x32xf32, #tpu.memory_space<vmem>>, %arg10: memref<8x32xf32, #tpu.memory_space<vmem>>) attributes {dimension_semantics = [#tpu.dimension_semantics<parallel>], iteration_bounds = array<i64: 1>, scalar_prefetch = 0 : i64, scratch_operands = 0 : i64, tpu.core_type = #tpu.core_type<tc>, window_params = [{transform_indices = @transform_0, window_bounds = array<i64: 8, 64, 32>}, {pipeline_mode = #tpu.pipeline_mode<synchronous>, transform_indices = @transform_1, window_bounds = array<i64: 1, 32>}, {pipeline_mode = #tpu.pipeline_mode<synchronous>, transform_indices = @transform_2, window_bounds = array<i64: 1, 1>}, {pipeline_mode = #tpu.pipeline_mode<synchronous>, transform_indices = @transform_3, window_bounds = array<i64: 32, 2>}, {pipeline_mode = #tpu.pipeline_mode<synchronous>, transform_indices = @transform_4, window_bounds = array<i64: 1, 2>}, {pipeline_mode = #tpu.pipeline_mode<synchronous>, transform_indices = @transform_5, window_bounds = array<i64: 1, 2>}, {pipeline_mode = #tpu.pipeline_mode<synchronous>, transform_indices = @transform_6, window_bounds = array<i64: 1, 2>}, {pipeline_mode = #tpu.pipeline_mode<synchronous>, transform_indices = @transform_7, window_bounds = array<i64: 2, 32>}, {pipeline_mode = #tpu.pipeline_mode<synchronous>, transform_indices = @transform_8, window_bounds = array<i64: 1, 32>}, {transform_indices = @transform_9, window_bounds = array<i64: 8, 32>}]} {
    %c0 = arith.constant 0 : index
    %c0_0 = arith.constant 0 : index
    %c0_1 = arith.constant 0 : index
    %0 = vector.load %arg1[%c0, %c0_0, %c0_1] : memref<8x64x32xf32, #tpu.memory_space<vmem>>, vector<8x64x32xf32>
    %c0_2 = arith.constant 0 : index
    %c0_3 = arith.constant 0 : index
    %1 = vector.load %arg2[%c0_2, %c0_3] : memref<1x32xf32, #tpu.memory_space<vmem>>, vector<1x32xf32>
    %2 = vector.shape_cast %1 : vector<1x32xf32> to vector<1x1x32xf32>
    %3 = vector.broadcast %2 : vector<1x1x32xf32> to vector<8x64x32xf32>
    %4 = arith.mulf %0, %3 : vector<8x64x32xf32>
    %cst = arith.constant dense<0.000000e+00> : vector<8x64xf32>
    %5 = vector.multi_reduction <add>, %4, %cst [2] : vector<8x64x32xf32> to vector<8x64xf32>
    %c0_4 = arith.constant 0 : index
    %c0_5 = arith.constant 0 : index
    %6 = vector.load %arg3[%c0_4, %c0_5] : memref<1x1xf32, #tpu.memory_space<vmem>>, vector<1x1xf32>
    %7 = vector.broadcast %6 : vector<1x1xf32> to vector<8x64xf32>
    %8 = arith.addf %5, %7 : vector<8x64xf32>
    %cst_6 = arith.constant dense<0xFF800000> : vector<8xf32>
    %9 = vector.multi_reduction <maximumf>, %8, %cst_6 [1] : vector<8x64xf32> to vector<8xf32>
    %10 = vector.shape_cast %9 : vector<8xf32> to vector<8x1xf32>
    %11 = vector.broadcast %10 : vector<8x1xf32> to vector<8x64xf32>
    %12 = arith.subf %8, %11 : vector<8x64xf32>
    %13 = math.exp %12 : vector<8x64xf32>
    %cst_7 = arith.constant dense<0.000000e+00> : vector<8xf32>
    %14 = vector.multi_reduction <add>, %13, %cst_7 [1] : vector<8x64xf32> to vector<8xf32>
    %15 = vector.shape_cast %14 : vector<8xf32> to vector<8x1xf32>
    %16 = tpu.reciprocal %15 : vector<8x1xf32> -> vector<8x1xf32>
    %17 = vector.broadcast %16 : vector<8x1xf32> to vector<8x64xf32>
    %18 = arith.mulf %13, %17 : vector<8x64xf32>
    %19 = vector.shape_cast %18 : vector<8x64xf32> to vector<8x64x1xf32>
    %20 = vector.broadcast %19 : vector<8x64x1xf32> to vector<8x64x32xf32>
    %21 = arith.mulf %0, %20 : vector<8x64x32xf32>
    %cst_8 = arith.constant dense<0.000000e+00> : vector<8x32xf32>
    %22 = vector.multi_reduction <add>, %21, %cst_8 [1] : vector<8x64x32xf32> to vector<8x32xf32>
    %c0_9 = arith.constant 0 : index
    %c0_10 = arith.constant 0 : index
    %23 = vector.load %arg4[%c0_9, %c0_10] : memref<32x2xf32, #tpu.memory_space<vmem>>, vector<32x2xf32>
    %cst_11 = arith.constant dense<0.000000e+00> : vector<8x2xf32>
    %24 = tpu.matmul %22, %23, %cst_11 {dimension_numbers = #tpu.dot_dimension_numbers<[1], [0], [0], [1], [0, 0, 1, 1], [], []>} : vector<8x32xf32>, vector<32x2xf32>, vector<8x2xf32> -> vector<8x2xf32>
    %c0_12 = arith.constant 0 : index
    %c0_13 = arith.constant 0 : index
    %25 = vector.load %arg5[%c0_12, %c0_13] : memref<1x2xf32, #tpu.memory_space<vmem>>, vector<1x2xf32>
    %26 = vector.broadcast %25 : vector<1x2xf32> to vector<8x2xf32>
    %27 = arith.addf %24, %26 : vector<8x2xf32>
    %cst_14 = arith.constant dense<0.000000e+00> : vector<8xf32>
    %28 = vector.multi_reduction <add>, %27, %cst_14 [1] : vector<8x2xf32> to vector<8xf32>
    %29 = vector.shape_cast %28 : vector<8xf32> to vector<8x1xf32>
    %cst_15 = arith.constant 2.000000e+00 : f32
    %30 = vector.broadcast %cst_15 : f32 to vector<8x1xf32>
    %31 = arith.divf %29, %30 : vector<8x1xf32>
    %32 = vector.broadcast %31 : vector<8x1xf32> to vector<8x2xf32>
    %33 = arith.subf %27, %32 : vector<8x2xf32>
    %34 = arith.mulf %33, %33 : vector<8x2xf32>
    %cst_16 = arith.constant dense<0.000000e+00> : vector<8xf32>
    %35 = vector.multi_reduction <add>, %34, %cst_16 [1] : vector<8x2xf32> to vector<8xf32>
    %36 = vector.shape_cast %35 : vector<8xf32> to vector<8x1xf32>
    %cst_17 = arith.constant 2.000000e+00 : f32
    %37 = vector.broadcast %cst_17 : f32 to vector<8x1xf32>
    %38 = arith.divf %36, %37 : vector<8x1xf32>
    %39 = vector.broadcast %31 : vector<8x1xf32> to vector<8x2xf32>
    %40 = arith.subf %27, %39 : vector<8x2xf32>
    %cst_18 = arith.constant 9.99999974E-6 : f32
    %41 = vector.broadcast %cst_18 : f32 to vector<8x1xf32>
    %42 = arith.addf %38, %41 : vector<8x1xf32>
    %43 = math.rsqrt %42 : vector<8x1xf32>
    %44 = vector.broadcast %43 : vector<8x1xf32> to vector<8x2xf32>
    %45 = arith.mulf %40, %44 : vector<8x2xf32>
    %c0_19 = arith.constant 0 : index
    %c0_20 = arith.constant 0 : index
    %46 = vector.load %arg6[%c0_19, %c0_20] : memref<1x2xf32, #tpu.memory_space<vmem>>, vector<1x2xf32>
    %47 = vector.broadcast %46 : vector<1x2xf32> to vector<8x2xf32>
    %48 = arith.mulf %45, %47 : vector<8x2xf32>
    %c0_21 = arith.constant 0 : index
    %c0_22 = arith.constant 0 : index
    %49 = vector.load %arg7[%c0_21, %c0_22] : memref<1x2xf32, #tpu.memory_space<vmem>>, vector<1x2xf32>
    %50 = vector.broadcast %49 : vector<1x2xf32> to vector<8x2xf32>
    %51 = arith.addf %48, %50 : vector<8x2xf32>
    %cst_23 = arith.constant 0.000000e+00 : f32
    %52 = vector.broadcast %cst_23 : f32 to vector<8x2xf32>
    %53 = arith.maximumf %51, %52 : vector<8x2xf32>
    %c0_24 = arith.constant 0 : index
    %c0_25 = arith.constant 0 : index
    %54 = vector.load %arg8[%c0_24, %c0_25] : memref<2x32xf32, #tpu.memory_space<vmem>>, vector<2x32xf32>
    %cst_26 = arith.constant dense<0.000000e+00> : vector<8x32xf32>
    %55 = tpu.matmul %53, %54, %cst_26 {dimension_numbers = #tpu.dot_dimension_numbers<[1], [0], [0], [1], [0, 0, 1, 1], [], []>} : vector<8x2xf32>, vector<2x32xf32>, vector<8x32xf32> -> vector<8x32xf32>
    %c0_27 = arith.constant 0 : index
    %c0_28 = arith.constant 0 : index
    %56 = vector.load %arg9[%c0_27, %c0_28] : memref<1x32xf32, #tpu.memory_space<vmem>>, vector<1x32xf32>
    %57 = vector.broadcast %56 : vector<1x32xf32> to vector<8x32xf32>
    %58 = arith.addf %55, %57 : vector<8x32xf32>
    %c0_29 = arith.constant 0 : index
    %c0_30 = arith.constant 0 : index
    %59 = vector.load %arg10[%c0_29, %c0_30] : memref<8x32xf32, #tpu.memory_space<vmem>>, vector<8x32xf32>
    tpu.vector_store %arg10[%c0_29, %c0_30], %58 {strides = array<i32>} : memref<8x32xf32, #tpu.memory_space<vmem>>, vector<8x32xf32>,
    return
  }
  func.func @transform_0(%arg0: i32) -> (i32, i32, i32) {
    %c0_i32 = arith.constant 0 : i32
    %c0_i32_0 = arith.constant 0 : i32
    %c0_i32_1 = arith.constant 0 : i32
    return %arg0, %c0_i32, %c0_i32_0 : i32, i32, i32
  }
  func.func @transform_1(%arg0: i32) -> (i32, i32) {
    %c0_i32 = arith.constant 0 : i32
    %c0_i32_0 = arith.constant 0 : i32
    %c0_i32_1 = arith.constant 0 : i32
    return %c0_i32, %c0_i32_0 : i32, i32
  }
  func.func @transform_2(%arg0: i32) -> (i32, i32) {
    %c0_i32 = arith.constant 0 : i32
    %c0_i32_0 = arith.constant 0 : i32
    %c0_i32_1 = arith.constant 0 : i32
    return %c0_i32, %c0_i32_0 : i32, i32
  }
  func.func @transform_3(%arg0: i32) -> (i32, i32) {
    %c0_i32 = arith.constant 0 : i32
    %c0_i32_0 = arith.constant 0 : i32
    %c0_i32_1 = arith.constant 0 : i32
    return %c0_i32, %c0_i32_0 : i32, i32
  }
  func.func @transform_4(%arg0: i32) -> (i32, i32) {
    %c0_i32 = arith.constant 0 : i32
    %c0_i32_0 = arith.constant 0 : i32
    %c0_i32_1 = arith.constant 0 : i32
    return %c0_i32, %c0_i32_0 : i32, i32
  }
  func.func @transform_5(%arg0: i32) -> (i32, i32) {
    %c0_i32 = arith.constant 0 : i32
    %c0_i32_0 = arith.constant 0 : i32
    %c0_i32_1 = arith.constant 0 : i32
    return %c0_i32, %c0_i32_0 : i32, i32
  }
  func.func @transform_6(%arg0: i32) -> (i32, i32) {
    %c0_i32 = arith.constant 0 : i32
    %c0_i32_0 = arith.constant 0 : i32
    %c0_i32_1 = arith.constant 0 : i32
    return %c0_i32, %c0_i32_0 : i32, i32
  }
  func.func @transform_7(%arg0: i32) -> (i32, i32) {
    %c0_i32 = arith.constant 0 : i32
    %c0_i32_0 = arith.constant 0 : i32
    %c0_i32_1 = arith.constant 0 : i32
    return %c0_i32, %c0_i32_0 : i32, i32
  }
  func.func @transform_8(%arg0: i32) -> (i32, i32) {
    %c0_i32 = arith.constant 0 : i32
    %c0_i32_0 = arith.constant 0 : i32
    %c0_i32_1 = arith.constant 0 : i32
    return %c0_i32, %c0_i32_0 : i32, i32
  }
  func.func @transform_9(%arg0: i32) -> (i32, i32) {
    %c0_i32 = arith.constant 0 : i32
    %c0_i32_0 = arith.constant 0 : i32
    return %arg0, %c0_i32 : i32, i32
  }
}

module attributes {stable_mosaic.version = 11 : i64} {
  func.func @fc_fused_kernel(%arg0: i32, %arg1: i32, %arg2: memref<8x1024xf32, #tpu.memory_space<vmem>>, %arg3: memref<1024x128xf32, #tpu.memory_space<vmem>>, %arg4: memref<8x32xf32, #tpu.memory_space<vmem>>, %arg5: memref<32x128xf32, #tpu.memory_space<vmem>>, %arg6: memref<1x128xf32, #tpu.memory_space<vmem>>, %arg7: memref<128x128xf32, #tpu.memory_space<vmem>>, %arg8: memref<1x128xf32, #tpu.memory_space<vmem>>, %arg9: memref<8x128xf32, #tpu.memory_space<vmem>>) attributes {dimension_semantics = [#tpu.dimension_semantics<parallel>, #tpu.dimension_semantics<arbitrary>], iteration_bounds = array<i64: 1, 2>, scalar_prefetch = 0 : i64, scratch_operands = 0 : i64, tpu.core_type = #tpu.core_type<tc>, window_params = [{transform_indices = @transform_0, window_bounds = array<i64: 8, 1024>}, {transform_indices = @transform_1, window_bounds = array<i64: 1024, 128>}, {transform_indices = @transform_2, window_bounds = array<i64: 8, 32>}, {pipeline_mode = #tpu.pipeline_mode<synchronous>, transform_indices = @transform_3, window_bounds = array<i64: 32, 128>}, {pipeline_mode = #tpu.pipeline_mode<synchronous>, transform_indices = @transform_4, window_bounds = array<i64: 1, 128>}, {pipeline_mode = #tpu.pipeline_mode<synchronous>, transform_indices = @transform_5, window_bounds = array<i64: 128, 128>}, {pipeline_mode = #tpu.pipeline_mode<synchronous>, transform_indices = @transform_6, window_bounds = array<i64: 1, 128>}, {transform_indices = @transform_7, window_bounds = array<i64: 8, 128>}]} {
    %c0_i32 = arith.constant 0 : i32
    %0 = arith.cmpi eq, %arg1, %c0_i32 : i32
    %1 = arith.extui %0 : i1 to i32
    %c0_i32_0 = arith.constant 0 : i32
    %2 = arith.cmpi ne, %1, %c0_i32_0 : i32
    scf.if %2 {
      %cst_9 = arith.constant 0.000000e+00 : f32
      %12 = vector.broadcast %cst_9 : f32 to vector<8x128xf32>
      %c0_10 = arith.constant 0 : index
      %c0_11 = arith.constant 0 : index
      %13 = vector.load %arg9[%c0_10, %c0_11] : memref<8x128xf32, #tpu.memory_space<vmem>>, vector<8x128xf32>
      tpu.vector_store %arg9[%c0_10, %c0_11], %12 {strides = array<i32>} : memref<8x128xf32, #tpu.memory_space<vmem>>, vector<8x128xf32>,
    } else {
    }
    %c0 = arith.constant 0 : index
    %c0_1 = arith.constant 0 : index
    %3 = vector.load %arg9[%c0, %c0_1] : memref<8x128xf32, #tpu.memory_space<vmem>>, vector<8x128xf32>
    %c0_2 = arith.constant 0 : index
    %c0_3 = arith.constant 0 : index
    %4 = vector.load %arg2[%c0_2, %c0_3] : memref<8x1024xf32, #tpu.memory_space<vmem>>, vector<8x1024xf32>
    %c0_4 = arith.constant 0 : index
    %c0_5 = arith.constant 0 : index
    %5 = vector.load %arg3[%c0_4, %c0_5] : memref<1024x128xf32, #tpu.memory_space<vmem>>, vector<1024x128xf32>
    %cst = arith.constant dense<0.000000e+00> : vector<8x128xf32>
    %6 = tpu.matmul %4, %5, %cst {dimension_numbers = #tpu.dot_dimension_numbers<[1], [0], [0], [1], [0, 0, 1, 1], [], []>} : vector<8x1024xf32>, vector<1024x128xf32>, vector<8x128xf32> -> vector<8x128xf32>
    %7 = arith.addf %3, %6 : vector<8x128xf32>
    %c0_6 = arith.constant 0 : index
    %c0_7 = arith.constant 0 : index
    %8 = vector.load %arg9[%c0_6, %c0_7] : memref<8x128xf32, #tpu.memory_space<vmem>>, vector<8x128xf32>
    tpu.vector_store %arg9[%c0_6, %c0_7], %7 {strides = array<i32>} : memref<8x128xf32, #tpu.memory_space<vmem>>, vector<8x128xf32>,
    %c1_i32 = arith.constant 1 : i32
    %9 = arith.cmpi eq, %arg1, %c1_i32 : i32
    %10 = arith.extui %9 : i1 to i32
    %c0_i32_8 = arith.constant 0 : i32
    %11 = arith.cmpi ne, %10, %c0_i32_8 : i32
    scf.if %11 {
      %c0_9 = arith.constant 0 : index
      %c0_10 = arith.constant 0 : index
      %12 = vector.load %arg9[%c0_9, %c0_10] : memref<8x128xf32, #tpu.memory_space<vmem>>, vector<8x128xf32>
      %c0_11 = arith.constant 0 : index
      %c0_12 = arith.constant 0 : index
      %13 = vector.load %arg4[%c0_11, %c0_12] : memref<8x32xf32, #tpu.memory_space<vmem>>, vector<8x32xf32>
      %c0_13 = arith.constant 0 : index
      %c0_14 = arith.constant 0 : index
      %14 = vector.load %arg5[%c0_13, %c0_14] : memref<32x128xf32, #tpu.memory_space<vmem>>, vector<32x128xf32>
      %cst_15 = arith.constant dense<0.000000e+00> : vector<8x128xf32>
      %15 = tpu.matmul %13, %14, %cst_15 {dimension_numbers = #tpu.dot_dimension_numbers<[1], [0], [0], [1], [0, 0, 1, 1], [], []>} : vector<8x32xf32>, vector<32x128xf32>, vector<8x128xf32> -> vector<8x128xf32>
      %16 = arith.addf %12, %15 : vector<8x128xf32>
      %c0_16 = arith.constant 0 : index
      %c0_17 = arith.constant 0 : index
      %17 = vector.load %arg6[%c0_16, %c0_17] : memref<1x128xf32, #tpu.memory_space<vmem>>, vector<1x128xf32>
      %18 = vector.broadcast %17 : vector<1x128xf32> to vector<8x128xf32>
      %19 = arith.addf %16, %18 : vector<8x128xf32>
      %cst_18 = arith.constant 0.000000e+00 : f32
      %20 = vector.broadcast %cst_18 : f32 to vector<8x128xf32>
      %21 = arith.maximumf %19, %20 : vector<8x128xf32>
      %c0_19 = arith.constant 0 : index
      %c0_20 = arith.constant 0 : index
      %22 = vector.load %arg7[%c0_19, %c0_20] : memref<128x128xf32, #tpu.memory_space<vmem>>, vector<128x128xf32>
      %cst_21 = arith.constant dense<0.000000e+00> : vector<8x128xf32>
      %23 = tpu.matmul %21, %22, %cst_21 {dimension_numbers = #tpu.dot_dimension_numbers<[1], [0], [0], [1], [0, 0, 1, 1], [], []>} : vector<8x128xf32>, vector<128x128xf32>, vector<8x128xf32> -> vector<8x128xf32>
      %c0_22 = arith.constant 0 : index
      %c0_23 = arith.constant 0 : index
      %24 = vector.load %arg8[%c0_22, %c0_23] : memref<1x128xf32, #tpu.memory_space<vmem>>, vector<1x128xf32>
      %25 = vector.broadcast %24 : vector<1x128xf32> to vector<8x128xf32>
      %26 = arith.addf %23, %25 : vector<8x128xf32>
      %cst_24 = arith.constant 0.000000e+00 : f32
      %27 = vector.broadcast %cst_24 : f32 to vector<8x128xf32>
      %28 = arith.maximumf %26, %27 : vector<8x128xf32>
      %c0_25 = arith.constant 0 : index
      %c0_26 = arith.constant 0 : index
      %29 = vector.load %arg9[%c0_25, %c0_26] : memref<8x128xf32, #tpu.memory_space<vmem>>, vector<8x128xf32>
      tpu.vector_store %arg9[%c0_25, %c0_26], %28 {strides = array<i32>} : memref<8x128xf32, #tpu.memory_space<vmem>>, vector<8x128xf32>,
    } else {
    }
    return
  }
  func.func @transform_0(%arg0: i32, %arg1: i32) -> (i32, i32) {
    %c0_i32 = arith.constant 0 : i32
    return %arg0, %arg1 : i32, i32
  }
  func.func @transform_1(%arg0: i32, %arg1: i32) -> (i32, i32) {
    %c0_i32 = arith.constant 0 : i32
    %c0_i32_0 = arith.constant 0 : i32
    return %arg1, %c0_i32 : i32, i32
  }
  func.func @transform_2(%arg0: i32, %arg1: i32) -> (i32, i32) {
    %c0_i32 = arith.constant 0 : i32
    %c0_i32_0 = arith.constant 0 : i32
    return %arg0, %c0_i32 : i32, i32
  }
  func.func @transform_3(%arg0: i32, %arg1: i32) -> (i32, i32) {
    %c0_i32 = arith.constant 0 : i32
    %c0_i32_0 = arith.constant 0 : i32
    %c0_i32_1 = arith.constant 0 : i32
    return %c0_i32, %c0_i32_0 : i32, i32
  }
  func.func @transform_4(%arg0: i32, %arg1: i32) -> (i32, i32) {
    %c0_i32 = arith.constant 0 : i32
    %c0_i32_0 = arith.constant 0 : i32
    %c0_i32_1 = arith.constant 0 : i32
    return %c0_i32, %c0_i32_0 : i32, i32
  }
  func.func @transform_5(%arg0: i32, %arg1: i32) -> (i32, i32) {
    %c0_i32 = arith.constant 0 : i32
    %c0_i32_0 = arith.constant 0 : i32
    %c0_i32_1 = arith.constant 0 : i32
    return %c0_i32, %c0_i32_0 : i32, i32
  }
  func.func @transform_6(%arg0: i32, %arg1: i32) -> (i32, i32) {
    %c0_i32 = arith.constant 0 : i32
    %c0_i32_0 = arith.constant 0 : i32
    %c0_i32_1 = arith.constant 0 : i32
    return %c0_i32, %c0_i32_0 : i32, i32
  }
  func.func @transform_7(%arg0: i32, %arg1: i32) -> (i32, i32) {
    %c0_i32 = arith.constant 0 : i32
    %c0_i32_0 = arith.constant 0 : i32
    return %arg0, %c0_i32 : i32, i32
  }
}

</mosaic_0001>

<bundles_post_ra>
// kernel: gcnet_forward.2
= control target key start
LH: loop header
LB: loop body
LE: loop exit
PB: predicated region body
PF: predicated region fallthrough
CT: control target
= control target key end

     0   :  { %vm169_vm0 = vcmask 261120   ;;  %v2777_v3 = vmov 0   ;;  %vm511_vm1 = vcmask 130112   ;;  %vm518_vm2 = vcmask 195712   ;;  %s4887_s0 = inlined_call_operand.vmem [shape: f32[8,64,32], index: 0, kind: input, shape index: {}]   ;;  %s4888_s1 = inlined_call_operand.vmem [shape: f32[1,32], index: 1, kind: input, shape index: {}]   ;;  %s4889_s2 = inlined_call_operand.<no memory space> [shape: f32[1,1], index: 2, kind: input, shape index: {}]   ;;  %s4890_s3 = inlined_call_operand.vmem [shape: f32[32,2], index: 3, kind: input, shape index: {}]   ;;  %s4891_s4 = inlined_call_operand.vmem [shape: f32[1,2], index: 4, kind: input, shape index: {}]   ;;  %s4892_s7 = inlined_call_operand.vmem [shape: f32[2,32], index: 7, kind: input, shape index: {}]   ;;  %s4893_s5 = inlined_call_operand.vmem [shape: f32[1,2], index: 5, kind: input, shape index: {}]   ;;  %s4894_s6 = inlined_call_operand.vmem [shape: f32[1,2], index: 6, kind: input, shape index: {}]   ;;  %s4895_s8 = inlined_call_operand.vmem [shape: f32[1,32], index: 8, kind: input, shape index: {}]   ;;  %s4896_s9 = inlined_call_operand.vmem [shape: f32[8,32], index: 9, kind: output, shape index: {}]  }
   0x1   :  { %v42_v0 = vld [vmem:[%s4887_s0 + $0x40] sm:$0xff]  ;;  %2579 = vset.pattern.permute.xlu1 %v2777_v3  ;;  %v14_v4 = vstv %s4889_s2  ;;  %2580 = vset.pattern.permute.xlu0 %v2777_v3  ;;  %v43_v7 = vld [vmem:[%s4887_s0 + $0x48] sm:$0xff]  ;;  %v44_v11 = vld [vmem:[%s4887_s0 + $0x50] sm:$0xff]  ;;  %vm525_vm3 = vcmask 261312   ;;  %vm532_vm4 = vcmask 326912   ;;  %vm539_vm5 = vcmask 392512  }
   0x2   :  { %v2837_v1 = vld [vmem:[%s4888_s1] ss:$0 sm:$0xff]  ;;  %v35_v8 = vld [vmem:[%s4887_s0 + $0x8] sm:$0xff]  ;;  %15 = vst [vmem:[#allocation2] sm:$0x1] %v14_v4  ;;  %v36_v12 = vld [vmem:[%s4887_s0 + $0x10] sm:$0xff] }
   0x3   :  { %v34_v2 = vld [vmem:[%s4887_s0] sm:$0xff]  ;;  %v113_v5 = vmul.f32 %v2837_v1, %v42_v0  ;;  %v114_v9 = vmul.f32 %v2837_v1, %v43_v7  ;;  %v106_v10 = vmul.f32 %v2837_v1, %v35_v8  ;;  %v115_v17 = vmul.f32 %v2837_v1, %v44_v11  ;;  %v51_v19 = vld [vmem:[%s4887_s0 + $0x88] sm:$0xff]  ;;  %v45_v25 = vld [vmem:[%s4887_s0 + $0x58] sm:$0xff] }
   0x4   :  { %v105_v6 = vmul.f32 %v2837_v1, %v34_v2  ;;  %v107_v18 = vmul.f32 %v2837_v1, %v36_v12  ;;  %v50_v20 = vld [vmem:[%s4887_s0 + $0x80] sm:$0xff]  ;;  %v122_v23 = vmul.f32 %v2837_v1, %v51_v19  ;;  %v37_v26 = vld [vmem:[%s4887_s0 + $0x18] sm:$0xff]  ;;  %v116_v29 = vmul.f32 %v2837_v1, %v45_v25  ;;  %v52_v32 = vld [vmem:[%s4887_s0 + $0x90] sm:$0xff] }
   0x5   :  { %v194_v13 = vsel %vm169_vm0, %v113_v5, 0.0  ;;  %v197_v15 = vsel %vm169_vm0, %v114_v9, 0.0  ;;  %v173_v16 = vsel %vm169_vm0, %v106_v10, 0.0  ;;  %v200_v21 = vsel %vm169_vm0, %v115_v17, 0.0  ;;  %v58_v31 = vld [vmem:[%s4887_s0 + $0xc0] sm:$0xff]  ;;  %v59_v38 = vld [vmem:[%s4887_s0 + $0xc8] sm:$0xff] }
   0x6   :  { %v170_v14 = vsel %vm169_vm0, %v105_v6, 0.0  ;;  %195 = vadd.xlane.f32.xlu1 %v194_v13  ;;  %v176_v22 = vsel %vm169_vm0, %v107_v18, 0.0  ;;  %v121_v24 = vmul.f32 %v2837_v1, %v50_v20  ;;  %v221_v27 = vsel %vm169_vm0, %v122_v23, 0.0  ;;  %v38_v37 = vld [vmem:[%s4887_s0 + $0x20] sm:$0xff]  ;;  %v53_v43 = vld [vmem:[%s4887_s0 + $0x98] sm:$0xff]  ;;  %v60_v50 = vld [vmem:[%s4887_s0 + $0xd0] sm:$0xff] }
   0x7   :  { %171 = vadd.xlane.f32.xlu0 %v170_v14  ;;  %v108_v30 = vmul.f32 %v2837_v1, %v37_v26  ;;  %v203_v33 = vsel %vm169_vm0, %v116_v29, 0.0  ;;  %v129_v35 = vmul.f32 %v2837_v1, %v58_v31  ;;  %v123_v36 = vmul.f32 %v2837_v1, %v52_v32  ;;  %v46_v44 = vld [vmem:[%s4887_s0 + $0x60] sm:$0xff]  ;;  %v39_v55 = vld [vmem:[%s4887_s0 + $0x28] sm:$0xff]  ;;  %v68_v4 = vld [vmem:[%s4887_s0 + $0x110] sm:$0xff] }
   0x8   :  { %v218_v28 = vsel %vm169_vm0, %v121_v24, 0.0  ;;  %v109_v41 = vmul.f32 %v2837_v1, %v38_v37  ;;  %v130_v42 = vmul.f32 %v2837_v1, %v59_v38  ;;  %v124_v47 = vmul.f32 %v2837_v1, %v53_v43  ;;  %v66_v49 = vld [vmem:[%s4887_s0 + $0x100] sm:$0xff]  ;;  %v67_v56 = vld [vmem:[%s4887_s0 + $0x108] sm:$0xff]  ;;  %v61_v5 = vld [vmem:[%s4887_s0 + $0xd8] sm:$0xff] }
   0x9   :  { %v179_v34 = vsel %vm169_vm0, %v108_v30, 0.0  ;;  %v242_v39 = vsel %vm169_vm0, %v129_v35, 0.0  ;;  %v224_v40 = vsel %vm169_vm0, %v123_v36, 0.0  ;;  %v117_v48 = vmul.f32 %v2837_v1, %v46_v44  ;;  %v54_v61 = vld [vmem:[%s4887_s0 + $0xa0] sm:$0xff]  ;;  %v47_v62 = vld [vmem:[%s4887_s0 + $0x68] sm:$0xff]  ;;  %v40_v17 = vld [vmem:[%s4887_s0 + $0x30] sm:$0xff] }
   0xa   :  { %198 = vadd.xlane.f32.xlu1 %v197_v15  ;;  %v182_v45 = vsel %vm169_vm0, %v109_v41, 0.0  ;;  %v245_v46 = vsel %vm169_vm0, %v130_v42, 0.0  ;;  %v227_v51 = vsel %vm169_vm0, %v124_v47, 0.0  ;;  %v137_v53 = vmul.f32 %v2837_v1, %v66_v49  ;;  %v75_v10 = vld [vmem:[%s4887_s0 + $0x148] sm:$0xff]  ;;  %v74_v11 = vld [vmem:[%s4887_s0 + $0x140] sm:$0xff]  ;;  %v69_v29 = vld [vmem:[%s4887_s0 + $0x118] sm:$0xff] }
   0xb   :  { %174 = vadd.xlane.f32.xlu0 %v173_v16  ;;  %v206_v52 = vsel %vm169_vm0, %v117_v48, 0.0  ;;  %v131_v54 = vmul.f32 %v2837_v1, %v60_v50  ;;  %v110_v59 = vmul.f32 %v2837_v1, %v39_v55  ;;  %v138_v60 = vmul.f32 %v2837_v1, %v67_v56  ;;  %v48_v16 = vld [vmem:[%s4887_s0 + $0x70] sm:$0xff]  ;;  %v55_v23 = vld [vmem:[%s4887_s0 + $0xa8] sm:$0xff]  ;;  %v82_v35 = vld [vmem:[%s4887_s0 + $0x180] sm:$0xff] }
   0xc   :  { %v266_v57 = vsel %vm169_vm0, %v137_v53, 0.0  ;;  %v125_v2 = vmul.f32 %v2837_v1, %v54_v61  ;;  %v118_v3 = vmul.f32 %v2837_v1, %v47_v62  ;;  %v139_v8 = vmul.f32 %v2837_v1, %v68_v4  ;;  %v41_v41 = vld [vmem:[%s4887_s0 + $0x38] sm:$0xff]  ;;  %v56_v47 = vld [vmem:[%s4887_s0 + $0xb0] sm:$0xff]  ;;  %v70_v53 = vld [vmem:[%s4887_s0 + $0x120] sm:$0xff] }
   0xd   :  { %v248_v58 = vsel %vm169_vm0, %v131_v54, 0.0  ;;  %v185_v63 = vsel %vm169_vm0, %v110_v59, 0.0  ;;  %v269_v0 = vsel %vm169_vm0, %v138_v60, 0.0  ;;  %v132_v9 = vmul.f32 %v2837_v1, %v61_v5  ;;  %v84_v59 = vld [vmem:[%s4887_s0 + $0x190] sm:$0xff] }
   0xe   :  { %201 = vadd.xlane.f32.xlu1 %v200_v21  ;;  %v230_v6 = vsel %vm169_vm0, %v125_v2, 0.0  ;;  %v209_v7 = vsel %vm169_vm0, %v118_v3, 0.0  ;;  %v272_v12 = vsel %vm169_vm0, %v139_v8, 0.0  ;;  %v146_v14 = vmul.f32 %v2837_v1, %v75_v10  ;;  %v91_v2 = vld [vmem:[%s4887_s0 + $0x1c8] sm:$0xff]  ;;  %v64_v8 = vld [vmem:[%s4887_s0 + $0xf0] sm:$0xff] }
   0xf   :  { %177 = vadd.xlane.f32.xlu0 %v176_v22  ;;  %v251_v13 = vsel %vm169_vm0, %v132_v9, 0.0  ;;  %v145_v15 = vmul.f32 %v2837_v1, %v74_v11  ;;  %v119_v20 = vmul.f32 %v2837_v1, %v48_v16  ;;  %v111_v21 = vmul.f32 %v2837_v1, %v40_v17  ;;  %v62_v22 = vld [vmem:[%s4887_s0 + $0xe0] sm:$0xff] }
  0x10   :  { %v293_v18 = vsel %vm169_vm0, %v146_v14, 0.0  ;;  %v133_v26 = vmul.f32 %v2837_v1, %v62_v22  ;;  %v78_v14 = vld [vmem:[%s4887_s0 + $0x160] sm:$0xff]  ;;  %vm546_vm6 = vcmask 458112   ;;  %vm553_vm7 = vcmask 523712  }
  0x11   :  { %v290_v19 = vsel %vm169_vm0, %v145_v15, 0.0  ;;  %v212_v24 = vsel %vm169_vm0, %v119_v20, 0.0  ;;  %v188_v25 = vsel %vm169_vm0, %v111_v21, 0.0  ;;  %vm828_vm8 = vcmask 1041409  }
  0x12   :  { %222 = vadd.xlane.f32.xlu1 %v221_v27  ;;  %v126_v27 = vmul.f32 %v2837_v1, %v55_v23  ;;  %v254_v30 = vsel %vm169_vm0, %v133_v26, 0.0  ;;  %v65_v23 = vld [vmem:[%s4887_s0 + $0xf8] sm:$0xff]  ;;  %v72_v26 = vld [vmem:[%s4887_s0 + $0x130] sm:$0xff]  ;;  %vm830_vm9 = vcmask 1042434   ;;  %vm832_vm10 = vcmask 1043459  }
  0x13   :  { %219 = vadd.xlane.f32.xlu0 %v218_v28  ;;  %v76_v28 = vld [vmem:[%s4887_s0 + $0x150] sm:$0xff]  ;;  %vm834_vm11 = vcmask 1044484   ;;  %vm836_vm12 = vcmask 1045509   ;;  %vm838_vm13 = vcmask 1046534   ;;  %vm840_vm14 = vcmask 1047559  }
  0x14   :  { %v233_v31 = vsel %vm169_vm0, %v126_v27, 0.0  ;;  %v147_v32 = vmul.f32 %v2837_v1, %v76_v28  ;;  %v143_v28 = vmul.f32 %v2837_v1, %v72_v26  ;;  %vm843_vm15 = vcmask 523264  }
  0x16   :  { %204 = vadd.xlane.f32.xlu1 %v203_v33  ;;  %v140_v33 = vmul.f32 %v2837_v1, %v69_v29  ;;  %v296_v36 = vsel %vm169_vm0, %v147_v32, 0.0  ;;  %v79_v29 = vld [vmem:[%s4887_s0 + $0x168] sm:$0xff]  ;;  %v86_v32 = vld [vmem:[%s4887_s0 + $0x1a0] sm:$0xff] }
  0x17   :  { %180 = vadd.xlane.f32.xlu0 %v179_v34  ;;  %v83_v34 = vld [vmem:[%s4887_s0 + $0x188] sm:$0xff] }
  0x18   :  { %v275_v37 = vsel %vm169_vm0, %v140_v33, 0.0  ;;  %v154_v38 = vmul.f32 %v2837_v1, %v83_v34  ;;  %v157_v34 = vmul.f32 %v2837_v1, %v86_v32 }
  0x1a   :  { %243 = vadd.xlane.f32.xlu1 %v242_v39  ;;  %v153_v39 = vmul.f32 %v2837_v1, %v82_v35  ;;  %v317_v42 = vsel %vm169_vm0, %v154_v38, 0.0  ;;  %v2538_v35 = vld [vmem:[#allocation2] ss:$0 sm:$0xff] }
  0x1b   :  { %225 = vadd.xlane.f32.xlu0 %v224_v40  ;;  %v49_v40 = vld [vmem:[%s4887_s0 + $0x78] sm:$0xff] }
  0x1c   :  { %v314_v43 = vsel %vm169_vm0, %v153_v39, 0.0  ;;  %v120_v44 = vmul.f32 %v2837_v1, %v49_v40  ;;  %v80_v39 = vld [vmem:[%s4887_s0 + $0x170] sm:$0xff] }
  0x1e   :  { %183 = vadd.xlane.f32.xlu1 %v182_v45  ;;  %v112_v45 = vmul.f32 %v2837_v1, %v41_v41  ;;  %v215_v48 = vsel %vm169_vm0, %v120_v44, 0.0  ;;  %v151_v41 = vmul.f32 %v2837_v1, %v80_v39 }
  0x1f   :  { %246 = vadd.xlane.f32.xlu0 %v245_v46  ;;  %v63_v46 = vld [vmem:[%s4887_s0 + $0xe8] sm:$0xff] }
  0x20   :  { %v191_v49 = vsel %vm169_vm0, %v112_v45, 0.0  ;;  %v134_v50 = vmul.f32 %v2837_v1, %v63_v46  ;;  %v94_v45 = vld [vmem:[%s4887_s0 + $0x1e0] sm:$0xff] }
  0x22   :  { %228 = vadd.xlane.f32.xlu1 %v227_v51  ;;  %v127_v51 = vmul.f32 %v2837_v1, %v56_v47  ;;  %v257_v54 = vsel %vm169_vm0, %v134_v50, 0.0  ;;  %v165_v47 = vmul.f32 %v2837_v1, %v94_v45 }
  0x23   :  { %207 = vadd.xlane.f32.xlu0 %v206_v52  ;;  %v77_v52 = vld [vmem:[%s4887_s0 + $0x158] sm:$0xff] }
  0x24   :  { %v236_v55 = vsel %vm169_vm0, %v127_v51, 0.0  ;;  %v148_v56 = vmul.f32 %v2837_v1, %v77_v52  ;;  %v88_v51 = vld [vmem:[%s4887_s0 + $0x1b0] sm:$0xff] }
  0x26   :  { %267 = vadd.xlane.f32.xlu1 %v266_v57  ;;  %v141_v57 = vmul.f32 %v2837_v1, %v70_v53  ;;  %v299_v60 = vsel %vm169_vm0, %v148_v56, 0.0  ;;  %v159_v53 = vmul.f32 %v2837_v1, %v88_v51 }
  0x27   :  { %249 = vadd.xlane.f32.xlu0 %v248_v58  ;;  %v90_v58 = vld [vmem:[%s4887_s0 + $0x1c0] sm:$0xff] }
  0x28   :  { %v278_v61 = vsel %vm169_vm0, %v141_v57, 0.0  ;;  %v161_v62 = vmul.f32 %v2837_v1, %v90_v58  ;;  %v89_v57 = vld [vmem:[%s4887_s0 + $0x1b8] sm:$0xff] }
  0x29   :  { %v93_v58 = vld [vmem:[%s4887_s0 + $0x1d8] sm:$0xff] }
  0x2a   :  { %186 = vadd.xlane.f32.xlu1 %v185_v63  ;;  %v155_v63 = vmul.f32 %v2837_v1, %v84_v59  ;;  %v338_v3 = vsel %vm169_vm0, %v161_v62, 0.0  ;;  %v96_v62 = vld [vmem:[%s4887_s0 + $0x1f0] sm:$0xff] }
  0x2b   :  { %270 = vadd.xlane.f32.xlu0 %v269_v0  ;;  %v57_v0 = vld [vmem:[%s4887_s0 + $0xb8] sm:$0xff] }
  0x2c   :  { %v320_v4 = vsel %vm169_vm0, %v155_v63, 0.0  ;;  %v128_v5 = vmul.f32 %v2837_v1, %v57_v0  ;;  %v97_v63 = vld [vmem:[%s4887_s0 + $0x1f8] sm:$0xff] }
  0x2e   :  { %231 = vadd.xlane.f32.xlu1 %v230_v6  ;;  %v162_v6 = vmul.f32 %v2837_v1, %v91_v2  ;;  %v239_v9 = vsel %vm169_vm0, %v128_v5, 0.0 }
  0x2f   :  { %210 = vadd.xlane.f32.xlu0 %v209_v7  ;;  %v71_v7 = vld [vmem:[%s4887_s0 + $0x128] sm:$0xff] }
  0x30   :  { %v341_v10 = vsel %vm169_vm0, %v162_v6, 0.0  ;;  %v142_v11 = vmul.f32 %v2837_v1, %v71_v7  ;;  %v168_v6 = vmul.f32 %v2837_v1, %v97_v63 }
  0x32   :  { %273 = vadd.xlane.f32.xlu1 %v272_v12  ;;  %v135_v12 = vmul.f32 %v2837_v1, %v64_v8  ;;  %v281_v15 = vsel %vm169_vm0, %v142_v11, 0.0 }
  0x33   :  { %252 = vadd.xlane.f32.xlu0 %v251_v13  ;;  %v85_v13 = vld [vmem:[%s4887_s0 + $0x198] sm:$0xff] }
  0x34   :  { %v260_v16 = vsel %vm169_vm0, %v135_v12, 0.0  ;;  %v156_v17 = vmul.f32 %v2837_v1, %v85_v13 }
  0x36   :  { %294 = vadd.xlane.f32.xlu1 %v293_v18  ;;  %v149_v18 = vmul.f32 %v2837_v1, %v78_v14  ;;  %v323_v20 = vsel %vm169_vm0, %v156_v17, 0.0 }
  0x37   :  { %291 = vadd.xlane.f32.xlu0 %v290_v19  ;;  %v92_v19 = vld [vmem:[%s4887_s0 + $0x1d0] sm:$0xff] }
  0x38   :  { %v302_v21 = vsel %vm169_vm0, %v149_v18, 0.0  ;;  %v163_v22 = vmul.f32 %v2837_v1, %v92_v19 }
  0x3a   :  { %213 = vadd.xlane.f32.xlu1 %v212_v24  ;;  %v344_v24 = vsel %vm169_vm0, %v163_v22, 0.0 }
  0x3b   :  { %189 = vadd.xlane.f32.xlu0 %v188_v25  ;;  %v136_v25 = vmul.f32 %v2837_v1, %v65_v23 }
  0x3d   :  { %v263_v27 = vsel %vm169_vm0, %v136_v25, 0.0 }
  0x3e   :  { %255 = vadd.xlane.f32.xlu1 %v254_v30  ;;  %v284_v30 = vsel %vm169_vm0, %v143_v28, 0.0 }
  0x3f   :  { %234 = vadd.xlane.f32.xlu0 %v233_v31  ;;  %v150_v31 = vmul.f32 %v2837_v1, %v79_v29 }
  0x41   :  { %v305_v33 = vsel %vm169_vm0, %v150_v31, 0.0 }
  0x42   :  { %297 = vadd.xlane.f32.xlu1 %v296_v36  ;;  %v73_v36 = vld [vmem:[%s4887_s0 + $0x138] sm:$0xff] }
  0x43   :  { %276 = vadd.xlane.f32.xlu0 %v275_v37  ;;  %v326_v37 = vsel %vm169_vm0, %v157_v34, 0.0  ;;  %v144_v38 = vmul.f32 %v2837_v1, %v73_v36 }
  0x45   :  { %v287_v40 = vsel %vm169_vm0, %v144_v38, 0.0 }
  0x46   :  { %318 = vadd.xlane.f32.xlu1 %v317_v42  ;;  %v87_v42 = vld [vmem:[%s4887_s0 + $0x1a8] sm:$0xff] }
  0x47   :  { %315 = vadd.xlane.f32.xlu0 %v314_v43  ;;  %v308_v43 = vsel %vm169_vm0, %v151_v41, 0.0  ;;  %v158_v44 = vmul.f32 %v2837_v1, %v87_v42 }
  0x49   :  { %v329_v46 = vsel %vm169_vm0, %v158_v44, 0.0 }
  0x4a   :  { %216 = vadd.xlane.f32.xlu1 %v215_v48  ;;  %v81_v48 = vld [vmem:[%s4887_s0 + $0x178] sm:$0xff] }
  0x4b   :  { %192 = vadd.xlane.f32.xlu0 %v191_v49  ;;  %v350_v49 = vsel %vm169_vm0, %v165_v47, 0.0  ;;  %v152_v50 = vmul.f32 %v2837_v1, %v81_v48 }
  0x4d   :  { %v311_v52 = vsel %vm169_vm0, %v152_v50, 0.0  ;;  %v500_v50 = vlaneseq }
  0x4e   :  { %258 = vadd.xlane.f32.xlu1 %v257_v54  ;;  %v95_v54 = vld [vmem:[%s4887_s0 + $0x1e8] sm:$0xff] }
  0x4f   :  { %237 = vadd.xlane.f32.xlu0 %v236_v55  ;;  %v332_v55 = vsel %vm169_vm0, %v159_v53, 0.0  ;;  %v166_v56 = vmul.f32 %v2837_v1, %v95_v54  ;;  %v501_v53 = vand.u32 127, %v500_v50 }
  0x51   :  { %v353_v59 = vsel %vm169_vm0, %v166_v56, 0.0  ;;  %v3235_v56 = vshrl.u32 %v500_v50, 7 }
  0x52   :  { %300 = vadd.xlane.f32.xlu1 %v299_v60  ;;  %v160_v60 = vmul.f32 %v2837_v1, %v89_v57  ;;  %v506_v57 = vadd.s32 4294967288, %v501_v53 }
  0x53   :  { %279 = vadd.xlane.f32.xlu0 %v278_v61  ;;  %v164_v61 = vmul.f32 %v2837_v1, %v93_v58  ;;  %5010 = vst [vmem:[#allocation6_spill] sm:$0xff] %v3235_v56  ;;  %v513_v58 = vadd.s32 4294967280, %v501_v53 }
  0x55   :  { %v347_v5 = vsel %vm169_vm0, %v164_v61, 0.0  ;;  %v3243_v61 = vsub.s32 %v506_v57, %v3235_v56  ;;  %v3246_v63 = vsub.s32 %v513_v58, %v3235_v56 }
  0x56   :  { %339 = vadd.xlane.f32.xlu1 %v338_v3  ;;  %v335_v3 = vsel %vm169_vm0, %v160_v60, 0.0  ;;  %v3240_v60 = vsub.s32 %v501_v53, %v3235_v56 }
  0x57   :  { %321 = vadd.xlane.f32.xlu0 %v320_v4  ;;  %v167_v4 = vmul.f32 %v2837_v1, %v96_v62  ;;  %5012 = vst [vmem:[#allocation8_spill] sm:$0xff] %v3243_v61  ;;  %5013 = vst [vmem:[#allocation9_spill] sm:$0xff] %v3246_v63 }
  0x58   :  { %5011 = vst [vmem:[#allocation7_spill] sm:$0xff] %v3240_v60 }
  0x5a   :  { %240 = vadd.xlane.f32.xlu1 %v239_v9  ;;  %v356_v9 = vsel %vm169_vm0, %v167_v4, 0.0 }
  0x5b   :  { %342 = vadd.xlane.f32.xlu0 %v341_v10  ;;  %v359_v10 = vsel %vm169_vm0, %v168_v6, 0.0  ;;  %v520_v6 = vadd.s32 4294967272, %v501_v53 }
  0x5e   :  { %282 = vadd.xlane.f32.xlu1 %v281_v15 }
  0x5f   :  { %261 = vadd.xlane.f32.xlu0 %v260_v16 }
  0x62   :  { %324 = vadd.xlane.f32.xlu1 %v323_v20 }
  0x63   :  { %303 = vadd.xlane.f32.xlu0 %v302_v21 }
  0x67   :  { %345 = vadd.xlane.f32.xlu0 %v344_v24 }
  0x6b   :  { %264 = vadd.xlane.f32.xlu0 %v263_v27 }
  0x6f   :  { %285 = vadd.xlane.f32.xlu0 %v284_v30 }
  0x73   :  { %306 = vadd.xlane.f32.xlu0 %v305_v33  ;;  %369 = vperm.xlu1 %2579, %v2538_v35  }
  0x77   :  { %327 = vadd.xlane.f32.xlu0 %v326_v37 }
  0x7b   :  { %288 = vadd.xlane.f32.xlu0 %v287_v40 }
  0x7f   :  { %309 = vadd.xlane.f32.xlu0 %v308_v43 }
  0x83   :  { %330 = vadd.xlane.f32.xlu0 %v329_v46 }
  0x87   :  { %351 = vadd.xlane.f32.xlu0 %v350_v49 }
  0x8b   :  { %312 = vadd.xlane.f32.xlu0 %v311_v52 }
  0x8f   :  { %333 = vadd.xlane.f32.xlu0 %v332_v55 }
  0x93   :  { %354 = vadd.xlane.f32.xlu0 %v353_v59  ;;  %v3153_v0 = vpop.xlane.xlu1 %195 }
  0x94   :  { %v3155_v2 = vpop.xlane.xlu0 %171 }
  0x97   :  { %336 = vadd.xlane.f32.xlu0 %v335_v3  ;;  %v3161_v7 = vpop.xlane.xlu1 %198  ;;  %348 = vadd.xlane.f32.xlu1 %v347_v5 }
  0x98   :  { %v3163_v8 = vpop.xlane.xlu0 %174 }
  0x9b   :  { %357 = vadd.xlane.f32.xlu0 %v356_v9  ;;  %v3167_v11 = vpop.xlane.xlu1 %201  ;;  %360 = vadd.xlane.f32.xlu1 %v359_v10  ;;  %v527_v9 = vadd.s32 4294967264, %v501_v53 }
  0x9c   :  { %v3169_v12 = vpop.xlane.xlu0 %177 }
  0x9f   :  { %v3171_v13 = vpop.xlane.xlu1 %222 }
  0xa0   :  { %v3173_v14 = vpop.xlane.xlu0 %219 }
  0xa3   :  { %v3175_v1 = vpop.xlane.xlu1 %204 }
  0xa4   :  { %v3177_v15 = vpop.xlane.xlu0 %180 }
  0xa7   :  { %v244_v16 = vpop.xlane.xlu1 %243 }
  0xa8   :  { %v3179_v17 = vpop.xlane.xlu0 %225 }
  0xab   :  { %v3181_v18 = vpop.xlane.xlu1 %183 }
  0xac   :  { %v247_v19 = vpop.xlane.xlu0 %246 }
  0xaf   :  { %v3183_v20 = vpop.xlane.xlu1 %228 }
  0xb0   :  { %v3185_v21 = vpop.xlane.xlu0 %207 }
  0xb3   :  { %v3187_v22 = vpop.xlane.xlu1 %267 }
  0xb4   :  { %v250_v23 = vpop.xlane.xlu0 %249 }
  0xb7   :  { %v3189_v24 = vpop.xlane.xlu1 %186 }
  0xb8   :  { %v271_v25 = vpop.xlane.xlu0 %270 }
  0xbb   :  { %v3191_v26 = vpop.xlane.xlu1 %231 }
  0xbc   :  { %v3193_v27 = vpop.xlane.xlu0 %210 }
  0xbf   :  { %v3195_v28 = vpop.xlane.xlu1 %273 }
  0xc0   :  { %v253_v29 = vpop.xlane.xlu0 %252 }
  0xc3   :  { %v3197_v30 = vpop.xlane.xlu1 %294 }
  0xc4   :  { %v3199_v31 = vpop.xlane.xlu0 %291 }
  0xc7   :  { %v3201_v32 = vpop.xlane.xlu1 %213 }
  0xc8   :  { %v3203_v33 = vpop.xlane.xlu0 %189 }
  0xcb   :  { %v256_v34 = vpop.xlane.xlu1 %255 }
  0xcc   :  { %v3205_v35 = vpop.xlane.xlu0 %234 }
  0xcf   :  { %v3207_v36 = vpop.xlane.xlu1 %297 }
  0xd0   :  { %v3209_v37 = vpop.xlane.xlu0 %276 }
  0xd3   :  { %v3211_v38 = vpop.xlane.xlu1 %318 }
  0xd4   :  { %v3213_v39 = vpop.xlane.xlu0 %315 }
  0xd7   :  { %v3215_v40 = vpop.xlane.xlu1 %216 }
  0xd8   :  { %5007 = vst [vmem:[#allocation3_spill] sm:$0xff] %v3215_v40  ;;  %v3217_v41 = vpop.xlane.xlu0 %192  ;;  %v541_v40 = vadd.s32 4294967248, %v501_v53 }
  0xdb   :  { %v259_v42 = vpop.xlane.xlu1 %258 }
  0xdc   :  { %v3219_v43 = vpop.xlane.xlu0 %237 }
  0xdd   :  { %5008 = vst [vmem:[#allocation4_spill] sm:$0xff] %v3219_v43 }
  0xdf   :  { %v3221_v44 = vpop.xlane.xlu1 %300 }
  0xe0   :  { %v3223_v45 = vpop.xlane.xlu0 %279 }
  0xe3   :  { %v340_v46 = vpop.xlane.xlu1 %339 }
  0xe4   :  { %v3225_v47 = vpop.xlane.xlu0 %321 }
  0xe7   :  { %v3227_v48 = vpop.xlane.xlu1 %240 }
  0xe8   :  { %5009 = vst [vmem:[#allocation5_spill] sm:$0xff] %v3227_v48  ;;  %v343_v49 = vpop.xlane.xlu0 %342  ;;  %v534_v48 = vadd.s32 4294967256, %v501_v53 }
  0xeb   :  { %v3229_v51 = vpop.xlane.xlu1 %282 }
  0xec   :  { %v262_v52 = vpop.xlane.xlu0 %261 }
  0xef   :  { %v3231_v54 = vpop.xlane.xlu1 %324 }
  0xf0   :  { %v3233_v55 = vpop.xlane.xlu0 %303 }
  0xf3   :  { %v3237_v59 = vpop.permute.xlu1 %369 }
  0xf4   :  { %v346_v62 = vpop.xlane.xlu0 %345  ;;  %v3249_v3 = vadd.f32 %v3237_v59, %v244_v16  ;;  %v3252_v4 = vadd.f32 %v3237_v59, %v247_v19  ;;  %v3255_v5 = vadd.f32 %v3237_v59, %v250_v23  ;;  %v3264_v19 = vadd.f32 %v3237_v59, %v253_v29 }
  0xf5   :  { %v3267_v23 = vsub.s32 %v520_v6, %v3235_v56  ;;  %v3271_v43 = vadd.f32 %v3237_v59, %v256_v34  ;;  %v3279_v29 = vadd.f32 %v3237_v59, %v3187_v22  ;;  %v3282_v6 = vadd.f32 %v3237_v59, %v271_v25 }
  0xf6   :  { %5014 = vst [vmem:[#allocation10_spill] sm:$0xff] %v3249_v3  ;;  %5015 = vst [vmem:[#allocation11_spill] sm:$0xff] %v3252_v4  ;;  %v636_v10 = vrot.slane %v3249_v3, %v3240_v60  ;;  %v640_v50 = vrot.slane %v3252_v4, %v3243_v61  ;;  %v645_v16 = vrot.slane %v3255_v5, %v3246_v63 }
  0xf7   :  { %5016 = vst [vmem:[#allocation12_spill] sm:$0xff] %v3255_v5  ;;  %5017 = vst [vmem:[#allocation13_spill] sm:$0xff] %v3264_v19  ;;  %v3274_v3 = vsub.s32 %v527_v9, %v3235_v56  ;;  %v650_v34 = vrot.slane %v3264_v19, %v3267_v23  ;;  %v3290_v9 = vadd.f32 %v3237_v59, %v343_v49 }
  0xf8   :  { %v265_v57 = vpop.xlane.xlu0 %264  ;;  %v641_v58 = vsel %vm511_vm1, %v640_v50, %v636_v10  ;;  %5018 = vst [vmem:[#allocation14_spill] sm:$0xff] %v3271_v43  ;;  %5019 = vst [vmem:[#allocation15_spill] sm:$0xff] %v3279_v29  ;;  %v548_v10 = vadd.s32 4294967240, %v501_v53  ;;  %v3287_v50 = vadd.f32 %v3237_v59, %v340_v46  ;;  %v3296_v22 = vadd.f32 %v3237_v59, %v259_v42 }
  0xf9   :  { %v646_v5 = vsel %vm518_vm2, %v645_v16, %v641_v58  ;;  %5021 = vst [vmem:[#allocation17_spill] sm:$0xff] %v3290_v9  ;;  %v3293_v16 = vsub.s32 %v534_v48, %v3235_v56  ;;  %v655_v53 = vrot.slane %v3271_v43, %v3274_v3  ;;  %v3303_v58 = vadd.f32 %v3237_v59, %v3195_v28 }
  0xfa   :  { %5020 = vst [vmem:[#allocation16_spill] sm:$0xff] %v3287_v50  ;;  %5022 = vst [vmem:[#allocation18_spill] sm:$0xff] %v3296_v22  ;;  %v651_v25 = vsel %vm525_vm3, %v650_v34, %v646_v5  ;;  %v675_v49 = vrot.slane %v3279_v29, %v3240_v60  ;;  %v679_v48 = vrot.slane %v3282_v6, %v3243_v61 }
  0xfb   :  { %5023 = vst [vmem:[#allocation19_spill] sm:$0xff] %v3303_v58  ;;  %v3311_v42 = vadd.f32 %v3237_v59, %v3199_v31  ;;  %v3315_v5 = vadd.f32 %v3237_v59, %v3197_v30  ;;  %v3318_v34 = vsub.s32 %v541_v40, %v3235_v56  ;;  %v3321_v28 = vsub.s32 %v548_v10, %v3235_v56 }
  0xfc   :  { %v286_v4 = vpop.xlane.xlu0 %285  ;;  %v792_v43 = vrot.slane %v3287_v50, %v3240_v60  ;;  %v3326_v29 = vadd.f32 %v3237_v59, %v346_v62  ;;  %v3329_v31 = vadd.f32 %v3237_v59, %v262_v52  ;;  %v656_v19 = vsel %vm532_vm4, %v655_v53, %v651_v25 }
  0xfd   :  { %5024 = vst [vmem:[#allocation20_spill] sm:$0xff] %v3315_v5  ;;  %v796_v30 = vrot.slane %v3290_v9, %v3243_v61  ;;  %v660_v40 = vrot.slane %v3296_v22, %v3293_v16  ;;  %v684_v10 = vrot.slane %v3303_v58, %v3246_v63  ;;  %v3340_v50 = vadd.f32 %v3237_v59, %v3207_v36 }
  0xfe   :  { %5025 = vst [vmem:[#allocation21_spill] sm:$0xff] %v3326_v29  ;;  %5026 = vst [vmem:[#allocation22_spill] sm:$0xff] %v3329_v31  ;;  %v3344_v52 = vadd.f32 %v3237_v59, %v3209_v37  ;;  %v680_v25 = vsel %vm511_vm1, %v679_v48, %v675_v49  ;;  %v714_v53 = vrot.slane %v3311_v42, %v3240_v60 }
  0xff   :  { %5027 = vst [vmem:[#allocation23_spill] sm:$0xff] %v3340_v50  ;;  %v718_v22 = vrot.slane %v3315_v5, %v3243_v61  ;;  %v661_v9 = vsel %vm539_vm5, %v660_v40, %v656_v19  ;;  %v3353_v36 = vadd.f32 %v3237_v59, %v265_v57  ;;  %v801_v58 = vrot.slane %v3326_v29, %v3246_v63 }
 0x100   :  { %v307_v46 = vpop.xlane.xlu0 %306  ;;  %5028 = vst [vmem:[#allocation24_spill] sm:$0xff] %v3344_v52  ;;  %v665_v37 = vrot.slane %v3329_v31, %v3318_v34  ;;  %v3361_v49 = vadd.f32 %v3237_v59, %v3223_v45  ;;  %v3365_v48 = vadd.f32 %v3237_v59, %v3229_v51  ;;  %v797_v5 = vsel %vm511_vm1, %v796_v30, %v792_v43 }
 0x101   :  { %5029 = vst [vmem:[#allocation25_spill] sm:$0xff] %v3353_v36  ;;  %v685_v19 = vsel %vm518_vm2, %v684_v10, %v680_v25  ;;  %v3370_v57 = vadd.f32 %v3237_v59, %v286_v4  ;;  %v723_v40 = vrot.slane %v3340_v50, %v3246_v63  ;;  %v689_v45 = vrot.slane %v3344_v52, %v3267_v23  ;;  %v5041_v52 = vld [vmem:[#allocation4_spill] sm:$0xff] }
 0x102   :  { %5030 = vst [vmem:[#allocation26_spill] sm:$0xff] %v3361_v49  ;;  %5031 = vst [vmem:[#allocation27_spill] sm:$0xff] %v3365_v48  ;;  %v666_v31 = vsel %vm546_vm6, %v665_v37, %v661_v9  ;;  %v3381_v51 = vadd.f32 %v3237_v59, %v3221_v44  ;;  %v719_v43 = vsel %vm511_vm1, %v718_v22, %v714_v53 }
 0x103   :  { %v670_v4 = vrot.slane %v3353_v36, %v3321_v28  ;;  %v3388_v30 = vadd.f32 %v3237_v59, %v3233_v55  ;;  %v3391_v10 = vsel %vm518_vm2, %v801_v58, %v797_v5  ;;  %v690_v9 = vsel %vm525_vm3, %v689_v45, %v685_v19 }
 0x104   :  { %v328_v62 = vpop.xlane.xlu0 %327  ;;  %5032 = vst [vmem:[#allocation28_spill] sm:$0xff] %v3381_v51  ;;  %v694_v25 = vrot.slane %v3361_v49, %v3274_v3  ;;  %v724_v55 = vsel %vm518_vm2, %v723_v40, %v719_v43  ;;  %v3408_v58 = vadd.f32 %v3237_v59, %v3155_v2  ;;  %v728_v5 = vrot.slane %v3381_v51, %v3267_v23 }
 0x105   :  { %v3399_v22 = vsel %vm553_vm7, %v670_v4, %v666_v31  ;;  %v3414_v19 = vadd.f32 %v3237_v59, %v3213_v39  ;;  %v3418_v31 = vadd.f32 %v3237_v59, %v3163_v8  ;;  %v3422_v40 = vadd.f32 %v3237_v59, %v3169_v12 }
 0x106   :  { %v3425_v45 = vsel %vm532_vm4, %v694_v25, %v690_v9  ;;  %v3430_v43 = vadd.f32 %v3237_v59, %v307_v46  ;;  %v3434_v39 = vadd.f32 %v3237_v59, %v3211_v38  ;;  %v3437_v8 = vsel %vm525_vm3, %v728_v5, %v724_v55 }
 0x107   :  { %5033 = vst [vmem:[#allocation29_spill] sm:$0xff] %v3414_v19  ;;  %v3441_v12 = vadd.f32 %v3237_v59, %v3225_v47  ;;  %v3445_v4 = vadd.f32 %v3237_v59, %v3231_v54  ;;  %v3449_v9 = vadd.f32 %v3237_v59, %v3153_v0  ;;  %v3455_v38 = vadd.f32 %v3237_v59, %v3177_v15 }
 0x108   :  { %v3374_v29 = vpop.xlane.xlu0 %288  ;;  %5034 = vst [vmem:[#allocation30_spill] sm:$0xff] %v3430_v43  ;;  %5035 = vst [vmem:[#allocation31_spill] sm:$0xff] %v3434_v39  ;;  %v3459_v25 = vadd.f32 %v3237_v59, %v3161_v7  ;;  %v3463_v47 = vadd.f32 %v3237_v59, %v3167_v11  ;;  %v505_v54 = vrot.slane %v3408_v58, %v3240_v60 }
 0x109   :  { %5036 = vst [vmem:[#allocation32_spill] sm:$0xff] %v3445_v4  ;;  %v753_v0 = vrot.slane %v3414_v19, %v3240_v60  ;;  %v3470_v55 = vadd.f32 %v3237_v59, %v328_v62  ;;  %v510_v15 = vrot.slane %v3418_v31, %v3243_v61  ;;  %v517_v7 = vrot.slane %v3422_v40, %v3246_v63 }
 0x10a   :  { %v757_v5 = vrot.slane %v3434_v39, %v3243_v61  ;;  %v3480_v11 = vadd.f32 %v3237_v59, %v3181_v18  ;;  %v3484_v53 = vadd.f32 %v3237_v59, %v3175_v1  ;;  %v3488_v62 = vadd.f32 %v3237_v59, %v3185_v21 }
 0x10b   :  { %v3492_v2 = vadd.f32 %v3237_v59, %v3173_v14  ;;  %v3496_v44 = vadd.f32 %v3237_v59, %v3171_v13  ;;  %v512_v36 = vsel %vm511_vm1, %v510_v15, %v505_v54  ;;  %v558_v18 = vrot.slane %v3449_v9, %v3240_v60 }
 0x10c   :  { %v3404_v37 = vpop.xlane.xlu0 %309  ;;  %v519_v1 = vsel %vm518_vm2, %v517_v7, %v512_v36  ;;  %v524_v21 = vrot.slane %v3455_v38, %v3267_v23  ;;  %v562_v14 = vrot.slane %v3459_v25, %v3243_v61  ;;  %v567_v39 = vrot.slane %v3463_v47, %v3246_v63 }
 0x10d   :  { %v3512_v13 = vadd.f32 %v3237_v59, %v3189_v24  ;;  %v3516_v54 = vadd.f32 %v3237_v59, %v3203_v33  ;;  %v3520_v36 = vadd.f32 %v3237_v59, %v3193_v27  ;;  %v3524_v15 = vadd.f32 %v3237_v59, %v3179_v17 }
 0x10e   :  { %v3528_v7 = vadd.f32 %v3237_v59, %v3183_v20  ;;  %v526_v50 = vsel %vm525_vm3, %v524_v21, %v519_v1  ;;  %v563_v24 = vsel %vm511_vm1, %v562_v14, %v558_v18  ;;  %v572_v33 = vrot.slane %v3484_v53, %v3267_v23 }
 0x10f   :  { %5037 = vst [vmem:[#allocation33_spill] sm:$0xff] %v3512_v13  ;;  %v3536_v49 = vadd.f32 %v3237_v59, %v3191_v26  ;;  %v531_v27 = vrot.slane %v3480_v11, %v3274_v3  ;;  %v568_v17 = vsel %vm518_vm2, %v567_v39, %v563_v24  ;;  %v577_v20 = vrot.slane %v3488_v62, %v3274_v3 }
 0x110   :  { %v3451_v46 = vpop.xlane.xlu0 %330  ;;  %5038 = vst [vmem:[#allocation34_spill] sm:$0xff] %v3528_v7  ;;  %v3545_v1 = vadd.f32 %v3237_v59, %v3201_v32  ;;  %v573_v18 = vsel %vm525_vm3, %v572_v33, %v568_v17  ;;  %v597_v21 = vrot.slane %v3492_v2, %v3240_v60  ;;  %v601_v26 = vrot.slane %v3496_v44, %v3243_v61 }
 0x111   :  { %5039 = vst [vmem:[#allocation35_spill] sm:$0xff] %v3536_v49  ;;  %v3554_v14 = vadd.f32 %v3237_v59, %v3205_v35  ;;  %v533_v39 = vsel %vm532_vm4, %v531_v27, %v526_v50  ;;  %v578_v24 = vsel %vm532_vm4, %v577_v20, %v573_v18  ;;  %v606_v32 = vrot.slane %v3524_v15, %v3246_v63  ;;  %v5040_v50 = vld [vmem:[#allocation3_spill] sm:$0xff] }
 0x112   :  { %v538_v33 = vrot.slane %v3512_v13, %v3293_v16  ;;  %v582_v17 = vrot.slane %v3520_v36, %v3293_v16  ;;  %v602_v60 = vsel %vm511_vm1, %v601_v26, %v597_v21  ;;  %v611_v61 = vrot.slane %v3528_v7, %v3267_v23 }
 0x113   :  { %v3569_v35 = vadd.f32 %v3237_v59, %v3217_v41  ;;  %v3573_v27 = vadd.f32 %v3237_v59, %v5040_v50  ;;  %v607_v20 = vsel %vm518_vm2, %v606_v32, %v602_v60  ;;  %v616_v18 = vrot.slane %v3536_v49, %v3274_v3 }
 0x114   :  { %v3501_v51 = vpop.xlane.xlu0 %351  ;;  %v3580_v21 = vadd.f32 %v3237_v59, %v5041_v52  ;;  %v540_v26 = vsel %vm539_vm5, %v538_v33, %v533_v39  ;;  %v583_v7 = vsel %vm539_vm5, %v582_v17, %v578_v24  ;;  %v612_v41 = vsel %vm525_vm3, %v611_v61, %v607_v20  ;;  %v5043_v33 = vld [vmem:[#allocation5_spill] sm:$0xff] }
 0x115   :  { %v545_v50 = vrot.slane %v3516_v54, %v3318_v34  ;;  %v587_v60 = vrot.slane %v3545_v1, %v3318_v34  ;;  %v617_v32 = vsel %vm532_vm4, %v616_v18, %v612_v41  ;;  %v621_v49 = vrot.slane %v3554_v14, %v3293_v16 }
 0x116   :  { %v758_v52 = vsel %vm511_vm1, %v757_v5, %v753_v0  ;;  %v762_v39 = vrot.slane %v3441_v12, %v3246_v63  ;;  %v3597_v61 = vadd.f32 %v3237_v59, %v3374_v29  ;;  %v3601_v24 = vadd.f32 %v3237_v59, %v3404_v37 }
 0x117   :  { %v3605_v17 = vadd.f32 %v3237_v59, %v5043_v33  ;;  %v547_v20 = vsel %vm546_vm6, %v545_v50, %v540_v26  ;;  %v588_v18 = vsel %vm546_vm6, %v587_v60, %v583_v7  ;;  %v622_v0 = vsel %vm539_vm5, %v621_v49, %v617_v32 }
 0x118   :  { %v313_v19 = vpop.xlane.xlu0 %312  ;;  %5042 = vst [vmem:[#allocation3_spill] sm:$0xff] %v3601_v24  ;;  %v3612_v5 = vadd.f32 %v3237_v59, %v3451_v46  ;;  %v552_v41 = vrot.slane %v3569_v35, %v3321_v28  ;;  %v592_v37 = vrot.slane %v3573_v27, %v3321_v28  ;;  %v626_v33 = vrot.slane %v3580_v21, %v3318_v34 }
 0x119   :  { %5044 = vst [vmem:[#allocation4_spill] sm:$0xff] %v3605_v17  ;;  %v5045_v7 = vrot.slane %v3365_v48, %v3293_v16  ;;  %v5046_v46 = vrot.slane %v3388_v30, %v3274_v3  ;;  %v738_v50 = vrot.slane %v3430_v43, %v3293_v16  ;;  %v3633_v60 = vadd.f32 %v3237_v59, %v313_v19 }
 0x11a   :  { %v554_v63 = vsel %vm553_vm7, %v552_v41, %v547_v20  ;;  %v763_v48 = vsel %vm518_vm2, %v762_v39, %v758_v52  ;;  %v772_v19 = vrot.slane %v3470_v55, %v3274_v3  ;;  %v743_v20 = vrot.slane %v3601_v24, %v3318_v34 }
 0x11b   :  { %v700_v49 = vsel %vm539_vm5, %v5045_v7, %v3425_v45  ;;  %v734_v26 = vsel %vm532_vm4, %v5046_v46, %v3437_v8  ;;  %5047 = vst [vmem:[#allocation5_spill] sm:$0xff] %v3633_v60  ;;  %v593_v45 = vsel %vm553_vm7, %v592_v37, %v588_v18  ;;  %v627_v7 = vsel %vm546_vm6, %v626_v33, %v622_v0 }
 0x11c   :  { %v334_v13 = vpop.xlane.xlu0 %333  ;;  %v767_v8 = vrot.slane %v3445_v4, %v3267_v23  ;;  %v631_v46 = vrot.slane %v3605_v17, %v3321_v28  ;;  %v777_v18 = vrot.slane %v3612_v5, %v3293_v16  ;;  %v3656_v52 = vadd.f32 %v3237_v59, %v3501_v51 }
 0x11d   :  { %v3636_v32 = vadd.f32 %v3237_v59, %v334_v13  ;;  %v709_v13 = vrot.slane %v3597_v61, %v3321_v28  ;;  %v748_v0 = vrot.slane %v3633_v60, %v3321_v28  ;;  %v829_v43 = vsel %vm828_vm8, %v593_v45, %v554_v63 }
 0x11e   :  { %v632_v33 = vsel %vm553_vm7, %v631_v46, %v627_v7  ;;  %v768_v24 = vsel %vm525_vm3, %v767_v8, %v763_v48  ;;  %v739_v7 = vsel %vm539_vm5, %v738_v50, %v734_v26 }
 0x11f   :  { %5048 = vst [vmem:[#allocation36_spill] sm:$0xff] %v3636_v32  ;;  %v782_v4 = vrot.slane %v3636_v32, %v3318_v34  ;;  %v773_v63 = vsel %vm532_vm4, %v772_v19, %v768_v24 }
 0x120   :  { %v355_v29 = vpop.xlane.xlu0 %354  ;;  %v778_v32 = vsel %vm539_vm5, %v777_v18, %v773_v63 }
 0x121   :  { %v3669_v51 = vadd.f32 %v3237_v59, %v355_v29  ;;  %v744_v29 = vsel %vm546_vm6, %v743_v20, %v739_v7 }
 0x122   :  { %v749_v50 = vsel %vm553_vm7, %v748_v0, %v744_v29  ;;  %v4938_v29 = vsub.s32 0, %v3235_v56 }
 0x124   :  { %v337_v39 = vpop.xlane.xlu0 %336  ;;  %v349_v37 = vpop.xlane.xlu1 %348 }
 0x125   :  { %v3661_v41 = vadd.f32 %v3237_v59, %v337_v39  ;;  %v3672_v17 = vadd.f32 %v3237_v59, %v349_v37  ;;  %v5049_v39 = vrot.slane %v3370_v57, %v3318_v34  ;;  %v831_v37 = vsel %vm830_vm9, %v632_v33, %v829_v43 }
 0x126   :  { %v783_v43 = vsel %vm546_vm6, %v782_v4, %v778_v32  ;;  %v833_v0 = vsel %vm832_vm10, %v3399_v22, %v831_v37 }
 0x127   :  { %v705_v60 = vsel %vm546_vm6, %v5049_v39, %v700_v49  ;;  %v787_v48 = vrot.slane %v3661_v41, %v3321_v28  ;;  %v806_v8 = vrot.slane %v3672_v17, %v3267_v23  ;;  %v811_v49 = vrot.slane %v3656_v52, %v3274_v3 }
 0x128   :  { %v710_v45 = vsel %vm553_vm7, %v709_v13, %v705_v60  ;;  %v358_v46 = vpop.xlane.xlu0 %357  ;;  %v361_v26 = vpop.xlane.xlu1 %360  ;;  %v816_v60 = vrot.slane %v3669_v51, %v3293_v16 }
 0x129   :  { %v3691_v24 = vadd.f32 %v3237_v59, %v358_v46  ;;  %v807_v19 = vsel %vm525_vm3, %v806_v8, %v3391_v10  ;;  %v3699_v13 = vadd.f32 %v3237_v59, %v361_v26  ;;  %v788_v18 = vsel %vm553_vm7, %v787_v48, %v783_v43 }
 0x12a   :  { %v812_v33 = vsel %vm532_vm4, %v811_v49, %v807_v19  ;;  %v835_v59 = vsel %vm834_vm11, %v710_v45, %v833_v0  ;;  %v4937_v8 = vsub.s32 1, %v3235_v56  ;;  %v4935_v45 = vsub.s32 2, %v3235_v56 }
 0x12b   :  { %v821_v20 = vrot.slane %v3691_v24, %v3318_v34  ;;  %v826_v39 = vrot.slane %v3699_v13, %v3321_v28  ;;  %v817_v10 = vsel %vm539_vm5, %v816_v60, %v812_v33  ;;  %v837_v32 = vsel %vm836_vm12, %v749_v50, %v835_v59 }
 0x12c   :  { %v839_v63 = vsel %vm838_vm13, %v788_v18, %v837_v32  ;;  %v4939_v46 = vsub.s32 3, %v3235_v56 }
 0x12d   :  { %v822_v4 = vsel %vm546_vm6, %v821_v20, %v817_v10  ;;  %v5050_v10 = vld [vmem:[#allocation11_spill] sm:$0xff] }
 0x12e   :  { %v827_v7 = vsel %vm553_vm7, %v826_v39, %v822_v4 }
 0x12f   :  { %v841_v48 = vsel %vm840_vm14, %v827_v7, %v839_v63 }
 0x130   :  { %v844_v22 = vsel %vm843_vm15, %v841_v48, -inf }
 0x131   :  { %845 = vmax.xlane.f32.xlu0 %v844_v22 }
 0x1be   :  { %v3722_v37 = vpop.xlane.xlu0 %845 }
 0x1bf   :  { %v3727_v49 = vrot.slane %v3722_v37, %v4938_v29  ;;  %v3732_v26 = vrot.slane %v3722_v37, %v4937_v8  ;;  %v3737_v50 = vrot.slane %v3722_v37, %v4935_v45  ;;  %v3742_v60 = vrot.slane %v3722_v37, %v4939_v46 }
 0x1c1   :  { %v889_v19 = vsub.f32 %v3418_v31, %v3727_v49  ;;  %v888_v43 = vsub.f32 %v3408_v58, %v3727_v49  ;;  %v906_v20 = vsub.f32 %v3524_v15, %v3737_v50  ;;  %v896_v18 = vsub.f32 %v3449_v9, %v3732_v26 }
 0x1c2   :  { %v913_v59 = vsub.f32 %v5050_v10, %v3742_v60  ;;  %v897_v31 = vsub.f32 %v3459_v25, %v3732_v26  ;;  %v4933_v58 = vsub.s32 4, %v3235_v56  ;;  %v900_v15 = vsub.f32 %v3488_v62, %v3732_v26  ;;  %v5051_v25 = vld [vmem:[#allocation12_spill] sm:$0xff] }
 0x1c3   :  { %v954_v33 = vmul.f32 1.442695, %v889_v19  ;;  %v952_v0 = vmul.f32 1.442695, %v888_v43  ;;  %v988_v39 = vmul.f32 1.442695, %v906_v20  ;;  %v890_v7 = vsub.f32 %v3422_v40, %v3727_v49 }
 0x1c4   :  { %v968_v4 = vmul.f32 1.442695, %v896_v18  ;;  %v1002_v32 = vmul.f32 1.442695, %v913_v59  ;;  %v970_v9 = vmul.f32 1.442695, %v897_v31  ;;  %v3764_v63 = vrot.slane %v3722_v37, %v4933_v58 }
 0x1c5   :  { %2581 = vpow2.f32 %v954_v33  ;;  %v976_v48 = vmul.f32 1.442695, %v900_v15  ;;  %v914_v22 = vsub.f32 %v5051_v25, %v3742_v60  ;;  %v956_v19 = vmul.f32 1.442695, %v890_v7 }
 0x1c6   :  { %2583 = vpow2.f32 %v952_v0  ;;  %v898_v62 = vsub.f32 %v3463_v47, %v3732_v26  ;;  %v921_v18 = vsub.f32 %v3282_v6, %v3764_v63  ;;  %v904_v0 = vsub.f32 %v3492_v2, %v3737_v50 }
 0x1c7   :  { %2585 = vpow2.f32 %v988_v39  ;;  %v1004_v40 = vmul.f32 1.442695, %v914_v22  ;;  %v4936_v10 = vsub.s32 5, %v3235_v56  ;;  %v901_v6 = vsub.f32 %v3520_v36, %v3732_v26 }
 0x1c8   :  { %2587 = vpow2.f32 %v968_v4  ;;  %v972_v33 = vmul.f32 1.442695, %v898_v62  ;;  %v1018_v59 = vmul.f32 1.442695, %v921_v18  ;;  %v984_v4 = vmul.f32 1.442695, %v904_v0 }
 0x1c9   :  { %2589 = vpow2.f32 %v1002_v32  ;;  %v905_v2 = vsub.f32 %v3496_v44, %v3737_v50  ;;  %v3799_v15 = vrot.slane %v3722_v37, %v4936_v10  ;;  %v978_v36 = vmul.f32 1.442695, %v901_v6  ;;  %v5063_v6 = vld [vmem:[#allocation10_spill] sm:$0xff] }
 0x1ca   :  { %2591 = vpow2.f32 %v970_v9  ;;  %v5058_v9 = vld [vmem:[#allocation13_spill] sm:$0xff]  ;;  %v899_v18 = vsub.f32 %v3484_v53, %v3732_v26 }
 0x1cb   :  { %2593 = vpow2.f32 %v976_v48  ;;  %v915_v7 = vsub.f32 %v5058_v9, %v3742_v60  ;;  %v986_v44 = vmul.f32 1.442695, %v905_v2  ;;  %v891_v48 = vsub.f32 %v3455_v38, %v3727_v49 }
 0x1cc   :  { %2595 = vpow2.f32 %v956_v19  ;;  %v928_v62 = vsub.f32 %v3311_v42, %v3799_v15  ;;  %v974_v42 = vmul.f32 1.442695, %v899_v18 }
 0x1cd   :  { %2597 = vpow2.f32 %v1004_v40  ;;  %v1006_v19 = vmul.f32 1.442695, %v915_v7  ;;  %v958_v40 = vmul.f32 1.442695, %v891_v48 }
 0x1ce   :  { %2599 = vpow2.f32 %v972_v33  ;;  %v1032_v0 = vmul.f32 1.442695, %v928_v62 }
 0x1cf   :  { %v3770_v43 = vpop.eup %2581  ;;  %2601 = vpow2.f32 %v1018_v59  ;;  %v894_v59 = vsub.f32 %v3516_v54, %v3727_v49  ;;  %v909_v54 = vsub.f32 %v3554_v14, %v3737_v50 }
 0x1d0   :  { %5052 = vst [vmem:[#allocation11_spill] sm:$0xff] %v3770_v43  ;;  %v3772_v20 = vpop.eup %2583  ;;  %1148 = vperm.xlu0 %2580, %v3770_v43   ;;  %2603 = vpow2.f32 %v984_v4  ;;  %v912_v4 = vsub.f32 %v5063_v6, %v3742_v60 }
 0x1d1   :  { %5053 = vst [vmem:[#allocation12_spill] sm:$0xff] %v3772_v20  ;;  %1145 = vperm.xlu1 %2579, %v3772_v20   ;;  %v3780_v39 = vpop.eup %2585  ;;  %2605 = vpow2.f32 %v978_v36  ;;  %v4934_v36 = vsub.s32 6, %v3235_v56  ;;  %v964_v9 = vmul.f32 1.442695, %v894_v59  ;;  %v994_v14 = vmul.f32 1.442695, %v909_v54 }
 0x1d2   :  { %5054 = vst [vmem:[#allocation37_spill] sm:$0xff] %v3780_v39  ;;  %v3782_v47 = vpop.eup %2587  ;;  %2607 = vpow2.f32 %v986_v44  ;;  %v1000_v7 = vmul.f32 1.442695, %v912_v4  ;;  %v892_v44 = vsub.f32 %v3480_v11, %v3727_v49 }
 0x1d3   :  { %5055 = vst [vmem:[#allocation38_spill] sm:$0xff] %v3782_v47  ;;  %v3791_v31 = vpop.eup %2589  ;;  %2609 = vpow2.f32 %v1006_v19  ;;  %v3845_v62 = vrot.slane %v3722_v37, %v4934_v36 }
 0x1d4   :  { %1199 = vperm.xlu0 %2580, %v3780_v39   ;;  %5056 = vst [vmem:[#allocation39_spill] sm:$0xff] %v3791_v31  ;;  %v3793_v32 = vpop.eup %2591  ;;  %2611 = vpow2.f32 %v958_v40  ;;  %v5068_v40 = vld [vmem:[#allocation24_spill] sm:$0xff]  ;;  %v960_v11 = vmul.f32 1.442695, %v892_v44 }
 0x1d5   :  { %1169 = vperm.xlu1 %2579, %v3782_v47   ;;  %5057 = vst [vmem:[#allocation40_spill] sm:$0xff] %v3793_v32  ;;  %v3806_v25 = vpop.eup %2593  ;;  %2613 = vpow2.f32 %v1032_v0  ;;  %v923_v18 = vsub.f32 %v5068_v40, %v3764_v63  ;;  %v5069_v0 = vld [vmem:[#allocation34_spill] sm:$0xff]  ;;  %v5146_v47 = vld [vmem:[#allocation9_spill] sm:$0xff] }
 0x1d6   :  { %5059 = vst [vmem:[#allocation13_spill] sm:$0xff] %v3806_v25  ;;  %v3808_v22 = vpop.eup %2595  ;;  %2615 = vpow2.f32 %v974_v42  ;;  %v907_v59 = vsub.f32 %v5069_v0, %v3737_v50 }
 0x1d7   :  { %5060 = vst [vmem:[#allocation41_spill] sm:$0xff] %v3808_v22  ;;  %v3816_v33 = vpop.eup %2597  ;;  %2617 = vpow2.f32 %v964_v9  ;;  %v1022_v4 = vmul.f32 1.442695, %v923_v18  ;;  %v5072_v9 = vld [vmem:[#allocation29_spill] sm:$0xff] }
 0x1d8   :  { %1220 = vperm.xlu0 %2580, %v3791_v31   ;;  %5061 = vst [vmem:[#allocation42_spill] sm:$0xff] %v3816_v33  ;;  %v3818_v38 = vpop.eup %2599  ;;  %2619 = vpow2.f32 %v1000_v7  ;;  %v936_v54 = vsub.f32 %v5072_v9, %v3845_v62  ;;  %v990_v40 = vmul.f32 1.442695, %v907_v59  ;;  %v5073_v7 = vld [vmem:[#allocation15_spill] sm:$0xff] }
 0x1d9   :  { %1172 = vperm.xlu1 %2579, %v3793_v32   ;;  %5062 = vst [vmem:[#allocation43_spill] sm:$0xff] %v3818_v38  ;;  %v3826_v2 = vpop.eup %2601  ;;  %2621 = vpow2.f32 %v994_v14  ;;  %v920_v44 = vsub.f32 %v5073_v7, %v3764_v63  ;;  %v895_v14 = vsub.f32 %v3569_v35, %v3727_v49  ;;  %v5145_v32 = vld [vmem:[#allocation7_spill] sm:$0xff] }
 0x1da   :  { %5064 = vst [vmem:[#allocation10_spill] sm:$0xff] %v3826_v2  ;;  %v3828_v53 = vpop.eup %2603  ;;  %2623 = vpow2.f32 %v960_v11  ;;  %v1048_v36 = vmul.f32 1.442695, %v936_v54  ;;  %v5076_v11 = vld [vmem:[#allocation33_spill] sm:$0xff]  ;;  %v5079_v54 = vld [vmem:[#allocation35_spill] sm:$0xff] }
 0x1db   :  { %5065 = vst [vmem:[#allocation44_spill] sm:$0xff] %v3828_v53  ;;  %v3837_v48 = vpop.eup %2605  ;;  %2625 = vpow2.f32 %v1022_v4  ;;  %v1016_v18 = vmul.f32 1.442695, %v920_v44  ;;  %v893_v59 = vsub.f32 %v5076_v11, %v3727_v49  ;;  %v966_v45 = vmul.f32 1.442695, %v895_v14  ;;  %v5082_v14 = vld [vmem:[#allocation26_spill] sm:$0xff] }
 0x1dc   :  { %1181 = vperm.xlu0 %2580, %v3806_v25   ;;  %5066 = vst [vmem:[#allocation45_spill] sm:$0xff] %v3837_v48  ;;  %v3839_v19 = vpop.eup %2607  ;;  %2627 = vpow2.f32 %v990_v40  ;;  %v910_v4 = vsub.f32 %v3580_v21, %v3737_v50  ;;  %v908_v40 = vsub.f32 %v5079_v54, %v3737_v50  ;;  %v4940_v11 = vsub.s32 7, %v3235_v56 }
 0x1dd   :  { %1151 = vperm.xlu1 %2579, %v3808_v22   ;;  %5067 = vst [vmem:[#allocation46_spill] sm:$0xff] %v3839_v19  ;;  %v3852_v42 = vpop.eup %2609  ;;  %2629 = vpow2.f32 %v1048_v36  ;;  %v962_v35 = vmul.f32 1.442695, %v893_v59  ;;  %v924_v21 = vsub.f32 %v5082_v14, %v3764_v63  ;;  %v5083_v59 = vld [vmem:[#allocation19_spill] sm:$0xff] }
 0x1de   :  { %5070 = vst [vmem:[#allocation24_spill] sm:$0xff] %v3852_v42  ;;  %v3854_v6 = vpop.eup %2611  ;;  %2631 = vpow2.f32 %v1016_v18  ;;  %v996_v36 = vmul.f32 1.442695, %v910_v4  ;;  %v992_v18 = vmul.f32 1.442695, %v908_v40  ;;  %v922_v54 = vsub.f32 %v5083_v59, %v3764_v63  ;;  %v5086_v40 = vld [vmem:[#allocation20_spill] sm:$0xff] }
 0x1df   :  { %5071 = vst [vmem:[#allocation34_spill] sm:$0xff] %v3854_v6  ;;  %v3862_v58 = vpop.eup %2613  ;;  %2633 = vpow2.f32 %v966_v45  ;;  %v3901_v29 = vrot.slane %v3722_v37, %v4940_v11  ;;  %v1024_v45 = vmul.f32 1.442695, %v924_v21  ;;  %v938_v4 = vsub.f32 %v3441_v12, %v3845_v62 }
 0x1e0   :  { %1223 = vperm.xlu0 %2580, %v3816_v33   ;;  %5074 = vst [vmem:[#allocation29_spill] sm:$0xff] %v3862_v58  ;;  %v3864_v0 = vpop.eup %2615  ;;  %2635 = vpow2.f32 %v962_v35  ;;  %v1020_v35 = vmul.f32 1.442695, %v922_v54  ;;  %v929_v14 = vsub.f32 %v5086_v40, %v3799_v15 }
 0x1e1   :  { %1175 = vperm.xlu1 %2579, %v3818_v38   ;;  %5075 = vst [vmem:[#allocation15_spill] sm:$0xff] %v3864_v0  ;;  %v3872_v9 = vpop.eup %2617  ;;  %2637 = vpow2.f32 %v996_v36  ;;  %v1052_v37 = vmul.f32 1.442695, %v938_v4  ;;  %v5089_v36 = vld [vmem:[#allocation17_spill] sm:$0xff] }
 0x1e2   :  { %5077 = vst [vmem:[#allocation33_spill] sm:$0xff] %v3872_v9  ;;  %v3874_v7 = vpop.eup %2619  ;;  %2639 = vpow2.f32 %v992_v18  ;;  %v945_v21 = vsub.f32 %v5089_v36, %v3901_v29  ;;  %v1034_v12 = vmul.f32 1.442695, %v929_v14  ;;  %v902_v18 = vsub.f32 %v3545_v1, %v3732_v26 }
 0x1e3   :  { %5078 = vst [vmem:[#allocation47_spill] sm:$0xff] %v3874_v7  ;;  %v3882_v44 = vpop.eup %2621  ;;  %2641 = vpow2.f32 %v1024_v45  ;;  %v5092_v45 = vld [vmem:[#allocation22_spill] sm:$0xff] }
 0x1e4   :  { %1244 = vperm.xlu0 %2580, %v3826_v2   ;;  %5080 = vst [vmem:[#allocation35_spill] sm:$0xff] %v3882_v44  ;;  %v3884_v49 = vpop.eup %2623  ;;  %2643 = vpow2.f32 %v1020_v35  ;;  %v1066_v11 = vmul.f32 1.442695, %v945_v21  ;;  %v918_v4 = vsub.f32 %v5092_v45, %v3742_v60  ;;  %v980_v36 = vmul.f32 1.442695, %v902_v18  ;;  %v5093_v35 = vld [vmem:[#allocation14_spill] sm:$0xff] }
 0x1e5   :  { %1193 = vperm.xlu1 %2579, %v3828_v53   ;;  %5081 = vst [vmem:[#allocation48_spill] sm:$0xff] %v3884_v49  ;;  %v3893_v10 = vpop.eup %2625  ;;  %2645 = vpow2.f32 %v1052_v37  ;;  %v916_v14 = vsub.f32 %v5093_v35, %v3742_v60  ;;  %v932_v37 = vsub.f32 %v3388_v30, %v3799_v15 }
 0x1e6   :  { %5084 = vst [vmem:[#allocation26_spill] sm:$0xff] %v3893_v10  ;;  %v3895_v8 = vpop.eup %2627  ;;  %2647 = vpow2.f32 %v1034_v12  ;;  %v5096_v12 = vld [vmem:[#allocation23_spill] sm:$0xff] }
 0x1e7   :  { %5085 = vst [vmem:[#allocation19_spill] sm:$0xff] %v3895_v8  ;;  %v3908_v59 = vpop.eup %2629  ;;  %2649 = vpow2.f32 %v1066_v11  ;;  %v1008_v21 = vmul.f32 1.442695, %v916_v14  ;;  %v930_v18 = vsub.f32 %v5096_v12, %v3799_v15  ;;  %v5099_v11 = vld [vmem:[#allocation21_spill] sm:$0xff] }
 0x1e8   :  { %1184 = vperm.xlu0 %2580, %v3837_v48   ;;  %5087 = vst [vmem:[#allocation20_spill] sm:$0xff] %v3908_v59  ;;  %v3910_v46 = vpop.eup %2631  ;;  %2651 = vpow2.f32 %v980_v36  ;;  %v5100_v36 = vld [vmem:[#allocation31_spill] sm:$0xff] }
 0x1e9   :  { %1196 = vperm.xlu1 %2579, %v3839_v19   ;;  %5088 = vst [vmem:[#allocation49_spill] sm:$0xff] %v3910_v46  ;;  %v3918_v54 = vpop.eup %2633  ;;  %v1036_v30 = vmul.f32 1.442695, %v930_v18  ;;  %v937_v14 = vsub.f32 %v5100_v36, %v3845_v62 }
 0x1ea   :  { %5090 = vst [vmem:[#allocation17_spill] sm:$0xff] %v3918_v54  ;;  %v3920_v40 = vpop.eup %2635 }
 0x1eb   :  { %5091 = vst [vmem:[#allocation50_spill] sm:$0xff] %v3920_v40 }
 0x1ec   :  { %1226 = vperm.xlu0 %2580, %v3852_v42   ;;  %v5144_v42 = vld [vmem:[#allocation8_spill] sm:$0xff] }
 0x1ed   :  { %1154 = vperm.xlu1 %2579, %v3854_v6  }
 0x1f0   :  { %1265 = vperm.xlu0 %2580, %v3862_v58  }
 0x1f1   :  { %1178 = vperm.xlu1 %2579, %v3864_v0  }
 0x1f4   :  { %1163 = vperm.xlu0 %2580, %v3872_v9   ;;  %v3928_v9 = vpop.eup %2637 }
 0x1f5   :  { %1217 = vperm.xlu1 %2579, %v3874_v7   ;;  %5094 = vst [vmem:[#allocation22_spill] sm:$0xff] %v3928_v9  ;;  %v3930_v1 = vpop.eup %2639 }
 0x1f6   :  { %5095 = vst [vmem:[#allocation14_spill] sm:$0xff] %v3930_v1  ;;  %v3938_v45 = vpop.eup %2641 }
 0x1f7   :  { %5097 = vst [vmem:[#allocation23_spill] sm:$0xff] %v3938_v45  ;;  %v3940_v35 = vpop.eup %2643 }
 0x1f8   :  { %1208 = vperm.xlu0 %2580, %v3882_v44   ;;  %5098 = vst [vmem:[#allocation51_spill] sm:$0xff] %v3940_v35 }
 0x1f9   :  { %1157 = vperm.xlu1 %2579, %v3884_v49  }
 0x1fc   :  { %1250 = vperm.xlu0 %2580, %v3893_v10   ;;  %v3948_v10 = vpop.eup %2645 }
 0x1fd   :  { %1202 = vperm.xlu1 %2579, %v3895_v8   ;;  %5101 = vst [vmem:[#allocation21_spill] sm:$0xff] %v3948_v10  ;;  %v3950_v12 = vpop.eup %2647 }
 0x1fe   :  { %5102 = vst [vmem:[#allocation31_spill] sm:$0xff] %v3950_v12  ;;  %v3958_v18 = vpop.eup %2649 }
 0x1ff   :  { %5103 = vst [vmem:[#allocation52_spill] sm:$0xff] %v3958_v18 }
 0x200   :  { %1289 = vperm.xlu0 %2580, %v3908_v59  }
 0x201   :  { %1241 = vperm.xlu1 %2579, %v3910_v46  }
 0x204   :  { %1166 = vperm.xlu0 %2580, %v3918_v54   ;;  %v1012_v54 = vmul.f32 1.442695, %v918_v4  ;;  %v946_v4 = vsub.f32 %v5099_v11, %v3901_v29  ;;  %v3960_v11 = vpop.eup %2651 }
 0x205   :  { %1160 = vperm.xlu1 %2579, %v3920_v40   ;;  %v1040_v40 = vmul.f32 1.442695, %v932_v37  ;;  %v1050_v37 = vmul.f32 1.442695, %v937_v14  ;;  %5104 = vst [vmem:[#allocation53_spill] sm:$0xff] %v3960_v11 }
 0x206   :  { %2653 = vpow2.f32 %v1012_v54  ;;  %v926_v54 = vsub.f32 %v3370_v57, %v3764_v63 }
 0x207   :  { %2655 = vpow2.f32 %v1008_v21  ;;  %v903_v21 = vsub.f32 %v3573_v27, %v3732_v26 }
 0x208   :  { %1211 = vperm.xlu0 %2580, %v3928_v9   ;;  %2657 = vpow2.f32 %v1040_v40  ;;  %v1028_v36 = vmul.f32 1.442695, %v926_v54  ;;  %v940_v40 = vsub.f32 %v3470_v55, %v3845_v62  ;;  %v5108_v54 = vld [vmem:[#allocation28_spill] sm:$0xff] }
 0x209   :  { %1205 = vperm.xlu1 %2579, %v3930_v1   ;;  %2659 = vpow2.f32 %v1036_v30  ;;  %v982_v57 = vmul.f32 1.442695, %v903_v21 }
 0x20a   :  { %v1056_v26 = vmul.f32 1.442695, %v940_v40  ;;  %v5111_v40 = vld [vmem:[#allocation16_spill] sm:$0xff] }
 0x20c   :  { %1253 = vperm.xlu0 %2580, %v3938_v45   ;;  %v1068_v45 = vmul.f32 1.442695, %v946_v4  ;;  %v5105_v4 = vld [vmem:[#allocation18_spill] sm:$0xff] }
 0x20d   :  { %1247 = vperm.xlu1 %2579, %v3940_v35   ;;  %v917_v30 = vsub.f32 %v5105_v4, %v3742_v60 }
 0x20e   :  { %2661 = vpow2.f32 %v1068_v45  ;;  %v927_v45 = vsub.f32 %v3597_v61, %v3764_v63 }
 0x20f   :  { %2663 = vpow2.f32 %v1050_v37  ;;  %v1010_v55 = vmul.f32 1.442695, %v917_v30  ;;  %v931_v37 = vsub.f32 %v5108_v54, %v3799_v15 }
 0x210   :  { %1295 = vperm.xlu0 %2580, %v3948_v10   ;;  %v3968_v14 = vpop.eup %2653  ;;  %2665 = vpow2.f32 %v1028_v36  ;;  %v941_v36 = vsub.f32 %v3612_v5, %v3845_v62 }
 0x211   :  { %1268 = vperm.xlu1 %2579, %v3950_v12   ;;  %5106 = vst [vmem:[#allocation18_spill] sm:$0xff] %v3968_v14  ;;  %v3970_v27 = vpop.eup %2655  ;;  %2667 = vpow2.f32 %v982_v57  ;;  %v1038_v61 = vmul.f32 1.442695, %v931_v37  ;;  %v944_v57 = vsub.f32 %v5111_v40, %v3901_v29 }
 0x212   :  { %5107 = vst [vmem:[#allocation54_spill] sm:$0xff] %v3970_v27  ;;  %v3978_v21 = vpop.eup %2657  ;;  %2669 = vpow2.f32 %v1056_v26  ;;  %v5114_v26 = vld [vmem:[#allocation5_spill] sm:$0xff] }
 0x213   :  { %5109 = vst [vmem:[#allocation28_spill] sm:$0xff] %v3978_v21  ;;  %v3980_v4 = vpop.eup %2659  ;;  %2671 = vpow2.f32 %v1010_v55  ;;  %v1064_v5 = vmul.f32 1.442695, %v944_v57  ;;  %v5115_v55 = vld [vmem:[#allocation4_spill] sm:$0xff] }
 0x214   :  { %1316 = vperm.xlu0 %2580, %v3958_v18   ;;  %5110 = vst [vmem:[#allocation55_spill] sm:$0xff] %v3980_v4  ;;  %v911_v37 = vsub.f32 %v5115_v55, %v3737_v50 }
 0x215   :  { %1187 = vperm.xlu1 %2579, %v3960_v11  }
 0x218   :  { %1235 = vperm.xlu0 %2580, %v3968_v14   ;;  %v1030_v14 = vmul.f32 1.442695, %v927_v45  ;;  %v3988_v30 = vpop.eup %2661  ;;  %v935_v45 = vsub.f32 %v5114_v26, %v3799_v15 }
 0x219   :  { %1229 = vperm.xlu1 %2579, %v3970_v27   ;;  %5112 = vst [vmem:[#allocation16_spill] sm:$0xff] %v3988_v30  ;;  %v3990_v54 = vpop.eup %2663  ;;  %v1058_v27 = vmul.f32 1.442695, %v941_v36  ;;  %v998_v36 = vmul.f32 1.442695, %v911_v37 }
 0x21a   :  { %5113 = vst [vmem:[#allocation56_spill] sm:$0xff] %v3990_v54  ;;  %2673 = vpow2.f32 %v1030_v14  ;;  %v3998_v18 = vpop.eup %2665  ;;  %v949_v14 = vsub.f32 %v3669_v51, %v3901_v29 }
 0x21b   :  { %2675 = vpow2.f32 %v1038_v61  ;;  %5116 = vst [vmem:[#allocation5_spill] sm:$0xff] %v3998_v18  ;;  %v4000_v40 = vpop.eup %2667  ;;  %v5118_v61 = vld [vmem:[#allocation27_spill] sm:$0xff] }
 0x21c   :  { %1277 = vperm.xlu0 %2580, %v3978_v21   ;;  %5117 = vst [vmem:[#allocation4_spill] sm:$0xff] %v4000_v40  ;;  %2677 = vpow2.f32 %v1058_v27  ;;  %v925_v57 = vsub.f32 %v5118_v61, %v3764_v63  ;;  %v4008_v26 = vpop.eup %2669  ;;  %v1074_v55 = vmul.f32 1.442695, %v949_v14  ;;  %v950_v27 = vsub.f32 %v3691_v24, %v3901_v29  ;;  %v5124_v14 = vld [vmem:[#allocation25_spill] sm:$0xff] }
 0x21d   :  { %1271 = vperm.xlu1 %2579, %v3980_v4   ;;  %2679 = vpow2.f32 %v1064_v5  ;;  %5119 = vst [vmem:[#allocation27_spill] sm:$0xff] %v4008_v26  ;;  %v4010_v50 = vpop.eup %2671  ;;  %v919_v24 = vsub.f32 %v5124_v14, %v3742_v60 }
 0x21e   :  { %5120 = vst [vmem:[#allocation57_spill] sm:$0xff] %v4010_v50  ;;  %v1026_v51 = vmul.f32 1.442695, %v925_v57  ;;  %v1076_v61 = vmul.f32 1.442695, %v950_v27 }
 0x220   :  { %1319 = vperm.xlu0 %2580, %v3988_v30   ;;  %v1046_v30 = vmul.f32 1.442695, %v935_v45  ;;  %v5121_v45 = vld [vmem:[#allocation32_spill] sm:$0xff] }
 0x221   :  { %1292 = vperm.xlu1 %2579, %v3990_v54   ;;  %v939_v5 = vsub.f32 %v5121_v45, %v3845_v62  ;;  %v1014_v45 = vmul.f32 1.442695, %v919_v24 }
 0x222   :  { %2681 = vpow2.f32 %v1046_v30 }
 0x223   :  { %2683 = vpow2.f32 %v998_v36  ;;  %v1054_v30 = vmul.f32 1.442695, %v939_v5  ;;  %v947_v5 = vsub.f32 %v3672_v17, %v3901_v29 }
 0x224   :  { %1259 = vperm.xlu0 %2580, %v3998_v18   ;;  %v4018_v37 = vpop.eup %2673  ;;  %2685 = vpow2.f32 %v1074_v55  ;;  %v5127_v18 = vld [vmem:[#allocation30_spill] sm:$0xff] }
 0x225   :  { %1190 = vperm.xlu1 %2579, %v4000_v40   ;;  %5122 = vst [vmem:[#allocation32_spill] sm:$0xff] %v4018_v37  ;;  %v4020_v63 = vpop.eup %2675  ;;  %2687 = vpow2.f32 %v1026_v51  ;;  %v933_v55 = vsub.f32 %v5127_v18, %v3799_v15  ;;  %v1070_v18 = vmul.f32 1.442695, %v947_v5 }
 0x226   :  { %5123 = vst [vmem:[#allocation58_spill] sm:$0xff] %v4020_v63  ;;  %v4026_v36 = vpop.eup %2677  ;;  %2689 = vpow2.f32 %v1076_v61 }
 0x227   :  { %5125 = vst [vmem:[#allocation25_spill] sm:$0xff] %v4026_v36  ;;  %v4028_v57 = vpop.eup %2679  ;;  %2691 = vpow2.f32 %v1054_v30  ;;  %v1042_v60 = vmul.f32 1.442695, %v933_v55  ;;  %v5132_v30 = vld [vmem:[#allocation3_spill] sm:$0xff]  ;;  %v948_v55 = vsub.f32 %v3656_v52, %v3901_v29 }
 0x228   :  { %1301 = vperm.xlu0 %2580, %v4008_v26   ;;  %5126 = vst [vmem:[#allocation59_spill] sm:$0xff] %v4028_v57  ;;  %2693 = vpow2.f32 %v1014_v45  ;;  %v934_v24 = vsub.f32 %v5132_v30, %v3799_v15  ;;  %v5136_v15 = vld [vmem:[#allocation36_spill] sm:$0xff] }
 0x229   :  { %1232 = vperm.xlu1 %2579, %v4010_v50   ;;  %2695 = vpow2.f32 %v1042_v60  ;;  %v1072_v60 = vmul.f32 1.442695, %v948_v55  ;;  %v942_v5 = vsub.f32 %v5136_v15, %v3845_v62 }
 0x22a   :  { %2697 = vpow2.f32 %v1070_v18  ;;  %v1044_v17 = vmul.f32 1.442695, %v934_v24  ;;  %v943_v18 = vsub.f32 %v3661_v41, %v3845_v62 }
 0x22c   :  { %1262 = vperm.xlu0 %2580, %v4018_v37   ;;  %v4034_v27 = vpop.eup %2681  ;;  %2699 = vpow2.f32 %v1044_v17  ;;  %v1062_v52 = vmul.f32 1.442695, %v943_v18  ;;  %v951_v17 = vsub.f32 %v3699_v13, %v3901_v29 }
 0x22d   :  { %1274 = vperm.xlu1 %2579, %v4020_v63   ;;  %5128 = vst [vmem:[#allocation30_spill] sm:$0xff] %v4034_v27  ;;  %v4036_v51 = vpop.eup %2683  ;;  %2701 = vpow2.f32 %v1072_v60 }
 0x22e   :  { %5129 = vst [vmem:[#allocation60_spill] sm:$0xff] %v4036_v51  ;;  %v4042_v14 = vpop.eup %2685  ;;  %v1078_v15 = vmul.f32 1.442695, %v951_v17 }
 0x22f   :  { %5130 = vst [vmem:[#allocation61_spill] sm:$0xff] %v4042_v14  ;;  %v4044_v61 = vpop.eup %2687 }
 0x230   :  { %1304 = vperm.xlu0 %2580, %v4026_v36   ;;  %5131 = vst [vmem:[#allocation62_spill] sm:$0xff] %v4044_v61  ;;  %v4050_v50 = vpop.eup %2689 }
 0x231   :  { %1313 = vperm.xlu1 %2579, %v4028_v57   ;;  %5133 = vst [vmem:[#allocation3_spill] sm:$0xff] %v4050_v50  ;;  %v4052_v45 = vpop.eup %2691 }
 0x232   :  { %5134 = vst [vmem:[#allocation63_spill] sm:$0xff] %v4052_v45 }
 0x234   :  { %1286 = vperm.xlu0 %2580, %v4034_v27  }
 0x235   :  { %1214 = vperm.xlu1 %2579, %v4036_v51  }
 0x238   :  { %1328 = vperm.xlu0 %2580, %v4042_v14   ;;  %v4058_v14 = vpop.eup %2693 }
 0x239   :  { %1256 = vperm.xlu1 %2579, %v4044_v61   ;;  %5135 = vst [vmem:[#allocation64_spill] sm:$0xff] %v4058_v14  ;;  %v4063_v30 = vpop.eup %2695 }
 0x23a   :  { %5137 = vst [vmem:[#allocation36_spill] sm:$0xff] %v4063_v30  ;;  %v4068_v24 = vpop.eup %2697 }
 0x23b   :  { %5138 = vst [vmem:[#allocation65_spill] sm:$0xff] %v4068_v24  ;;  %v4073_v55 = vpop.eup %2699 }
 0x23c   :  { %1331 = vperm.xlu0 %2580, %v4050_v50   ;;  %v1060_v50 = vmul.f32 1.442695, %v942_v5  ;;  %5139 = vst [vmem:[#allocation66_spill] sm:$0xff] %v4073_v55  ;;  %v4078_v5 = vpop.eup %2701 }
 0x23d   :  { %1298 = vperm.xlu1 %2579, %v4052_v45   ;;  %5140 = vst [vmem:[#allocation67_spill] sm:$0xff] %v4078_v5 }
 0x23e   :  { %2703 = vpow2.f32 %v1060_v50 }
 0x23f   :  { %2705 = vpow2.f32 %v1062_v52 }
 0x240   :  { %2707 = vpow2.f32 %v1078_v15 }
 0x241   :  { %1238 = vperm.xlu1 %2579, %v4058_v14  }
 0x245   :  { %1280 = vperm.xlu1 %2579, %v4063_v30  }
 0x248   :  { %v4085_v50 = vpop.eup %2703 }
 0x249   :  { %1322 = vperm.xlu1 %2579, %v4068_v24   ;;  %5141 = vst [vmem:[#allocation68_spill] sm:$0xff] %v4085_v50  ;;  %v4090_v18 = vpop.eup %2705 }
 0x24a   :  { %5142 = vst [vmem:[#allocation69_spill] sm:$0xff] %v4090_v18  ;;  %v4095_v14 = vpop.eup %2707 }
 0x24b   :  { %5143 = vst [vmem:[#allocation70_spill] sm:$0xff] %v4095_v14 }
 0x24d   :  { %1283 = vperm.xlu1 %2579, %v4073_v55  }
 0x24f   :  { %v4076_v60 = vpop.permute.xlu0 %1148 }
 0x250   :  { %v4080_v41 = vpop.permute.xlu1 %1145  ;;  %v1343_v59 = vrot.slane %v4076_v60, %v5144_v42 }
 0x251   :  { %1325 = vperm.xlu1 %2579, %v4078_v5   ;;  %v1339_v8 = vrot.slane %v4080_v41, %v5145_v32 }
 0x253   :  { %v4083_v62 = vpop.permute.xlu0 %1199 }
 0x254   :  { %v1170_v13 = vpop.permute.xlu1 %1169 }
 0x255   :  { %1307 = vperm.xlu1 %2579, %v4085_v50   ;;  %v1378_v43 = vrot.slane %v1170_v13, %v5145_v32 }
 0x257   :  { %v4088_v29 = vpop.permute.xlu0 %1220 }
 0x258   :  { %v1173_v52 = vpop.permute.xlu1 %1172 }
 0x259   :  { %1310 = vperm.xlu1 %2579, %v4090_v18   ;;  %v1382_v19 = vrot.slane %v1173_v52, %v5144_v42 }
 0x25b   :  { %v4093_v17 = vpop.permute.xlu0 %1181  ;;  %v1383_v60 = vsel %vm511_vm1, %v1382_v19, %v1378_v43  ;;  %v1344_v43 = vsel %vm511_vm1, %v1343_v59, %v1339_v8 }
 0x25c   :  { %v4097_v5 = vpop.permute.xlu1 %1151 }
 0x25d   :  { %1334 = vperm.xlu1 %2579, %v4095_v14   ;;  %v1348_v41 = vrot.slane %v4097_v5, %v5146_v47 }
 0x25f   :  { %v4100_v15 = vpop.permute.xlu0 %1223  ;;  %v1349_v8 = vsel %vm518_vm2, %v1348_v41, %v1344_v43 }
 0x260   :  { %v1176_v61 = vpop.permute.xlu1 %1175 }
 0x261   :  { %v1387_v58 = vrot.slane %v1176_v61, %v5146_v47 }
 0x263   :  { %v4102_v24 = vpop.permute.xlu0 %1244 }
 0x264   :  { %v1194_v50 = vpop.permute.xlu1 %1193 }
 0x265   :  { %v1417_v0 = vrot.slane %v1194_v50, %v5145_v32 }
 0x267   :  { %v4104_v27 = vpop.permute.xlu0 %1184 }
 0x268   :  { %v1197_v37 = vpop.permute.xlu1 %1196 }
 0x269   :  { %v1421_v49 = vrot.slane %v1197_v37, %v5144_v42  ;;  %v1460_v37 = vrot.slane %v4088_v29, %v5144_v42 }
 0x26b   :  { %v4106_v55 = vpop.permute.xlu0 %1226  ;;  %v1422_v61 = vsel %vm511_vm1, %v1421_v49, %v1417_v0  ;;  %v1397_v49 = vrot.slane %v4093_v17, %v3274_v3 }
 0x26c   :  { %v4108_v18 = vpop.permute.xlu1 %1154  ;;  %v1470_v41 = vrot.slane %v4106_v55, %v3267_v23 }
 0x26d   :  { %v1353_v50 = vrot.slane %v4108_v18, %v3267_v23 }
 0x26f   :  { %v4110_v36 = vpop.permute.xlu0 %1265 }
 0x270   :  { %v1179_v51 = vpop.permute.xlu1 %1178 }
 0x271   :  { %v1392_v20 = vrot.slane %v1179_v51, %v3267_v23  ;;  %v1426_v51 = vrot.slane %v4083_v62, %v5146_v47 }
 0x273   :  { %v4112_v30 = vpop.permute.xlu0 %1163 }
 0x274   :  { %v1218_v4 = vpop.permute.xlu1 %1217 }
 0x275   :  { %v1456_v52 = vrot.slane %v1218_v4, %v5145_v32  ;;  %v1388_v4 = vsel %vm518_vm2, %v1387_v58, %v1383_v60  ;;  %v1465_v58 = vrot.slane %v4100_v15, %v5146_v47 }
 0x276   :  { %v1393_v19 = vsel %vm525_vm3, %v1392_v20, %v1388_v4  ;;  %v1402_v20 = vrot.slane %v4104_v27, %v3293_v16 }
 0x277   :  { %v4114_v14 = vpop.permute.xlu0 %1208  ;;  %v1461_v5 = vsel %vm511_vm1, %v1460_v37, %v1456_v52  ;;  %v1398_v18 = vsel %vm532_vm4, %v1397_v49, %v1393_v19 }
 0x278   :  { %v4116_v40 = vpop.permute.xlu1 %1157  ;;  %v1466_v17 = vsel %vm518_vm2, %v1465_v58, %v1461_v5 }
 0x279   :  { %v1358_v0 = vrot.slane %v4116_v40, %v3274_v3  ;;  %v1354_v40 = vsel %vm525_vm3, %v1353_v50, %v1349_v8 }
 0x27b   :  { %v4118_v25 = vpop.permute.xlu0 %1250  ;;  %v1359_v37 = vsel %vm532_vm4, %v1358_v0, %v1354_v40 }
 0x27c   :  { %v1203_v26 = vpop.permute.xlu1 %1202  ;;  %v1509_v40 = vrot.slane %v4118_v25, %v3267_v23  ;;  %v1534_v25 = vrot.slane %v4110_v36, %v5145_v32 }
 0x27d   :  { %v1431_v13 = vrot.slane %v1203_v26, %v3267_v23  ;;  %v1427_v26 = vsel %vm518_vm2, %v1426_v51, %v1422_v61 }
 0x27f   :  { %v4120_v54 = vpop.permute.xlu0 %1289  ;;  %v1432_v59 = vsel %vm525_vm3, %v1431_v13, %v1427_v26 }
 0x280   :  { %v4122_v9 = vpop.permute.xlu1 %1241 }
 0x281   :  { %v1495_v55 = vrot.slane %v4122_v9, %v5145_v32 }
 0x283   :  { %v4124_v35 = vpop.permute.xlu0 %1166 }
 0x284   :  { %v4126_v21 = vpop.permute.xlu1 %1160  ;;  %v1373_v19 = vrot.slane %v4124_v35, %v3321_v28 }
 0x287   :  { %v4128_v11 = vpop.permute.xlu0 %1211 }
 0x288   :  { %v1206_v12 = vpop.permute.xlu1 %1205 }
 0x289   :  { %v1436_v29 = vrot.slane %v1206_v12, %v3274_v3  ;;  %v1363_v12 = vrot.slane %v4126_v21, %v3293_v16  ;;  %v1441_v21 = vrot.slane %v4114_v14, %v3293_v16  ;;  %v1499_v14 = vrot.slane %v4102_v24, %v5144_v42 }
 0x28b   :  { %v4132_v45 = vpop.permute.xlu0 %1253  ;;  %v1437_v15 = vsel %vm532_vm4, %v1436_v29, %v1432_v59  ;;  %v1364_v61 = vsel %vm539_vm5, %v1363_v12, %v1359_v37  ;;  %v1471_v29 = vsel %vm525_vm3, %v1470_v41, %v1466_v17  ;;  %v1500_v26 = vsel %vm511_vm1, %v1499_v14, %v1495_v55 }
 0x28c   :  { %v4130_v33 = vpop.permute.xlu1 %1247  ;;  %v1442_v4 = vsel %vm539_vm5, %v1441_v21, %v1437_v15 }
 0x28f   :  { %v4138_v2 = vpop.permute.xlu0 %1295 }
 0x290   :  { %v4134_v6 = vpop.permute.xlu1 %1268 }
 0x291   :  { %v1538_v17 = vrot.slane %v4134_v6, %v5144_v42 }
 0x293   :  { %v4142_v46 = vpop.permute.xlu0 %1316 }
 0x294   :  { %v4136_v44 = vpop.permute.xlu1 %1187 }
 0x295   :  { %v1407_v27 = vrot.slane %v4136_v44, %v3318_v34  ;;  %v1368_v44 = vrot.slane %v4112_v30, %v3318_v34  ;;  %v1504_v30 = vrot.slane %v4130_v33, %v5146_v47 }
 0x297   :  { %v4148_v10 = vpop.permute.xlu0 %1235  ;;  %v1369_v24 = vsel %vm546_vm6, %v1368_v44, %v1364_v61  ;;  %v1505_v35 = vsel %vm518_vm2, %v1504_v30, %v1500_v26  ;;  %v1514_v61 = vrot.slane %v4132_v45, %v3274_v3 }
 0x298   :  { %v4140_v63 = vpop.permute.xlu1 %1229  ;;  %v1485_v49 = vrot.slane %v4148_v10, %v3318_v34  ;;  %v1374_v12 = vsel %vm553_vm7, %v1373_v19, %v1369_v24  ;;  %v1510_v37 = vsel %vm525_vm3, %v1509_v40, %v1505_v35  ;;  %v1573_v24 = vrot.slane %v4120_v54, %v5145_v32 }
 0x299   :  { %v1475_v60 = vrot.slane %v4140_v63, %v3274_v3 }
 0x29b   :  { %v4152_v1 = vpop.permute.xlu0 %1277 }
 0x29c   :  { %v4144_v48 = vpop.permute.xlu1 %1271  ;;  %v1553_v45 = vrot.slane %v4152_v1, %v3274_v3 }
 0x29f   :  { %v4158_v22 = vpop.permute.xlu0 %1319 }
 0x2a0   :  { %v4146_v39 = vpop.permute.xlu1 %1292  ;;  %v1621_v26 = vrot.slane %v4158_v22, %v5146_v47 }
 0x2a3   :  { %v4175_v7 = vpop.permute.xlu0 %1259 }
 0x2a4   :  { %v4150_v31 = vpop.permute.xlu1 %1190 }
 0x2a5   :  { %v1412_v13 = vrot.slane %v4150_v31, %v3321_v28  ;;  %v1446_v31 = vrot.slane %v4128_v11, %v3318_v34 }
 0x2a7   :  { %v4208_v52 = vpop.permute.xlu0 %1301  ;;  %v1447_v0 = vsel %vm546_vm6, %v1446_v31, %v1442_v4 }
 0x2a8   :  { %v4154_v38 = vpop.permute.xlu1 %1232 }
 0x2a9   :  { %v1480_v51 = vrot.slane %v4154_v38, %v3293_v16  ;;  %v1403_v38 = vsel %vm539_vm5, %v1402_v20, %v1398_v18 }
 0x2aa   :  { %v1408_v43 = vsel %vm546_vm6, %v1407_v27, %v1403_v38  ;;  %v1543_v27 = vrot.slane %v4144_v48, %v5146_v47 }
 0x2ab   :  { %v1413_v9 = vsel %vm553_vm7, %v1412_v13, %v1408_v43  ;;  %v1263_v5 = vpop.permute.xlu0 %1262  ;;  %v1539_v13 = vsel %vm511_vm1, %v1538_v17, %v1534_v25 }
 0x2ac   :  { %v4156_v57 = vpop.permute.xlu1 %1274  ;;  %v1648_v20 = vsel %vm828_vm8, %v1413_v9, %v1374_v12  ;;  %v1544_v44 = vsel %vm518_vm2, %v1543_v27, %v1539_v13  ;;  %v1529_v38 = vrot.slane %v1263_v5, %v3321_v28 }
 0x2ad   :  { %v1548_v6 = vrot.slane %v4156_v57, %v3267_v23 }
 0x2af   :  { %v1549_v36 = vsel %vm525_vm3, %v1548_v6, %v1544_v44 }
 0x2b0   :  { %v4162_v53 = vpop.permute.xlu1 %1313 }
 0x2b1   :  { %v1612_v43 = vrot.slane %v4162_v53, %v5145_v32  ;;  %v1616_v32 = vrot.slane %v4142_v46, %v5144_v42  ;;  %v1592_v46 = vrot.slane %v4208_v52, %v3274_v3 }
 0x2b4   :  { %v1215_v56 = vpop.permute.xlu1 %1214 }
 0x2b5   :  { %v1451_v63 = vrot.slane %v1215_v56, %v3321_v28  ;;  %v1476_v56 = vsel %vm532_vm4, %v1475_v60, %v1471_v29  ;;  %v1305_v60 = vpop.permute.xlu0 %1304  ;;  %v1554_v29 = vsel %vm532_vm4, %v1553_v45, %v1549_v36  ;;  %v5151_v36 = vld [vmem:[#allocation12_spill] sm:$0xff] }
 0x2b6   :  { %v1481_v11 = vsel %vm539_vm5, %v1480_v51, %v1476_v56  ;;  %v1515_v51 = vsel %vm532_vm4, %v1514_v61, %v1510_v37 }
 0x2b7   :  { %v1452_v58 = vsel %vm553_vm7, %v1451_v63, %v1447_v0  ;;  %v1486_v59 = vsel %vm546_vm6, %v1485_v49, %v1481_v11  ;;  %v1577_v63 = vrot.slane %v4146_v39, %v5144_v42  ;;  %v1582_v0 = vrot.slane %v4138_v2, %v5146_v47 }
 0x2b8   :  { %v1257_v62 = vpop.permute.xlu1 %1256  ;;  %v1649_v10 = vsel %vm830_vm9, %v1452_v58, %v1648_v20  ;;  %v1617_v49 = vsel %vm511_vm1, %v1616_v32, %v1612_v43  ;;  %v5162_v32 = vld [vmem:[#allocation20_spill] sm:$0xff] }
 0x2b9   :  { %v1519_v41 = vrot.slane %v1257_v62, %v3293_v16  ;;  %v1524_v62 = vrot.slane %v4175_v7, %v3318_v34  ;;  %v1287_v57 = vpop.permute.xlu0 %1286  ;;  %v1578_v19 = vsel %vm511_vm1, %v1577_v63, %v1573_v24  ;;  %v1622_v42 = vsel %vm518_vm2, %v1621_v26, %v1617_v49  ;;  %v5153_v63 = vld [vmem:[#allocation15_spill] sm:$0xff]  ;;  %v5156_v24 = vld [vmem:[#allocation29_spill] sm:$0xff]  ;;  %v5163_v49 = vld [vmem:[#allocation44_spill] sm:$0xff] }
 0x2ba   :  { %v1568_v30 = vrot.slane %v1287_v57, %v3321_v28  ;;  %v5165_v26 = vld [vmem:[#allocation46_spill] sm:$0xff]  ;;  %vm2779_vm1 = vmmov 0  }
 0x2bb   :  { %v1520_v48 = vsel %vm539_vm5, %v1519_v41, %v1515_v51 }
 0x2bc   :  { %v4230_v50 = vpop.permute.xlu1 %1298  ;;  %v1525_v55 = vsel %vm546_vm6, %v1524_v62, %v1520_v48  ;;  %v5150_v48 = vld [vmem:[#allocation47_spill] sm:$0xff] }
 0x2bd   :  { %v1530_v39 = vsel %vm553_vm7, %v1529_v38, %v1525_v55  ;;  %v1587_v9 = vrot.slane %v4230_v50, %v3267_v23  ;;  %v1329_v58 = vpop.permute.xlu0 %1328 }
 0x2be   :  { %v1636_v40 = vrot.slane %v1329_v58, %v3293_v16 }
 0x2c0   :  { %v1239_v33 = vpop.permute.xlu1 %1238 }
 0x2c1   :  { %v1490_v8 = vrot.slane %v1239_v33, %v3321_v28  ;;  %v1583_v33 = vsel %vm518_vm2, %v1582_v0, %v1578_v19  ;;  %v5159_v19 = vld [vmem:[#allocation19_spill] sm:$0xff]  ;;  %vm2415_vm2 = vcmask 15360  }
 0x2c2   :  { %v1588_v12 = vsel %vm525_vm3, %v1587_v9, %v1583_v33  ;;  %v5164_v33 = vld [vmem:[#allocation48_spill] sm:$0xff] }
 0x2c3   :  { %v1491_v18 = vsel %vm553_vm7, %v1490_v8, %v1486_v59  ;;  %v1593_v35 = vsel %vm532_vm4, %v1592_v46, %v1588_v12  ;;  %v5167_v46 = vld [vmem:[#allocation41_spill] sm:$0xff] }
 0x2c4   :  { %v1650_v15 = vsel %vm832_vm10, %v1491_v18, %v1649_v10  ;;  %v1281_v21 = vpop.permute.xlu1 %1280  ;;  %v1332_v10 = vpop.permute.xlu0 %1331 }
 0x2c5   :  { %v1558_v4 = vrot.slane %v1281_v21, %v3293_v16  ;;  %v1651_v54 = vsel %vm834_vm11, %v1530_v39, %v1650_v15  ;;  %v1641_v15 = vrot.slane %v1332_v10, %v3318_v34 }
 0x2c7   :  { %v1559_v1 = vsel %vm539_vm5, %v1558_v4, %v1554_v29 }
 0x2c8   :  { %v1323_v14 = vpop.permute.xlu1 %1322 }
 0x2c9   :  { %v1626_v50 = vrot.slane %v1323_v14, %v3267_v23  ;;  %v1597_v23 = vrot.slane %v1305_v60, %v3293_v16 }
 0x2cb   :  { %v1627_v20 = vsel %vm525_vm3, %v1626_v50, %v1622_v42  ;;  %vm2458_vm3 = vcmask 1041408  }
 0x2cc   :  { %v1284_v31 = vpop.permute.xlu1 %1283 }
 0x2cd   :  { %v1563_v7 = vrot.slane %v1284_v31, %v3318_v34  ;;  %v5154_v31 = vld [vmem:[#allocation11_spill] sm:$0xff] }
 0x2cf   :  { %v1564_v56 = vsel %vm546_vm6, %v1563_v7, %v1559_v1  ;;  %v5157_v1 = vld [vmem:[#allocation38_spill] sm:$0xff] }
 0x2d0   :  { %v1569_v11 = vsel %vm553_vm7, %v1568_v30, %v1564_v56  ;;  %v1326_v5 = vpop.permute.xlu1 %1325 }
 0x2d1   :  { %v1652_v53 = vsel %vm836_vm12, %v1569_v11, %v1651_v54  ;;  %v1631_v8 = vrot.slane %v1326_v5, %v3274_v3  ;;  %v1598_v3 = vsel %vm539_vm5, %v1597_v23, %v1593_v35  ;;  %v5160_v11 = vld [vmem:[#allocation40_spill] sm:$0xff] }
 0x2d3   :  { %v1632_v47 = vsel %vm532_vm4, %v1631_v8, %v1627_v20  ;;  %v5166_v8 = vld [vmem:[#allocation24_spill] sm:$0xff] }
 0x2d4   :  { %v1308_v2 = vpop.permute.xlu1 %1307  ;;  %v1637_v52 = vsel %vm539_vm5, %v1636_v40, %v1632_v47  ;;  %v5170_v47 = vld [vmem:[#allocation43_spill] sm:$0xff]  ;;  %v5171_v40 = vld [vmem:[#allocation14_spill] sm:$0xff] }
 0x2d5   :  { %v1602_v59 = vrot.slane %v1308_v2, %v3318_v34  ;;  %v1642_v60 = vsel %vm546_vm6, %v1641_v15, %v1637_v52  ;;  %v5147_v34 = vld [vmem:[#allocation6_spill] sm:$0xff]  ;;  %v5173_v52 = vld [vmem:[#allocation21_spill] sm:$0xff] }
 0x2d6   :  { %v5148_v51 = vsub.s32 3, %v5147_v34  ;;  %v5152_v45 = vsub.s32 1, %v5147_v34  ;;  %v5155_v29 = vsub.s32 5, %v5147_v34  ;;  %v5158_v39 = vsub.s32 2, %v5147_v34  ;;  %v5174_v15 = vld [vmem:[#allocation37_spill] sm:$0xff] }
 0x2d7   :  { %v1603_v17 = vsel %vm546_vm6, %v1602_v59, %v1598_v3  ;;  %v5161_v54 = vsub.s32 6, %v5147_v34  ;;  %v5168_v35 = vsub.s32 7, %v5147_v34  ;;  %v5169_v59 = vld [vmem:[#allocation59_spill] sm:$0xff] }
 0x2d8   :  { %v1311_v22 = vpop.permute.xlu1 %1310 }
 0x2d9   :  { %v1607_v18 = vrot.slane %v1311_v22, %v3321_v28 }
 0x2db   :  { %v1608_v21 = vsel %vm553_vm7, %v1607_v18, %v1603_v17  ;;  %v5172_v18 = vld [vmem:[#allocation39_spill] sm:$0xff] }
 0x2dc   :  { %v1335_v37 = vpop.permute.xlu1 %1334  ;;  %v1653_v41 = vsel %vm838_vm13, %v1608_v21, %v1652_v53 }
 0x2dd   :  { %v1646_v27 = vrot.slane %v1335_v37, %v3321_v28  ;;  %v5149_v28 = vsub.s32 0, %v5147_v34  ;;  %v5175_v37 = vsub.s32 4, %v5147_v34 }
 0x2df   :  { %v1647_v16 = vsel %vm553_vm7, %v1646_v27, %v1642_v60  ;;  %v5176_v60 = vld [vmem:[#allocation45_spill] sm:$0xff] }
 0x2e0   :  { %v1654_v25 = vsel %vm840_vm14, %v1647_v16, %v1653_v41  ;;  %v5177_v41 = vld [vmem:[#allocation49_spill] sm:$0xff] }
 0x2e1   :  { %v1656_v61 = vsel %vm843_vm15, %v1654_v25, 0.0 }
 0x2e2   :  { %1657 = vadd.xlane.f32.xlu0 %v1656_v61  ;;  %v5178_v61 = vld [vmem:[#allocation58_spill] sm:$0xff] }
 0x36f   :  { %v1658_v6 = vpop.xlane.xlu0 %1657 }
 0x370   :  { %2709 = vrcp.f32 %v1658_v6 }
 0x37a   :  { %v2710_v13 = vpop.eup %2709 }
 0x37b   :  { %v4338_v14 = vrot.slane %v2710_v13, %v5148_v51  ;;  %v4342_v44 = vrot.slane %v2710_v13, %v5149_v28  ;;  %v4350_v57 = vrot.slane %v2710_v13, %v5152_v45  ;;  %v4358_v7 = vrot.slane %v2710_v13, %v5155_v29  ;;  %v5179_v51 = vld [vmem:[#allocation10_spill] sm:$0xff] }
 0x37c   :  { %v4366_v56 = vrot.slane %v2710_v13, %v5158_v39  ;;  %v4374_v0 = vrot.slane %v2710_v13, %v5161_v54  ;;  %v4390_v20 = vrot.slane %v2710_v13, %v5168_v35  ;;  %v4406_v27 = vrot.slane %v2710_v13, %v5175_v37  ;;  %v5180_v13 = vld [vmem:[#allocation35_spill] sm:$0xff]  ;;  %v5183_v45 = vld [vmem:[#allocation42_spill] sm:$0xff] }
 0x37d   :  { %v1725_v62 = vmul.f32 %v5150_v48, %v4338_v14  ;;  %v1701_v4 = vmul.f32 %v5151_v36, %v4342_v44  ;;  %v1712_v55 = vmul.f32 %v5153_v63, %v4350_v57  ;;  %v1702_v38 = vmul.f32 %v5154_v31, %v4342_v44  ;;  %v5181_v48 = vld [vmem:[#allocation34_spill] sm:$0xff]  ;;  %v5182_v36 = vld [vmem:[#allocation63_spill] sm:$0xff] }
 0x37e   :  { %v1741_v30 = vmul.f32 %v5156_v24, %v4358_v7  ;;  %v1709_v43 = vmul.f32 %v5157_v1, %v4350_v57  ;;  %v1720_v9 = vmul.f32 %v5159_v19, %v4366_v56  ;;  %v1710_v5 = vmul.f32 %v5160_v11, %v4350_v57  ;;  %v5186_v24 = vld [vmem:[#allocation28_spill] sm:$0xff]  ;;  %v5187_v1 = vld [vmem:[#allocation51_spill] sm:$0xff]  ;;  %v5188_v39 = vld [vmem:[#allocation22_spill] sm:$0xff] }
 0x37f   :  { %1887 = vperm.xlu0 %2580, %v1725_v62   ;;  %1767 = vperm.xlu1 %2579, %v1701_v4   ;;  %v1749_v53 = vmul.f32 %v5162_v32, %v4374_v0  ;;  %v1717_v58 = vmul.f32 %v5163_v49, %v4366_v56  ;;  %v1705_v50 = vmul.f32 %v5164_v33, %v4342_v44  ;;  %v5191_v32 = vld [vmem:[#allocation13_spill] sm:$0xff]  ;;  %v5192_v49 = vld [vmem:[#allocation4_spill] sm:$0xff]  ;;  %v5193_v33 = vld [vmem:[#allocation55_spill] sm:$0xff] }
 0x380   :  { %v1718_v12 = vmul.f32 %v5165_v26, %v4366_v56  ;;  %v1728_v2 = vmul.f32 %v5166_v8, %v4338_v14  ;;  %v1703_v42 = vmul.f32 %v5167_v46, %v4342_v44  ;;  %v1757_v23 = vmul.f32 %v5169_v59, %v4390_v20  ;;  %v5194_v26 = vld [vmem:[#allocation36_spill] sm:$0xff]  ;;  %v5197_v35 = vld [vmem:[#allocation26_spill] sm:$0xff] }
 0x381   :  { %v1711_v22 = vmul.f32 %v5170_v47, %v4350_v57  ;;  %v1721_v10 = vmul.f32 %v5171_v40, %v4366_v56  ;;  %v1726_v3 = vmul.f32 %v5172_v18, %v4338_v14  ;;  %v1751_v17 = vmul.f32 %v5173_v52, %v4374_v0  ;;  %v5195_v8 = vld [vmem:[#allocation52_spill] sm:$0xff]  ;;  %v5199_v47 = vld [vmem:[#allocation50_spill] sm:$0xff] }
 0x382   :  { %v1719_v21 = vmul.f32 %v5174_v15, %v4366_v56  ;;  %v1714_v16 = vmul.f32 %v5176_v60, %v4350_v57  ;;  %v1733_v25 = vmul.f32 %v5177_v41, %v4406_v27  ;;  %v1744_v6 = vmul.f32 %v5178_v61, %v4358_v7  ;;  %v5196_v46 = vld [vmem:[#allocation60_spill] sm:$0xff]  ;;  %v5200_v40 = vld [vmem:[#allocation66_spill] sm:$0xff]  ;;  %v5205_v60 = vld [vmem:[#allocation23_spill] sm:$0xff] }
 0x383   :  { %1822 = vperm.xlu0 %2580, %v1712_v55   ;;  %1772 = vperm.xlu1 %2579, %v1702_v38   ;;  %v1734_v28 = vmul.f32 %v5179_v51, %v4406_v27  ;;  %v1722_v34 = vmul.f32 %v5180_v13, %v4366_v56  ;;  %v1704_v62 = vmul.f32 %v5181_v48, %v4342_v44  ;;  %v5184_v55 = vld [vmem:[#allocation53_spill] sm:$0xff]  ;;  %v5185_v38 = vld [vmem:[#allocation31_spill] sm:$0xff]  ;;  %v5201_v18 = vld [vmem:[#allocation54_spill] sm:$0xff] }
 0x384   :  { %v1752_v4 = vmul.f32 %v5182_v36, %v4374_v0  ;;  %v1727_v63 = vmul.f32 %v5183_v45, %v4338_v14  ;;  %v1715_v31 = vmul.f32 %v5184_v55, %v4350_v57  ;;  %v1742_v29 = vmul.f32 %v5185_v38, %v4358_v7  ;;  %v5206_v41 = vld [vmem:[#allocation69_spill] sm:$0xff] }
 0x385   :  { %v1723_v19 = vmul.f32 %v5188_v39, %v4366_v56  ;;  %v1736_v59 = vmul.f32 %v5197_v35, %v4406_v27  ;;  %v5207_v61 = vld [vmem:[#allocation33_spill] sm:$0xff] }
 0x386   :  { %v5208_v51 = vld [vmem:[#allocation57_spill] sm:$0xff] }
 0x387   :  { %1967 = vperm.xlu0 %2580, %v1741_v30   ;;  %1807 = vperm.xlu1 %2579, %v1709_v43   ;;  %v1745_v30 = vmul.f32 %v5186_v24, %v4358_v7  ;;  %v1735_v43 = vmul.f32 %v5187_v1, %v4406_v27  ;;  %v5209_v13 = vld [vmem:[#allocation65_spill] sm:$0xff]  ;;  %v5215_v1 = vld [vmem:[#allocation64_spill] sm:$0xff] }
 0x38b   :  { %1862 = vperm.xlu0 %2580, %v1720_v9   ;;  %1812 = vperm.xlu1 %2579, %v1710_v5   ;;  %v5189_v9 = vld [vmem:[#allocation56_spill] sm:$0xff]  ;;  %v5190_v5 = vld [vmem:[#allocation27_spill] sm:$0xff] }
 0x38c   :  { %v1750_v11 = vmul.f32 %v5189_v9, %v4374_v0  ;;  %v1753_v54 = vmul.f32 %v5190_v5, %v4374_v0  ;;  %v2714_v9 = vld [vmem:[%s4887_s0 + $0x8] sm:$0xff] }
 0x38f   :  { %2007 = vperm.xlu0 %2580, %v1749_v53   ;;  %1847 = vperm.xlu1 %2579, %v1717_v58   ;;  %v1713_v53 = vmul.f32 %v5191_v32, %v4350_v57  ;;  %v1716_v58 = vmul.f32 %v5192_v49, %v4350_v57  ;;  %v5198_v57 = vld [vmem:[#allocation25_spill] sm:$0xff] }
 0x393   :  { %1787 = vperm.xlu0 %2580, %v1705_v50   ;;  %1852 = vperm.xlu1 %2579, %v1718_v12   ;;  %v1743_v50 = vmul.f32 %v5193_v33, %v4358_v7  ;;  %v1746_v12 = vmul.f32 %v5194_v26, %v4358_v7 }
 0x397   :  { %1902 = vperm.xlu0 %2580, %v1728_v2   ;;  %1777 = vperm.xlu1 %2579, %v1703_v42   ;;  %v1758_v2 = vmul.f32 %v5195_v8, %v4390_v20  ;;  %v1724_v42 = vmul.f32 %v5196_v46, %v4366_v56  ;;  %v5202_v56 = vld [vmem:[#allocation32_spill] sm:$0xff] }
 0x398   :  { %v1740_v52 = vmul.f32 %v5202_v56, %v4406_v27 }
 0x39b   :  { %2047 = vperm.xlu0 %2580, %v1757_v23   ;;  %1817 = vperm.xlu1 %2579, %v1711_v22   ;;  %v1754_v23 = vmul.f32 %v5198_v57, %v4374_v0  ;;  %v1706_v22 = vmul.f32 %v5199_v47, %v4342_v44 }
 0x39f   :  { %1867 = vperm.xlu0 %2580, %v1721_v10   ;;  %1892 = vperm.xlu1 %2579, %v1726_v3   ;;  %v1747_v10 = vmul.f32 %v5200_v40, %v4358_v7  ;;  %v1729_v3 = vmul.f32 %v5201_v18, %v4338_v14 }
 0x3a3   :  { %2017 = vperm.xlu0 %2580, %v1751_v17   ;;  %1857 = vperm.xlu1 %2579, %v1719_v21   ;;  %v5203_v17 = vld [vmem:[#allocation16_spill] sm:$0xff]  ;;  %v5204_v21 = vld [vmem:[#allocation30_spill] sm:$0xff] }
 0x3a4   :  { %v1759_v15 = vmul.f32 %v5203_v17, %v4390_v20  ;;  %v1748_v37 = vmul.f32 %v5204_v21, %v4358_v7  ;;  %v1760_v7 = vmul.f32 %v5209_v13, %v4390_v20 }
 0x3a7   :  { %1832 = vperm.xlu0 %2580, %v1714_v16   ;;  %1927 = vperm.xlu1 %2579, %v1733_v25   ;;  %v1737_v16 = vmul.f32 %v5205_v60, %v4406_v27  ;;  %v1756_v25 = vmul.f32 %v5206_v41, %v4374_v0 }
 0x3ab   :  { %1982 = vperm.xlu0 %2580, %v1744_v6   ;;  %1932 = vperm.xlu1 %2579, %v1734_v28   ;;  %v1707_v6 = vmul.f32 %v5207_v61, %v4342_v44  ;;  %v1730_v28 = vmul.f32 %v5208_v51, %v4338_v14 }
 0x3af   :  { %1872 = vperm.xlu0 %2580, %v1722_v34   ;;  %1782 = vperm.xlu1 %2579, %v1704_v62   ;;  %v5210_v34 = vld [vmem:[#allocation62_spill] sm:$0xff]  ;;  %v5211_v62 = vld [vmem:[#allocation17_spill] sm:$0xff] }
 0x3b0   :  { %v1738_v48 = vmul.f32 %v5210_v34, %v4406_v27  ;;  %v1708_v36 = vmul.f32 %v5211_v62, %v4342_v44 }
 0x3b3   :  { %2022 = vperm.xlu0 %2580, %v1752_v4   ;;  %1897 = vperm.xlu1 %2579, %v1727_v63   ;;  %v5212_v4 = vld [vmem:[#allocation18_spill] sm:$0xff]  ;;  %v5213_v63 = vld [vmem:[#allocation67_spill] sm:$0xff] }
 0x3b4   :  { %v1731_v45 = vmul.f32 %v5212_v4, %v4338_v14  ;;  %v1761_v55 = vmul.f32 %v5213_v63, %v4390_v20 }
 0x3b7   :  { %1837 = vperm.xlu0 %2580, %v1715_v31   ;;  %1972 = vperm.xlu1 %2579, %v1742_v29   ;;  %v5214_v31 = vld [vmem:[#allocation5_spill] sm:$0xff] }
 0x3b8   :  { %v1739_v38 = vmul.f32 %v5214_v31, %v4406_v27  ;;  %v2723_v31 = vld [vmem:[%s4887_s0 + $0xc8] sm:$0xff] }
 0x3bb   :  { %1987 = vperm.xlu0 %2580, %v1745_v30   ;;  %1937 = vperm.xlu1 %2579, %v1735_v43   ;;  %v2713_v30 = vld [vmem:[%s4887_s0] sm:$0xff]  ;;  %v1732_v43 = vmul.f32 %v5215_v1, %v4338_v14 }
 0x3bc   :  { %v2715_v14 = vld [vmem:[%s4887_s0 + $0x40] sm:$0xff] }
 0x3bd   :  { %v2317_v1 = vld [vmem:[%s4890_s3] sm:$0xff] }
 0x3bf   :  { %1877 = vperm.xlu0 %2580, %v1723_v19   ;;  %2012 = vperm.xlu1 %2579, %v1750_v11  }
 0x3c3   :  { %2027 = vperm.xlu0 %2580, %v1753_v54   ;;  %1827 = vperm.xlu1 %2579, %v1713_v53   ;;  %v5216_v54 = vld [vmem:[#allocation61_spill] sm:$0xff] }
 0x3c4   :  { %v1762_v32 = vmul.f32 %v5216_v54, %v4390_v20  ;;  %v2320_v54 = vld [vmem:[%s4890_s3 + $0x18] sm:$0xff] }
 0x3c7   :  { %1842 = vperm.xlu0 %2580, %v1716_v58   ;;  %1977 = vperm.xlu1 %2579, %v1743_v50   ;;  %v5217_v50 = vld [vmem:[#allocation68_spill] sm:$0xff] }
 0x3c8   :  { %v1755_v26 = vmul.f32 %v5217_v50, %v4374_v0 }
 0x3cb   :  { %1992 = vperm.xlu0 %2580, %v1746_v12   ;;  %2052 = vperm.xlu1 %2579, %v1758_v2   ;;  %v2716_v2 = vld [vmem:[%s4887_s0 + $0x48] sm:$0xff] }
 0x3cf   :  { %1882 = vperm.xlu0 %2580, %v1724_v42   ;;  %1942 = vperm.xlu1 %2579, %v1736_v59   ;;  %v5218_v59 = vld [vmem:[#allocation3_spill] sm:$0xff] }
 0x3d0   :  { %v1763_v57 = vmul.f32 %v5218_v59, %v4390_v20 }
 0x3d3   :  { %2032 = vperm.xlu0 %2580, %v1754_v23   ;;  %1792 = vperm.xlu1 %2579, %v1706_v22   ;;  %v2717_v22 = vld [vmem:[%s4887_s0 + $0x80] sm:$0xff] }
 0x3d7   :  { %1997 = vperm.xlu0 %2580, %v1747_v10   ;;  %1907 = vperm.xlu1 %2579, %v1729_v3   ;;  %v5219_v10 = vld [vmem:[#allocation70_spill] sm:$0xff] }
 0x3d8   :  { %v1764_v18 = vmul.f32 %v5219_v10, %v4390_v20  ;;  %v2719_v20 = vld [vmem:[%s4887_s0 + $0x10] sm:$0xff] }
 0x3db   :  { %1962 = vperm.xlu0 %2580, %v1740_v52   ;;  %2057 = vperm.xlu1 %2579, %v1759_v15   ;;  %v2718_v52 = vld [vmem:[%s4887_s0 + $0x88] sm:$0xff] }
 0x3df   :  { %2002 = vperm.xlu0 %2580, %v1748_v37   ;;  %1947 = vperm.xlu1 %2579, %v1737_v16  }
 0x3e3   :  { %2042 = vperm.xlu0 %2580, %v1756_v25   ;;  %1797 = vperm.xlu1 %2579, %v1707_v6  }
 0x3e7   :  { %1912 = vperm.xlu1 %2579, %v1730_v28   ;;  %v2720_v28 = vld [vmem:[%s4887_s0 + $0x58] sm:$0xff] }
 0x3eb   :  { %2062 = vperm.xlu1 %2579, %v1760_v7   ;;  %v2721_v7 = vld [vmem:[%s4887_s0 + $0x50] sm:$0xff] }
 0x3ef   :  { %1952 = vperm.xlu1 %2579, %v1738_v48   ;;  %v2722_v48 = vld [vmem:[%s4887_s0 + $0xc0] sm:$0xff] }
 0x3f3   :  { %1802 = vperm.xlu1 %2579, %v1708_v36  }
 0x3f7   :  { %1917 = vperm.xlu1 %2579, %v1731_v45  }
 0x3fb   :  { %2067 = vperm.xlu1 %2579, %v1761_v55  }
 0x3fe   :  { %v1888_v29 = vpop.permute.xlu0 %1887  ;;  %v1768_v24 = vpop.permute.xlu1 %1767 }
 0x3ff   :  { %1957 = vperm.xlu1 %2579, %v1739_v38   ;;  %v2085_v44 = vmul.f32 %v2713_v30, %v1768_v24  ;;  %v2109_v62 = vmul.f32 %v2722_v48, %v1888_v29  ;;  %v2778_v29 = vmov 0.0|0.0  }
 0x400   :  { %2569 = vmatprep.subr.bf16.mxu0 %v2778_v29 }
 0x401   :  { %v2149_v27 = vsel %vm169_vm0, %v2085_v44, 0.0  ;;  %v2212_v30 = vsel %vm169_vm0, %v2109_v62, 0.0 }
 0x402   :  { %v1823_v39 = vpop.permute.xlu0 %1822  ;;  %v1773_v19 = vpop.permute.xlu1 %1772 }
 0x403   :  { %v2086_v11 = vmul.f32 %v2714_v9, %v1773_v19  ;;  %1922 = vperm.xlu1 %2579, %v1732_v43   ;;  %v2096_v13 = vmul.f32 %v2720_v28, %v1823_v39  ;;  %v2318_v43 = vld [vmem:[%s4890_s3 + $0x8] sm:$0xff]  ;;  %v2319_v39 = vld [vmem:[%s4890_s3 + $0x10] sm:$0xff]  ;;  %v2780_v19 = vmov 0.0  }
 0x404   :  { %2561 = vmatprep.mubr.msk.f32.mxu0 %vm2779_vm1, %v2780_v19  ;;  %2564 = vmatprep.subr.mxu1 %v2780_v19  ;;  %v2731_v28 = vld [vmem:[%s4887_s0 + $0xd0] sm:$0xff] }
 0x405   :  { %v2150_v5 = vsel %vm169_vm0, %v2086_v11, 0.0  ;;  %v2175_v55 = vsel %vm169_vm0, %v2096_v13, 0.0  ;;  %2566 = vmatprep.mubr.msk.f32.mxu1 %vm2779_vm1, %v2780_v19 }
 0x406   :  { %v2151_v53 = vadd.f32 %v2150_v5, %v2149_v27  ;;  %v4498_v49 = vpop.permute.xlu0 %1967  ;;  %v1808_v58 = vpop.permute.xlu1 %1807  ;;  %v2570_v5 = vpack.c.bf16 %v2318_v43, %v2317_v1 }
 0x407   :  { %2072 = vperm.xlu1 %2579, %v1762_v32   ;;  %v2093_v33 = vmul.f32 %v2715_v14, %v1808_v58  ;;  %v2724_v32 = vld [vmem:[%s4887_s0 + $0x98] sm:$0xff]  ;;  %v2725_v58 = vld [vmem:[%s4887_s0 + $0x90] sm:$0xff] }
 0x408   :  { %2571 = vmatpush3.bf16.msra.mxu0 %v2570_v5 }
 0x409   :  { %v2170_v42 = vsel %vm169_vm0, %v2093_v33, 0.0  ;;  %v2573_v33 = vpack.c.bf16 %v2320_v54, %v2319_v39  ;;  %2572 = vmatprep.subr.bf16.mxu0 %v2778_v29  ;;  %v2734_v29 = vld [vmem:[%s4887_s0 + $0x110] sm:$0xff]  ;;  %v2735_v39 = vld [vmem:[%s4887_s0 + $0x180] sm:$0xff]  ;;  %v2736_v54 = vld [vmem:[%s4887_s0 + $0x188] sm:$0xff] }
 0x40a   :  { %v4505_v12 = vpop.permute.xlu0 %1862  ;;  %v1813_v8 = vpop.permute.xlu1 %1812 }
 0x40b   :  { %v2094_v46 = vmul.f32 %v2716_v2, %v1813_v8  ;;  %2037 = vperm.xlu1 %2579, %v1755_v26  }
 0x40c   :  { %2574 = vmatpush3.bf16.msra.mxu0 %v2573_v33 }
 0x40d   :  { %v2171_v35 = vsel %vm169_vm0, %v2094_v46, 0.0 }
 0x40e   :  { %v2172_v23 = vadd.f32 %v2171_v35, %v2170_v42  ;;  %v4514_v47 = vpop.permute.xlu0 %2007  ;;  %v1848_v0 = vpop.permute.xlu1 %1847 }
 0x40f   :  { %2077 = vperm.xlu1 %2579, %v1763_v57   ;;  %v2101_v40 = vmul.f32 %v2717_v22, %v1848_v0  ;;  %v2133_v19 = vmul.f32 %v2735_v39, %v4514_v47  ;;  %v2737_v47 = vld [vmem:[%s4887_s0 + $0x60] sm:$0xff] }
 0x411   :  { %v2191_v15 = vsel %vm169_vm0, %v2101_v40, 0.0 }
 0x412   :  { %v4521_v3 = vpop.permute.xlu0 %1787  ;;  %v1853_v56 = vpop.permute.xlu1 %1852 }
 0x413   :  { %v2102_v17 = vmul.f32 %v2718_v52, %v1853_v56  ;;  %2082 = vperm.xlu1 %2579, %v1764_v18   ;;  %v2728_v52 = vld [vmem:[%s4887_s0 + $0x20] sm:$0xff] }
 0x415   :  { %v2192_v21 = vsel %vm169_vm0, %v2102_v17, 0.0  ;;  %v2089_v17 = vmul.f32 %v2728_v52, %v4521_v3 }
 0x416   :  { %v2193_v37 = vadd.f32 %v2192_v21, %v2191_v15  ;;  %v4528_v60 = vpop.permute.xlu0 %1902  ;;  %v1778_v16 = vpop.permute.xlu1 %1777  ;;  %v2729_v15 = vld [vmem:[%s4887_s0 + $0x18] sm:$0xff] }
 0x417   :  { %v2087_v41 = vmul.f32 %v2719_v20, %v1778_v16 }
 0x419   :  { %v2152_v25 = vsel %vm169_vm0, %v2087_v41, 0.0 }
 0x41a   :  { %v4534_v61 = vadd.f32 %v2152_v25, %v2151_v53  ;;  %v4536_v6 = vpop.permute.xlu0 %2047  ;;  %v1818_v51 = vpop.permute.xlu1 %1817  ;;  %v2104_v53 = vmul.f32 %v2724_v32, %v4505_v12  ;;  %v2726_v12 = vld [vmem:[%s4887_s0 + $0x100] sm:$0xff]  ;;  %v2156_v25 = vsel %vm169_vm0, %v2089_v17, 0.0 }
 0x41b   :  { %v2095_v34 = vmul.f32 %v2721_v7, %v1818_v51  ;;  %v2730_v51 = vld [vmem:[%s4887_s0 + $0xd8] sm:$0xff] }
 0x41c   :  { %v2196_v46 = vsel %vm169_vm0, %v2104_v53, 0.0  ;;  %v2112_v3 = vmul.f32 %v2730_v51, %v4528_v60  ;;  %v2275_v53 = vsel %vm169_vm0, %v2133_v19, 0.0 }
 0x41d   :  { %v2173_v36 = vsel %vm169_vm0, %v2095_v34, 0.0 }
 0x41e   :  { %v2174_v4 = vadd.f32 %v2173_v36, %v2172_v23  ;;  %v4548_v45 = vpop.permute.xlu0 %1867  ;;  %v1893_v63 = vpop.permute.xlu1 %1892  ;;  %v2727_v23 = vld [vmem:[%s4887_s0 + $0x108] sm:$0xff]  ;;  %v2217_v60 = vsel %vm169_vm0, %v2112_v3, 0.0 }
 0x41f   :  { %v2110_v38 = vmul.f32 %v2723_v31, %v1893_v63  ;;  %v2733_v63 = vld [vmem:[%s4887_s0 + $0x148] sm:$0xff] }
 0x420   :  { %v4554_v24 = vadd.f32 %v2175_v55, %v2174_v4  ;;  %v2741_v3 = vld [vmem:[%s4887_s0 + $0xa8] sm:$0xff] }
 0x421   :  { %v2213_v44 = vsel %vm169_vm0, %v2110_v38, 0.0 }
 0x422   :  { %v2214_v9 = vadd.f32 %v2213_v44, %v2212_v30  ;;  %v4567_v11 = vpop.permute.xlu0 %2017  ;;  %v1858_v27 = vpop.permute.xlu1 %1857 }
 0x423   :  { %v2103_v14 = vmul.f32 %v2725_v58, %v1858_v27 }
 0x425   :  { %v2194_v50 = vsel %vm169_vm0, %v2103_v14, 0.0 }
 0x426   :  { %v2195_v26 = vadd.f32 %v2194_v50, %v2193_v37  ;;  %v4580_v8 = vpop.permute.xlu0 %1832  ;;  %v1928_v2 = vpop.permute.xlu1 %1927 }
 0x427   :  { %v2117_v35 = vmul.f32 %v2726_v12, %v1928_v2 }
 0x428   :  { %v4583_v42 = vadd.f32 %v2196_v46, %v2195_v26 }
 0x429   :  { %v2233_v22 = vsel %vm169_vm0, %v2117_v35, 0.0  ;;  %v2738_v35 = vld [vmem:[%s4887_s0 + $0x150] sm:$0xff] }
 0x42a   :  { %v4588_v59 = vpop.permute.xlu0 %1982  ;;  %v1933_v57 = vpop.permute.xlu1 %1932 }
 0x42b   :  { %v2118_v0 = vmul.f32 %v2727_v23, %v1933_v57 }
 0x42d   :  { %v2234_v40 = vsel %vm169_vm0, %v2118_v0, 0.0 }
 0x42e   :  { %v2235_v10 = vadd.f32 %v2234_v40, %v2233_v22  ;;  %v4595_v18 = vpop.permute.xlu0 %1872  ;;  %v1783_v56 = vpop.permute.xlu1 %1782 }
 0x42f   :  { %v2088_v21 = vmul.f32 %v2729_v15, %v1783_v56 }
 0x431   :  { %v2154_v37 = vsel %vm169_vm0, %v2088_v21, 0.0 }
 0x432   :  { %v2155_v16 = vadd.f32 %v2154_v37, %v4534_v61  ;;  %v4606_v20 = vpop.permute.xlu0 %2022  ;;  %v1898_v41 = vpop.permute.xlu1 %1897  ;;  %v2732_v61 = vld [vmem:[%s4887_s0 + $0x140] sm:$0xff]  ;;  %v2739_v37 = vld [vmem:[%s4887_s0 + $0x68] sm:$0xff] }
 0x433   :  { %v2111_v13 = vmul.f32 %v2731_v28, %v1898_v41  ;;  %v2125_v34 = vmul.f32 %v2732_v61, %v4498_v49  ;;  %v2106_v28 = vmul.f32 %v2741_v3, %v4595_v18 }
 0x434   :  { %v4616_v7 = vadd.f32 %v2156_v25, %v2155_v16  ;;  %v2098_v16 = vmul.f32 %v2739_v37, %v4580_v8  ;;  %v2740_v25 = vld [vmem:[%s4887_s0 + $0xa0] sm:$0xff]  ;;  %v2742_v8 = vld [vmem:[%s4887_s0 + $0x70] sm:$0xff] }
 0x435   :  { %v2215_v48 = vsel %vm169_vm0, %v2111_v13, 0.0  ;;  %v2254_v38 = vsel %vm169_vm0, %v2125_v34, 0.0  ;;  %v2105_v51 = vmul.f32 %v2740_v25, %v4548_v45  ;;  %v2200_v18 = vsel %vm169_vm0, %v2106_v28, 0.0 }
 0x436   :  { %v2216_v62 = vadd.f32 %v2215_v48, %v2214_v9  ;;  %v1838_v36 = vpop.permute.xlu0 %1837  ;;  %v1973_v4 = vpop.permute.xlu1 %1972  ;;  %v2179_v61 = vsel %vm169_vm0, %v2098_v16, 0.0  ;;  %v2743_v48 = vld [vmem:[%s4887_s0 + $0xb0] sm:$0xff] }
 0x437   :  { %v2126_v55 = vmul.f32 %v2733_v63, %v1973_v4  ;;  %v2099_v34 = vmul.f32 %v2742_v8, %v1838_v36  ;;  %v2744_v63 = vld [vmem:[%s4887_s0 + $0xb8] sm:$0xff] }
 0x438   :  { %v4627_v31 = vadd.f32 %v2217_v60, %v2216_v62  ;;  %v2198_v60 = vsel %vm169_vm0, %v2105_v51, 0.0 }
 0x439   :  { %v2255_v30 = vsel %vm169_vm0, %v2126_v55, 0.0  ;;  %v2181_v36 = vsel %vm169_vm0, %v2099_v34, 0.0  ;;  %v2751_v34 = vld [vmem:[%s4887_s0 + $0x170] sm:$0xff] }
 0x43a   :  { %v2256_v44 = vadd.f32 %v2255_v30, %v2254_v38  ;;  %v1938_v49 = vpop.permute.xlu1 %1937  ;;  %v4634_v43 = vpop.permute.xlu0 %1987  ;;  %v2199_v38 = vadd.f32 %v2198_v60, %v4583_v42  ;;  %v2745_v30 = vld [vmem:[%s4887_s0 + $0x78] sm:$0xff] }
 0x43b   :  { %v2119_v1 = vmul.f32 %v2734_v29, %v1938_v49 }
 0x43c   :  { %v2201_v19 = vadd.f32 %v2200_v18, %v2199_v38 }
 0x43d   :  { %v2236_v9 = vsel %vm169_vm0, %v2119_v1, 0.0 }
 0x43e   :  { %v4641_v27 = vadd.f32 %v2236_v9, %v2235_v10  ;;  %v2013_v5 = vpop.permute.xlu1 %2012  ;;  %v1878_v14 = vpop.permute.xlu0 %1877 }
 0x43f   :  { %v2134_v32 = vmul.f32 %v2736_v54, %v2013_v5  ;;  %v2107_v45 = vmul.f32 %v2743_v48, %v1878_v14  ;;  %v2752_v48 = vld [vmem:[%s4887_s0 + $0x38] sm:$0xff] }
 0x441   :  { %v2276_v58 = vsel %vm169_vm0, %v2134_v32, 0.0  ;;  %v2202_v49 = vsel %vm169_vm0, %v2107_v45, 0.0 }
 0x442   :  { %v4648_v33 = vadd.f32 %v2276_v58, %v2275_v53  ;;  %v1828_v50 = vpop.permute.xlu1 %1827  ;;  %v4658_v23 = vpop.permute.xlu0 %2027  ;;  %v2203_v5 = vadd.f32 %v2202_v49, %v2201_v19  ;;  %v2746_v53 = vld [vmem:[%s4887_s0 + $0x158] sm:$0xff] }
 0x443   :  { %v2097_v26 = vmul.f32 %v2737_v47, %v1828_v50  ;;  %v2128_v58 = vmul.f32 %v2746_v53, %v4588_v59  ;;  %v2747_v50 = vld [vmem:[%s4887_s0 + $0x28] sm:$0xff]  ;;  %v2758_v53 = vld [vmem:[%s4887_s0 + $0xe0] sm:$0xff] }
 0x445   :  { %v2177_v2 = vsel %vm169_vm0, %v2097_v26, 0.0 }
 0x446   :  { %v2178_v46 = vadd.f32 %v2177_v2, %v4554_v24  ;;  %v1978_v12 = vpop.permute.xlu1 %1977  ;;  %v1843_v10 = vpop.permute.xlu0 %1842  ;;  %v2748_v2 = vld [vmem:[%s4887_s0 + $0x30] sm:$0xff] }
 0x447   :  { %v2127_v57 = vmul.f32 %v2738_v35, %v1978_v12  ;;  %v2749_v12 = vld [vmem:[%s4887_s0 + $0x160] sm:$0xff] }
 0x448   :  { %v2180_v62 = vadd.f32 %v2179_v61, %v2178_v46  ;;  %v2129_v35 = vmul.f32 %v2749_v12, %v4634_v43  ;;  %v2750_v43 = vld [vmem:[%s4887_s0 + $0x168] sm:$0xff] }
 0x449   :  { %v2257_v0 = vsel %vm169_vm0, %v2127_v57, 0.0 }
 0x44a   :  { %v2258_v22 = vadd.f32 %v2257_v0, %v2256_v44  ;;  %v4661_v40 = vpop.permute.xlu1 %2052  ;;  %v1993_v17 = vpop.permute.xlu0 %1992  ;;  %v2100_v44 = vmul.f32 %v2745_v30, %v1843_v10  ;;  %v2182_v29 = vadd.f32 %v2181_v36, %v2180_v62  ;;  %v2259_v0 = vsel %vm169_vm0, %v2128_v58, 0.0 }
 0x44b   :  { %v2261_v16 = vsel %vm169_vm0, %v2129_v35, 0.0  ;;  %v2130_v61 = vmul.f32 %v2750_v43, %v1993_v17  ;;  %v2754_v17 = vld [vmem:[%s4887_s0 + $0x178] sm:$0xff] }
 0x44c   :  { %v2183_v54 = vsel %vm169_vm0, %v2100_v44, 0.0 }
 0x44d   :  { %v2184_v42 = vadd.f32 %v2183_v54, %v2182_v29  ;;  %v2263_v49 = vsel %vm169_vm0, %v2130_v61, 0.0 }
 0x44e   :  { %v4663_v56 = vpop.permute.xlu1 %1942  ;;  %v1883_v24 = vpop.permute.xlu0 %1882 }
 0x44f   :  { %v2108_v55 = vmul.f32 %v2744_v63, %v1883_v24  ;;  %v2185_v59 = vrot.slane %v2184_v42, 4  ;;  %v2260_v24 = vadd.f32 %v2259_v0, %v2258_v22 }
 0x451   :  { %v2204_v9 = vsel %vm169_vm0, %v2108_v55, 0.0  ;;  %v2186_v25 = vadd.f32 %v2185_v59, %v2184_v42  ;;  %v2262_v62 = vadd.f32 %v2261_v16, %v2260_v24  ;;  %v2755_v55 = vld [vmem:[%s4887_s0 + $0x190] sm:$0xff] }
 0x452   :  { %v1793_v52 = vpop.permute.xlu1 %1792  ;;  %v4683_v13 = vpop.permute.xlu0 %2032  ;;  %v2205_v14 = vadd.f32 %v2204_v9, %v2203_v5  ;;  %v2135_v38 = vmul.f32 %v2755_v55, %v4567_v11  ;;  %v2757_v9 = vld [vmem:[%s4887_s0 + $0x198] sm:$0xff] }
 0x453   :  { %v2090_v47 = vmul.f32 %v2747_v50, %v1793_v52  ;;  %v2187_v36 = vrot.slane %v2186_v25, 2  ;;  %v2136_v11 = vmul.f32 %v2757_v9, %v4606_v20  ;;  %v2264_v5 = vadd.f32 %v2263_v49, %v2262_v62 }
 0x454   :  { %v2206_v10 = vrot.slane %v2205_v14, 4  ;;  %v2278_v12 = vsel %vm169_vm0, %v2135_v38, 0.0 }
 0x455   :  { %v2158_v52 = vsel %vm169_vm0, %v2090_v47, 0.0  ;;  %v2188_v47 = vadd.f32 %v2187_v36, %v2186_v25 }
 0x456   :  { %v4665_v15 = vpop.permute.xlu1 %1907  ;;  %v1998_v1 = vpop.permute.xlu0 %1997  ;;  %v2159_v51 = vadd.f32 %v2158_v52, %v4616_v7  ;;  %v2207_v8 = vadd.f32 %v2206_v10, %v2205_v14  ;;  %v2280_v10 = vsel %vm169_vm0, %v2136_v11, 0.0 }
 0x457   :  { %v2131_v22 = vmul.f32 %v2751_v34, %v1998_v1  ;;  %v2756_v1 = vld [vmem:[%s4887_s0 + $0x120] sm:$0xff]  ;;  %v2113_v58 = vmul.f32 %v2758_v53, %v4665_v15  ;;  %v2760_v15 = vld [vmem:[%s4887_s0 + $0xe8] sm:$0xff]  ;;  %v2763_v34 = vld [vmem:[%s4887_s0 + $0x138] sm:$0xff] }
 0x458   :  { %v2208_v29 = vrot.slane %v2207_v8, 2 }
 0x459   :  { %v2219_v16 = vsel %vm169_vm0, %v2113_v58, 0.0 }
 0x45a   :  { %v4667_v21 = vpop.permute.xlu1 %2057  ;;  %v4716_v26 = vpop.permute.xlu0 %1962  ;;  %v2209_v35 = vadd.f32 %v2208_v29, %v2207_v8  ;;  %v2766_v29 = vld [vmem:[%s4887_s0 + $0x1a8] sm:$0xff] }
 0x45e   :  { %v4673_v41 = vpop.permute.xlu1 %1947  ;;  %v2003_v3 = vpop.permute.xlu0 %2002 }
 0x45f   :  { %v2132_v18 = vmul.f32 %v2754_v17, %v2003_v3  ;;  %v2121_v19 = vmul.f32 %v2756_v1, %v4673_v41  ;;  %v2759_v41 = vld [vmem:[%s4887_s0 + $0x128] sm:$0xff] }
 0x461   :  { %v2267_v14 = vsel %vm169_vm0, %v2132_v18, 0.0  ;;  %v2240_v59 = vsel %vm169_vm0, %v2121_v19, 0.0  ;;  %v2765_v18 = vld [vmem:[%s4887_s0 + $0x1c8] sm:$0xff] }
 0x462   :  { %v1798_v4 = vpop.permute.xlu1 %1797 }
 0x463   :  { %v2091_v46 = vmul.f32 %v2748_v2, %v1798_v4  ;;  %v2753_v4 = vld [vmem:[%s4887_s0 + $0x118] sm:$0xff] }
 0x464   :  { %v2120_v60 = vmul.f32 %v2753_v4, %v4663_v56  ;;  %v2265_v56 = vsel %vm169_vm0, %v2131_v22, 0.0  ;;  %v2124_v22 = vmul.f32 %v2763_v34, %v4716_v26 }
 0x465   :  { %v2160_v37 = vsel %vm169_vm0, %v2091_v46, 0.0  ;;  %v2266_v2 = vadd.f32 %v2265_v56, %v2264_v5  ;;  %v2138_v56 = vmul.f32 %v2766_v29, %v4683_v13  ;;  %v2769_v13 = vld [vmem:[%s4887_s0 + $0x1d0] sm:$0xff] }
 0x466   :  { %v4703_v39 = vpop.permute.xlu1 %1912  ;;  %v2161_v7 = vadd.f32 %v2160_v37, %v2159_v51  ;;  %v2238_v42 = vsel %vm169_vm0, %v2120_v60, 0.0  ;;  %v2279_v37 = vadd.f32 %v2278_v12, %v4648_v33  ;;  %v2761_v51 = vld [vmem:[%s4887_s0 + $0xf0] sm:$0xff]  ;;  %v2210_v33 = vrot.slane %v2209_v35, 1 }
 0x467   :  { %v2114_v0 = vmul.f32 %v2760_v15, %v4703_v39  ;;  %v2268_v52 = vadd.f32 %v2267_v14, %v2266_v2  ;;  %v2762_v39 = vld [vmem:[%s4887_s0 + $0x1a0] sm:$0xff]  ;;  %v2246_v1 = vsel %vm169_vm0, %v2124_v22, 0.0  ;;  %v2143_v58 = vmul.f32 %v2769_v13, %v4667_v21 }
 0x468   :  { %v2281_v17 = vadd.f32 %v2280_v10, %v2279_v37  ;;  %v2771_v37 = vld [vmem:[%s4887_s0 + $0x1e0] sm:$0xff] }
 0x46a   :  { %v4707_v32 = vpop.permute.xlu1 %2062 }
 0x46e   :  { %v1953_v57 = vpop.permute.xlu1 %1952 }
 0x46f   :  { %v2122_v50 = vmul.f32 %v2759_v41, %v1953_v57  ;;  %v2239_v57 = vadd.f32 %v2238_v42, %v4641_v27  ;;  %v2189_v27 = vrot.slane %v2188_v47, 1  ;;  %v2768_v42 = vld [vmem:[%s4887_s0 + $0x1c0] sm:$0xff] }
 0x470   :  { %v2141_v53 = vmul.f32 %v2768_v42, %v4536_v6  ;;  %v2770_v6 = vld [vmem:[%s4887_s0 + $0x1d8] sm:$0xff] }
 0x471   :  { %v2242_v25 = vsel %vm169_vm0, %v2122_v50, 0.0  ;;  %v2241_v43 = vadd.f32 %v2240_v59, %v2239_v57  ;;  %v2190_v38 = vadd.f32 %v2189_v27, %v2188_v47  ;;  %v2144_v59 = vmul.f32 %v2770_v6, %v4707_v32 }
 0x472   :  { %v1803_v28 = vpop.permute.xlu1 %1802 }
 0x473   :  { %v2092_v45 = vmul.f32 %v2752_v48, %v1803_v28  ;;  %v2137_v28 = vmul.f32 %v2762_v39, %v4658_v23  ;;  %v2221_v48 = vsel %vm169_vm0, %v2114_v0, 0.0  ;;  %v2220_v23 = vadd.f32 %v2219_v16, %v4627_v31  ;;  %v2043_v0 = vpop.permute.xlu0 %2042 }
 0x474   :  { %v2243_v4 = vadd.f32 %v2242_v25, %v2241_v43  ;;  %v2211_v31 = vadd.f32 %v2210_v33, %v2209_v35  ;;  %v2284_v35 = vsel %vm169_vm0, %v2138_v56, 0.0  ;;  %v2301_v43 = vsel %vm169_vm0, %v2144_v59, 0.0 }
 0x475   :  { %v2162_v63 = vsel %vm169_vm0, %v2092_v45, 0.0  ;;  %v2764_v45 = vld [vmem:[%s4887_s0 + $0x130] sm:$0xff]  ;;  %v2222_v36 = vadd.f32 %v2221_v48, %v2220_v23 }
 0x476   :  { %v2163_v30 = vadd.f32 %v2162_v63, %v2161_v7  ;;  %v1918_v44 = vpop.permute.xlu1 %1917  ;;  %v2269_v7 = vrot.slane %v2268_v52, 4  ;;  %v2142_v63 = vmul.f32 %v2765_v18, %v4661_v40  ;;  %v2767_v40 = vld [vmem:[%s4887_s0 + $0xf8] sm:$0xff] }
 0x477   :  { %v2115_v3 = vmul.f32 %v2761_v51, %v1918_v44 }
 0x478   :  { %v2164_v54 = vrot.slane %v2163_v30, 4  ;;  %v2270_v9 = vadd.f32 %v2269_v7, %v2268_v52  ;;  %v2297_v12 = vsel %vm169_vm0, %v2142_v63, 0.0  ;;  %v2296_v52 = vsel %vm169_vm0, %v2141_v53, 0.0 }
 0x479   :  { %v2223_v26 = vsel %vm169_vm0, %v2115_v3, 0.0  ;;  %v2298_v25 = vadd.f32 %v2297_v12, %v2296_v52 }
 0x47a   :  { %v2165_v20 = vadd.f32 %v2164_v54, %v2163_v30  ;;  %v4770_v46 = vpop.permute.xlu1 %2067  ;;  %v2224_v5 = vadd.f32 %v2223_v26, %v2222_v36  ;;  %v2271_v15 = vrot.slane %v2270_v9, 2 }
 0x47b   :  { %v2145_v16 = vmul.f32 %v2771_v37, %v4770_v46  ;;  %v2774_v46 = vld [vmem:[%s4887_s0 + $0x1b0] sm:$0xff] }
 0x47c   :  { %v2166_v24 = vrot.slane %v2165_v20, 2  ;;  %v2272_v22 = vadd.f32 %v2271_v15, %v2270_v9  ;;  %v2776_v9 = vld [vmem:[%s4887_s0 + $0x1f8] sm:$0xff] }
 0x47e   :  { %v2167_v61 = vadd.f32 %v2166_v24, %v2165_v20  ;;  %v1958_v8 = vpop.permute.xlu1 %1957  ;;  %v2282_v20 = vsel %vm169_vm0, %v2137_v28, 0.0  ;;  %v2299_v24 = vsel %vm169_vm0, %v2143_v58, 0.0  ;;  %v2772_v28 = vld [vmem:[%s4887_s0 + $0x1b8] sm:$0xff]  ;;  %v2273_v36 = vrot.slane %v2272_v22, 1 }
 0x47f   :  { %v2123_v62 = vmul.f32 %v2764_v45, %v1958_v8  ;;  %v2283_v21 = vadd.f32 %v2282_v20, %v2281_v17  ;;  %v2140_v27 = vmul.f32 %v2772_v28, %v2043_v0  ;;  %v2300_v34 = vadd.f32 %v2299_v24, %v2298_v25  ;;  %v2447_v28 = vld [vmem:[%s4892_s7] sm:$0x3] }
 0x480   :  { %v2168_v60 = vrot.slane %v2167_v61, 1  ;;  %2565 = vmatpush3.msk.msra.mxu1 %vm2458_vm3, %v2447_v28 }
 0x481   :  { %v2244_v55 = vsel %vm169_vm0, %v2123_v62, 0.0  ;;  %v2285_v51 = vadd.f32 %v2284_v35, %v2283_v21  ;;  %v2303_v62 = vsel %vm169_vm0, %v2145_v16, 0.0  ;;  %v2302_v7 = vadd.f32 %v2301_v43, %v2300_v34  ;;  %v2542_v34 = vld [vmem:[%s4894_s6] ss:$0 sm:$0xff] }
 0x482   :  { %v2169_v30 = vadd.f32 %v2168_v60, %v2167_v61  ;;  %v2245_v44 = vadd.f32 %v2244_v55, %v2243_v4  ;;  %v1923_v49 = vpop.permute.xlu1 %1922  ;;  %v2773_v61 = vld [vmem:[%s4887_s0 + $0x1e8] sm:$0xff]  ;;  %v2288_v18 = vsel %vm169_vm0, %v2140_v27, 0.0  ;;  %v2775_v55 = vld [vmem:[%s4887_s0 + $0x1f0] sm:$0xff] }
 0x483   :  { %v2116_v19 = vmul.f32 %v2767_v40, %v1923_v49 }
 0x484   :  { %v2336_v11 = vsel %vm828_vm8, %v2190_v38, %v2169_v30  ;;  %v2247_v54 = vadd.f32 %v2246_v1, %v2245_v44  ;;  %v2304_v30 = vadd.f32 %v2303_v62, %v2302_v7  ;;  %v2543_v62 = vld [vmem:[%s4895_s8] ss:$0 sm:$0xff] }
 0x485   :  { %v2225_v14 = vsel %vm169_vm0, %v2116_v19, 0.0  ;;  %v2337_v41 = vsel %vm830_vm9, %v2211_v31, %v2336_v11 }
 0x486   :  { %v2248_v50 = vrot.slane %v2247_v54, 4  ;;  %v2226_v47 = vadd.f32 %v2225_v14, %v2224_v5  ;;  %v2073_v2 = vpop.permute.xlu1 %2072  ;;  %v2274_v5 = vadd.f32 %v2273_v36, %v2272_v22 }
 0x487   :  { %v2146_v8 = vmul.f32 %v2773_v61, %v2073_v2 }
 0x488   :  { %v2249_v10 = vadd.f32 %v2248_v50, %v2247_v54  ;;  %v2227_v57 = vrot.slane %v2226_v47, 4 }
 0x489   :  { %v2305_v26 = vsel %vm169_vm0, %v2146_v8, 0.0 }
 0x48a   :  { %v2250_v3 = vrot.slane %v2249_v10, 2  ;;  %v2228_v39 = vadd.f32 %v2227_v57, %v2226_v47  ;;  %v2038_v32 = vpop.permute.xlu1 %2037  ;;  %v2306_v56 = vadd.f32 %v2305_v26, %v2304_v30  ;;  %v2539_v57 = vld [vmem:[%s4891_s4] ss:$0 sm:$0xff] }
 0x48b   :  { %v2139_v33 = vmul.f32 %v2774_v46, %v2038_v32  ;;  %v2541_v46 = vld [vmem:[%s4893_s5] ss:$0 sm:$0xff] }
 0x48c   :  { %v2251_v48 = vadd.f32 %v2250_v3, %v2249_v10  ;;  %v2229_v45 = vrot.slane %v2228_v39, 2 }
 0x48d   :  { %v2286_v23 = vsel %vm169_vm0, %v2139_v33, 0.0 }
 0x48e   :  { %v2230_v4 = vadd.f32 %v2229_v45, %v2228_v39  ;;  %v2287_v60 = vadd.f32 %v2286_v23, %v2285_v51  ;;  %v2078_v17 = vpop.permute.xlu1 %2077  ;;  %v2252_v63 = vrot.slane %v2251_v48, 1 }
 0x48f   :  { %v2147_v38 = vmul.f32 %v2775_v55, %v2078_v17 }
 0x490   :  { %v2231_v44 = vrot.slane %v2230_v4, 1  ;;  %v2289_v49 = vadd.f32 %v2288_v18, %v2287_v60  ;;  %v2253_v19 = vadd.f32 %v2252_v63, %v2251_v48 }
 0x491   :  { %v2307_v31 = vsel %vm169_vm0, %v2147_v38, 0.0 }
 0x492   :  { %v2232_v29 = vadd.f32 %v2231_v44, %v2230_v4  ;;  %v2290_v1 = vrot.slane %v2289_v49, 4  ;;  %v2083_v40 = vpop.permute.xlu1 %2082  ;;  %v2308_v42 = vadd.f32 %v2307_v31, %v2306_v56 }
 0x493   :  { %v2148_v11 = vmul.f32 %v2776_v9, %v2083_v40 }
 0x494   :  { %v2291_v54 = vadd.f32 %v2290_v1, %v2289_v49  ;;  %v2338_v53 = vsel %vm832_vm10, %v2232_v29, %v2337_v41 }
 0x495   :  { %v2309_v13 = vsel %vm169_vm0, %v2148_v11, 0.0  ;;  %v2339_v58 = vsel %vm834_vm11, %v2253_v19, %v2338_v53 }
 0x496   :  { %v2292_v14 = vrot.slane %v2291_v54, 2  ;;  %v2310_v50 = vadd.f32 %v2309_v13, %v2308_v42  ;;  %v2340_v47 = vsel %vm836_vm12, %v2274_v5, %v2339_v58 }
 0x498   :  { %v2293_v2 = vadd.f32 %v2292_v14, %v2291_v54  ;;  %v2311_v20 = vrot.slane %v2310_v50, 4 }
 0x49a   :  { %v2294_v12 = vrot.slane %v2293_v2, 1  ;;  %v2312_v35 = vadd.f32 %v2311_v20, %v2310_v50 }
 0x49c   :  { %v2313_v6 = vrot.slane %v2312_v35, 2  ;;  %v2295_v59 = vadd.f32 %v2294_v12, %v2293_v2 }
 0x49e   :  { %v2314_v21 = vadd.f32 %v2313_v6, %v2312_v35  ;;  %v2341_v15 = vsel %vm838_vm13, %v2295_v59, %v2340_v47 }
 0x4a0   :  { %v2315_v0 = vrot.slane %v2314_v21, 1 }
 0x4a2   :  { %v2316_v10 = vadd.f32 %v2315_v0, %v2314_v21 }
 0x4a4   :  { %v2342_v41 = vsel %vm840_vm14, %v2316_v10, %v2341_v15 }
 0x4a5   :  { %2562 = vmatmul.mubr.msk.f32.vlgmr.msra.gmra.mrb[0].mxu0 %vm169_vm0, %v2342_v41 }
 0x578   :  { %v2411_v52 = vpop.f32.mrb[0].mxu0 }
 0x579   :  { %v2412_v24 = vadd.f32 %v2539_v57, %v2411_v52  ;;  %v2563_v37 = vpop.f32.mrb[1].mxu0 }
 0x57b   :  { %v2416_v16 = vsel %vm2415_vm2, %v2412_v24, 0.0 }
 0x57c   :  { %2417 = vadd.xlane.f32.xlu0 %v2416_v16 }
 0x609   :  { %v2418_v25 = vpop.xlane.xlu0 %2417 }
 0x60a   :  { %v2420_v51 = vmul.f32 0.5, %v2418_v25 }
 0x60c   :  { %v2421_v3 = vsub.f32 %v2412_v24, %v2420_v51 }
 0x60e   :  { %v2422_v39 = vmul.f32 %v2421_v3, %v2421_v3 }
 0x610   :  { %v2423_v32 = vsel %vm2415_vm2, %v2422_v39, 0.0 }
 0x611   :  { %2424 = vadd.xlane.f32.xlu1 %v2423_v32 }
 0x69e   :  { %v2425_v27 = vpop.xlane.xlu1 %2424 }
 0x69f   :  { %v2426_v43 = vmul.f32 0.5, %v2425_v27 }
 0x6a1   :  { %v2427_v61 = vadd.f32 1e-05, %v2426_v43 }
 0x6a3   :  { %2711 = vrsqrt.f32 %v2427_v61 }
 0x6ad   :  { %v2712_v8 = vpop.eup %2711 }
 0x6ae   :  { %v2429_v33 = vmul.f32 %v2712_v8, %v2421_v3 }
 0x6b0   :  { %v2437_v22 = vmul.f32 %v2541_v46, %v2429_v33 }
 0x6b2   :  { %v2445_v48 = vadd.f32 %v2542_v34, %v2437_v22 }
 0x6b4   :  { %v2446_v45 = vmax.f32 %v2445_v48, 0.0 }
 0x6b6   :  { %2567 = vmatmul.mubr.msk.f32.vlgmr.msra.gmra.mrb[0].mxu1 %vm2415_vm2, %v2446_v45 }
 0x789   :  { %v2528_v23 = vpop.f32.mrb[0].mxu1 }
 0x78a   :  { %v2529_v7 = vadd.f32 %v2543_v62, %v2528_v23  ;;  %v2568_v4 = vpop.f32.mrb[1].mxu1 }
 0x78c   :  { %2532 = vst.msk [vmem:[%s4896_s9] sm:$0xff] %vm169_vm0, %v2529_v7 }

// kernel: gcnet_forward.3
= control target key start
LH: loop header
LB: loop body
LE: loop exit
PB: predicated region body
PF: predicated region fallthrough
CT: control target
= control target key end

     0   :  { %s1528_s24 = smov 0   ;;  %s1530_s25 = smov 0   ;;  %s1791_s0 = inlined_call_operand.vmem [shape: f32[8,2048], index: 0, kind: input, shape index: {}]   ;;  %s1792_s1 = inlined_call_operand.vmem [shape: f32[2048,128], index: 1, kind: input, shape index: {}]   ;;  %s1793_s2 = inlined_call_operand.vmem [shape: f32[8,32], index: 2, kind: input, shape index: {}]   ;;  %s1794_s3 = inlined_call_operand.vmem [shape: f32[32,128], index: 3, kind: input, shape index: {}]   ;;  %s1795_s4 = inlined_call_operand.vmem [shape: f32[1,128], index: 4, kind: input, shape index: {}]   ;;  %s1796_s5 = inlined_call_operand.vmem [shape: f32[128,128], index: 5, kind: input, shape index: {}]   ;;  %s1797_s6 = inlined_call_operand.vmem [shape: f32[1,128], index: 6, kind: input, shape index: {}]   ;;  %s1798_s7 = inlined_call_operand.vmem [shape: f32[8,128], index: 7, kind: output, shape index: {}]  }
   0x1   :  { %s1532_s26 = smov 0  }
   0x2 LB: > { %s26_s27 = sadd.s32 1, %s1478_s25  ;;  %p1053_p0 = scmp.ge.s32.totalorder %s1482_s26, 1  ;;  %s1482_s26 = sphi %s1532_s26, %s17_s26   ;;  %s1478_s25 = sphi %s1530_s25, %s1800_s25   ;;  %s1474_s24 = sphi %s1528_s24, %s1799_s24  }
   0x3   : > { %p27_p1 = scmp.ge.s32.totalorder %s26_s27, 2  ;;  %p276_p2 = scmp.lt.s32.totalorder %s1482_s26, 3 }
   0x5   : > { %s1802_s27 = smov (%p27_p1, %s26_s27), 0  ;;  %p277_p3 = pnand %p1053_p0, %p276_p2 }
   0x6   : > { %s1054_s28 = sshll.u32 (!%p277_p3), %s1474_s24, 3  ;;  %s1056_s29 = sshll.u32 (!%p277_p3), %s1474_s24, 7 }
   0x7   : > { %280 = sbr.rel (%p277_p3) target bundleno = 707 (0x2c3), region = 48  ;;  %p323_p4 = scmp.lt.s32.totalorder (!%p277_p3), %s1054_s28, 15 }
   0x8   : > { %p331_p5 = scmp.lt.s32.totalorder (!%p277_p3), %s1056_s29, 255  ;;  %p1058_p6 = scmp.ne.s32.totalorder (!%p277_p3), %s1474_s24, 0 }
   0xe   : > { %s1804_s28 = smov (!%p323_p4, %s1054_s28), 15  ;;  %s1806_s29 = smov (!%p331_p5, %s1056_s29), 255 }
   0xf   : > { %s1055_s30 = sshll.u32 %s1804_s28, 3  ;;  %s1057_s11 = sshll.u32 %s1806_s29, 3  ;;  %v1484_v0 = vmov (!%p1058_p6), 0.0  }
  0x10   : > { %s1553_s10 = scalar_lea.vmem %s1791_s0, %s1055_s30  ;;  %s1558_s14 = scalar_lea.vmem %s1792_s1, %s1057_s11  ;;  %348 = vst [vmem:[%s1798_s7] sm:$0xff] (!%p1058_p6), %v1484_v0 }
  0x11   : > { %347 = sbr.rel (%p1058_p6) target bundleno = 24 (0x18), region = 52 }
  0x18 PF: > { %v374_v1 = vld [vmem:[%s1558_s14 + $0x80] sm:$0xff]  ;;  %v375_v2 = vld [vmem:[%s1558_s14 + $0x88] sm:$0xff]  ;;  %v376_v12 = vld [vmem:[%s1558_s14 + $0x90] sm:$0xff]  ;;  %p1059_p7 = scmp.ne.s32.totalorder %s1474_s24, 1 }
  0x19   : > { %v406_v3 = vld [vmem:[%s1558_s14 + $0x180] sm:$0xff]  ;;  %v1274_v4 = vpack.c.bf16 %v375_v2, %v374_v1  ;;  %v407_v5 = vld [vmem:[%s1558_s14 + $0x188] sm:$0xff]  ;;  %v377_v14 = vld [vmem:[%s1558_s14 + $0x98] sm:$0xff]  ;;  %vm1486_vm0 = vmmov (!%p1059_p7), 0   ;;  %vm778_vm1 = vcmask (!%p1059_p7), 261120  }
  0x1a   : > { %v358_v6 = vld [vmem:[%s1558_s14] sm:$0xff]  ;;  %v359_v7 = vld [vmem:[%s1558_s14 + $0x8] sm:$0xff]  ;;  %v1306_v8 = vpack.c.bf16 %v407_v5, %v406_v3  ;;  %v408_v15 = vld [vmem:[%s1558_s14 + $0x190] sm:$0xff]  ;;  %v1278_v17 = vpack.c.bf16 %v377_v14, %v376_v12 }
  0x1b   : > { %v1276_v9 = vpack.c.bf16 %v359_v7, %v358_v6  ;;  %v390_v10 = vld [vmem:[%s1558_s14 + $0x100] sm:$0xff]  ;;  %v391_v11 = vld [vmem:[%s1558_s14 + $0x108] sm:$0xff]  ;;  %1275 = vmatprep.subr.bf16.mxu0 %v1274_v4  ;;  %v409_v16 = vld [vmem:[%s1558_s14 + $0x198] sm:$0xff] }
  0x1c   : > { %v1308_v13 = vpack.c.bf16 %v391_v11, %v390_v10  ;;  %1307 = vmatprep.subr.bf16.mxu1 %v1306_v8  ;;  %v1310_v18 = vpack.c.bf16 %v409_v16, %v408_v15  ;;  %v360_v19 = vld [vmem:[%s1558_s14 + $0x10] sm:$0xff]  ;;  %v361_v20 = vld [vmem:[%s1558_s14 + $0x18] sm:$0xff]  ;;  %v378_v24 = vld [vmem:[%s1558_s14 + $0xa0] sm:$0xff] }
  0x1d   : > { %1277 = vmatpush3.bf16.msra.mxu0 %v1276_v9  ;;  %v392_v21 = vld [vmem:[%s1558_s14 + $0x110] sm:$0xff]  ;;  %v1280_v22 = vpack.c.bf16 %v361_v20, %v360_v19  ;;  %v393_v23 = vld [vmem:[%s1558_s14 + $0x118] sm:$0xff]  ;;  %v379_v25 = vld [vmem:[%s1558_s14 + $0xa8] sm:$0xff] }
  0x1e   : > { %1309 = vmatpush3.bf16.msra.mxu1 %v1308_v13  ;;  %1279 = vmatprep.subr.bf16.mxu0 %v1278_v17  ;;  %v1312_v26 = vpack.c.bf16 %v393_v23, %v392_v21  ;;  %v1282_v27 = vpack.c.bf16 %v379_v25, %v378_v24  ;;  %v410_v28 = vld [vmem:[%s1558_s14 + $0x1a0] sm:$0xff]  ;;  %v411_v29 = vld [vmem:[%s1558_s14 + $0x1a8] sm:$0xff]  ;;  %v380_v36 = vld [vmem:[%s1558_s14 + $0xb0] sm:$0xff] }
  0x1f   : > { %1311 = vmatprep.subr.bf16.mxu1 %v1310_v18  ;;  %v362_v30 = vld [vmem:[%s1558_s14 + $0x20] sm:$0xff]  ;;  %v1314_v31 = vpack.c.bf16 %v411_v29, %v410_v28  ;;  %v363_v32 = vld [vmem:[%s1558_s14 + $0x28] sm:$0xff]  ;;  %v381_v37 = vld [vmem:[%s1558_s14 + $0xb8] sm:$0xff] }
  0x20   : > { %v394_v33 = vld [vmem:[%s1558_s14 + $0x120] sm:$0xff]  ;;  %v395_v34 = vld [vmem:[%s1558_s14 + $0x128] sm:$0xff]  ;;  %v1284_v35 = vpack.c.bf16 %v363_v32, %v362_v30  ;;  %v412_v38 = vld [vmem:[%s1558_s14 + $0x1b0] sm:$0xff]  ;;  %v1286_v40 = vpack.c.bf16 %v381_v37, %v380_v36 }
  0x21   : > { %1281 = vmatpush3.bf16.msra.mxu0 %v1280_v22  ;;  %v1316_v39 = vpack.c.bf16 %v395_v34, %v394_v33  ;;  %v413_v41 = vld [vmem:[%s1558_s14 + $0x1b8] sm:$0xff]  ;;  %v364_v42 = vld [vmem:[%s1558_s14 + $0x30] sm:$0xff]  ;;  %v382_v47 = vld [vmem:[%s1558_s14 + $0xc0] sm:$0xff] }
  0x22   : > { %1313 = vmatpush3.bf16.msra.mxu1 %v1312_v26  ;;  %1283 = vmatprep.subr.bf16.mxu0 %v1282_v27  ;;  %v365_v43 = vld [vmem:[%s1558_s14 + $0x38] sm:$0xff]  ;;  %v1318_v44 = vpack.c.bf16 %v413_v41, %v412_v38  ;;  %v396_v45 = vld [vmem:[%s1558_s14 + $0x130] sm:$0xff]  ;;  %v383_v48 = vld [vmem:[%s1558_s14 + $0xc8] sm:$0xff] }
  0x23   : > { %1315 = vmatprep.subr.bf16.mxu1 %v1314_v31  ;;  %v397_v46 = vld [vmem:[%s1558_s14 + $0x138] sm:$0xff]  ;;  %v414_v49 = vld [vmem:[%s1558_s14 + $0x1c0] sm:$0xff]  ;;  %v415_v50 = vld [vmem:[%s1558_s14 + $0x1c8] sm:$0xff]  ;;  %v1288_v51 = vpack.c.bf16 %v365_v43, %v364_v42  ;;  %v1290_v53 = vpack.c.bf16 %v383_v48, %v382_v47 }
  0x24   : > { %v1320_v52 = vpack.c.bf16 %v397_v46, %v396_v45  ;;  %v366_v54 = vld [vmem:[%s1558_s14 + $0x40] sm:$0xff]  ;;  %v367_v55 = vld [vmem:[%s1558_s14 + $0x48] sm:$0xff]  ;;  %v1322_v57 = vpack.c.bf16 %v415_v50, %v414_v49  ;;  %v384_v59 = vld [vmem:[%s1558_s14 + $0xd0] sm:$0xff] }
  0x25   : > { %1285 = vmatpush3.bf16.msra.mxu0 %v1284_v35  ;;  %v398_v56 = vld [vmem:[%s1558_s14 + $0x140] sm:$0xff]  ;;  %v399_v58 = vld [vmem:[%s1558_s14 + $0x148] sm:$0xff]  ;;  %v385_v60 = vld [vmem:[%s1558_s14 + $0xd8] sm:$0xff]  ;;  %v1292_v63 = vpack.c.bf16 %v367_v55, %v366_v54 }
  0x26   : > { %1317 = vmatpush3.bf16.msra.mxu1 %v1316_v39  ;;  %1287 = vmatprep.subr.bf16.mxu0 %v1286_v40  ;;  %v416_v61 = vld [vmem:[%s1558_s14 + $0x1d0] sm:$0xff]  ;;  %v417_v62 = vld [vmem:[%s1558_s14 + $0x1d8] sm:$0xff]  ;;  %v1324_v0 = vpack.c.bf16 %v399_v58, %v398_v56  ;;  %v1294_v1 = vpack.c.bf16 %v385_v60, %v384_v59  ;;  %v386_v7 = vld [vmem:[%s1558_s14 + $0xe0] sm:$0xff] }
  0x27   : > { %1319 = vmatprep.subr.bf16.mxu1 %v1318_v44  ;;  %v368_v2 = vld [vmem:[%s1558_s14 + $0x50] sm:$0xff]  ;;  %v369_v3 = vld [vmem:[%s1558_s14 + $0x58] sm:$0xff]  ;;  %v1326_v5 = vpack.c.bf16 %v417_v62, %v416_v61  ;;  %v387_v8 = vld [vmem:[%s1558_s14 + $0xe8] sm:$0xff] }
  0x28   : > { %v400_v4 = vld [vmem:[%s1558_s14 + $0x150] sm:$0xff]  ;;  %v401_v6 = vld [vmem:[%s1558_s14 + $0x158] sm:$0xff]  ;;  %v418_v9 = vld [vmem:[%s1558_s14 + $0x1e0] sm:$0xff]  ;;  %v1296_v11 = vpack.c.bf16 %v369_v3, %v368_v2  ;;  %v1298_v15 = vpack.c.bf16 %v387_v8, %v386_v7 }
  0x29   : > { %1289 = vmatpush3.bf16.msra.mxu0 %v1288_v51  ;;  %v419_v10 = vld [vmem:[%s1558_s14 + $0x1e8] sm:$0xff]  ;;  %v370_v12 = vld [vmem:[%s1558_s14 + $0x60] sm:$0xff]  ;;  %v1328_v14 = vpack.c.bf16 %v401_v6, %v400_v4  ;;  %v353_v18 = vld [vmem:[%s1553_s10 + $0x18] sm:$0xff] }
  0x2a   : > { %1321 = vmatpush3.bf16.msra.mxu1 %v1320_v52  ;;  %1291 = vmatprep.subr.bf16.mxu0 %v1290_v53  ;;  %v371_v13 = vld [vmem:[%s1558_s14 + $0x68] sm:$0xff]  ;;  %v402_v16 = vld [vmem:[%s1558_s14 + $0x160] sm:$0xff]  ;;  %v1330_v19 = vpack.c.bf16 %v419_v10, %v418_v9  ;;  %v388_v21 = vld [vmem:[%s1558_s14 + $0xf0] sm:$0xff] }
  0x2b   : > { %1323 = vmatprep.subr.bf16.mxu1 %v1322_v57  ;;  %v351_v17 = vld [vmem:[%s1553_s10 + $0x8] sm:$0xff]  ;;  %v389_v22 = vld [vmem:[%s1558_s14 + $0xf8] sm:$0xff]  ;;  %v420_v23 = vld [vmem:[%s1558_s14 + $0x1f0] sm:$0xff]  ;;  %620 = vmatprep.mubr.f32.mxu1 %v353_v18  ;;  %v1300_v25 = vpack.c.bf16 %v371_v13, %v370_v12 }
  0x2c   : > { %v403_v20 = vld [vmem:[%s1558_s14 + $0x168] sm:$0xff]  ;;  %550 = vmatprep.mubr.f32.mxu0 %v351_v17  ;;  %v421_v24 = vld [vmem:[%s1558_s14 + $0x1f8] sm:$0xff]  ;;  %v1302_v27 = vpack.c.bf16 %v389_v22, %v388_v21  ;;  %v372_v28 = vld [vmem:[%s1558_s14 + $0x70] sm:$0xff] }
  0x2d   : > { %1293 = vmatpush3.bf16.msra.mxu0 %v1292_v63  ;;  %v1332_v26 = vpack.c.bf16 %v403_v20, %v402_v16  ;;  %v373_v29 = vld [vmem:[%s1558_s14 + $0x78] sm:$0xff]  ;;  %v404_v30 = vld [vmem:[%s1558_s14 + $0x170] sm:$0xff]  ;;  %v1334_v31 = vpack.c.bf16 %v421_v24, %v420_v23  ;;  %v438_v33 = vld [vmem:[%s1558_s14 + $0x280] sm:$0xff] }
  0x2e   : > { %1325 = vmatpush3.bf16.msra.mxu1 %v1324_v0  ;;  %1295 = vmatprep.subr.bf16.mxu0 %v1294_v1  ;;  %v405_v32 = vld [vmem:[%s1558_s14 + $0x178] sm:$0xff]  ;;  %v439_v34 = vld [vmem:[%s1558_s14 + $0x288] sm:$0xff]  ;;  %v470_v35 = vld [vmem:[%s1558_s14 + $0x380] sm:$0xff]  ;;  %v1304_v37 = vpack.c.bf16 %v373_v29, %v372_v28 }
  0x2f   : > { %1327 = vmatprep.subr.bf16.mxu1 %v1326_v5  ;;  %v471_v36 = vld [vmem:[%s1558_s14 + $0x388] sm:$0xff]  ;;  %v1336_v38 = vpack.c.bf16 %v405_v32, %v404_v30  ;;  %v1338_v39 = vpack.c.bf16 %v439_v34, %v438_v33  ;;  %v422_v40 = vld [vmem:[%s1558_s14 + $0x200] sm:$0xff]  ;;  %v440_v45 = vld [vmem:[%s1558_s14 + $0x290] sm:$0xff] }
  0x30   : > { %v423_v41 = vld [vmem:[%s1558_s14 + $0x208] sm:$0xff]  ;;  %v454_v42 = vld [vmem:[%s1558_s14 + $0x300] sm:$0xff]  ;;  %v1370_v43 = vpack.c.bf16 %v471_v36, %v470_v35  ;;  %v441_v46 = vld [vmem:[%s1558_s14 + $0x298] sm:$0xff] }
  0x31   : > { %1297 = vmatpush3.bf16.msra.mxu0 %v1296_v11  ;;  %v455_v44 = vld [vmem:[%s1558_s14 + $0x308] sm:$0xff]  ;;  %v472_v47 = vld [vmem:[%s1558_s14 + $0x390] sm:$0xff]  ;;  %v473_v48 = vld [vmem:[%s1558_s14 + $0x398] sm:$0xff]  ;;  %v1340_v51 = vpack.c.bf16 %v423_v41, %v422_v40  ;;  %v1342_v53 = vpack.c.bf16 %v441_v46, %v440_v45 }
  0x32   : > { %1329 = vmatpush3.bf16.msra.mxu1 %v1328_v14  ;;  %1299 = vmatprep.subr.bf16.mxu0 %v1298_v15  ;;  %v350_v49 = vld [vmem:[%s1553_s10] sm:$0xff]  ;;  %v352_v50 = vld [vmem:[%s1553_s10 + $0x10] sm:$0xff]  ;;  %v1372_v52 = vpack.c.bf16 %v455_v44, %v454_v42  ;;  %v425_v55 = vld [vmem:[%s1558_s14 + $0x218] sm:$0xff]  ;;  %v1374_v57 = vpack.c.bf16 %v473_v48, %v472_v47 }
  0x33   : > { %1331 = vmatprep.subr.bf16.mxu1 %v1330_v19  ;;  %v424_v54 = vld [vmem:[%s1558_s14 + $0x210] sm:$0xff]  ;;  %v457_v58 = vld [vmem:[%s1558_s14 + $0x318] sm:$0xff]  ;;  %v442_v59 = vld [vmem:[%s1558_s14 + $0x2a0] sm:$0xff] }
  0x34   : > { %v456_v56 = vld [vmem:[%s1558_s14 + $0x310] sm:$0xff]  ;;  %v443_v60 = vld [vmem:[%s1558_s14 + $0x2a8] sm:$0xff]  ;;  %v474_v61 = vld [vmem:[%s1558_s14 + $0x3a0] sm:$0xff]  ;;  %v1344_v63 = vpack.c.bf16 %v425_v55, %v424_v54 }
  0x35   : > { %1301 = vmatpush3.bf16.msra.mxu0 %v1300_v25  ;;  %v475_v62 = vld [vmem:[%s1558_s14 + $0x3a8] sm:$0xff]  ;;  %v1376_v0 = vpack.c.bf16 %v457_v58, %v456_v56  ;;  %v1346_v1 = vpack.c.bf16 %v443_v60, %v442_v59  ;;  %v426_v2 = vld [vmem:[%s1558_s14 + $0x220] sm:$0xff]  ;;  %v444_v7 = vld [vmem:[%s1558_s14 + $0x2b0] sm:$0xff] }
  0x36   : > { %1333 = vmatpush3.bf16.msra.mxu1 %v1332_v26  ;;  %1303 = vmatprep.subr.bf16.mxu0 %v1302_v27  ;;  %v427_v3 = vld [vmem:[%s1558_s14 + $0x228] sm:$0xff]  ;;  %v458_v4 = vld [vmem:[%s1558_s14 + $0x320] sm:$0xff]  ;;  %v1378_v5 = vpack.c.bf16 %v475_v62, %v474_v61  ;;  %v445_v8 = vld [vmem:[%s1558_s14 + $0x2b8] sm:$0xff] }
  0x37   : > { %1335 = vmatprep.subr.bf16.mxu1 %v1334_v31  ;;  %v459_v6 = vld [vmem:[%s1558_s14 + $0x328] sm:$0xff]  ;;  %v476_v9 = vld [vmem:[%s1558_s14 + $0x3b0] sm:$0xff]  ;;  %v477_v10 = vld [vmem:[%s1558_s14 + $0x3b8] sm:$0xff]  ;;  %v1348_v11 = vpack.c.bf16 %v427_v3, %v426_v2  ;;  %v1350_v13 = vpack.c.bf16 %v445_v8, %v444_v7 }
  0x38   : > { %v1380_v12 = vpack.c.bf16 %v459_v6, %v458_v4  ;;  %v428_v14 = vld [vmem:[%s1558_s14 + $0x230] sm:$0xff]  ;;  %v429_v15 = vld [vmem:[%s1558_s14 + $0x238] sm:$0xff]  ;;  %v1382_v17 = vpack.c.bf16 %v477_v10, %v476_v9  ;;  %v446_v19 = vld [vmem:[%s1558_s14 + $0x2c0] sm:$0xff] }
  0x39   : > { %1305 = vmatpush3.bf16.msra.mxu0 %v1304_v37  ;;  %v460_v16 = vld [vmem:[%s1558_s14 + $0x330] sm:$0xff]  ;;  %v461_v18 = vld [vmem:[%s1558_s14 + $0x338] sm:$0xff]  ;;  %v447_v20 = vld [vmem:[%s1558_s14 + $0x2c8] sm:$0xff]  ;;  %v1352_v23 = vpack.c.bf16 %v429_v15, %v428_v14 }
  0x3a   : > { %1337 = vmatpush3.bf16.msra.mxu1 %v1336_v38  ;;  %1339 = vmatprep.subr.bf16.mxu0 %v1338_v39  ;;  %v478_v21 = vld [vmem:[%s1558_s14 + $0x3c0] sm:$0xff]  ;;  %v479_v22 = vld [vmem:[%s1558_s14 + $0x3c8] sm:$0xff]  ;;  %v357_v25 = vld [vmem:[%s1553_s10 + $0x38] sm:$0xff]  ;;  %v1384_v26 = vpack.c.bf16 %v461_v18, %v460_v16  ;;  %v1354_v27 = vpack.c.bf16 %v447_v20, %v446_v19 }
  0x3b   : > { %1371 = vmatprep.subr.bf16.mxu1 %v1370_v43  ;;  %v355_v24 = vld [vmem:[%s1553_s10 + $0x28] sm:$0xff]  ;;  %v430_v28 = vld [vmem:[%s1558_s14 + $0x240] sm:$0xff]  ;;  %v1386_v31 = vpack.c.bf16 %v479_v22, %v478_v21  ;;  %v448_v33 = vld [vmem:[%s1558_s14 + $0x2d0] sm:$0xff] }
  0x3c   : > { %551 = vmatmul.mubr.f32.vlgmr.msra.gmra.mrb[0].mxu0 %v350_v49  ;;  %v431_v29 = vld [vmem:[%s1558_s14 + $0x248] sm:$0xff]  ;;  %v462_v30 = vld [vmem:[%s1558_s14 + $0x340] sm:$0xff]  ;;  %v449_v34 = vld [vmem:[%s1558_s14 + $0x2d8] sm:$0xff] }
  0x3d   : > { %621 = vmatmul.mubr.f32.vlgmr.msra.gmra.mrb[0].mxu1 %v352_v50  ;;  %1341 = vmatpush3.bf16.msra.mxu0 %v1340_v51  ;;  %v463_v32 = vld [vmem:[%s1558_s14 + $0x348] sm:$0xff]  ;;  %v480_v35 = vld [vmem:[%s1558_s14 + $0x3d0] sm:$0xff]  ;;  %v481_v36 = vld [vmem:[%s1558_s14 + $0x3d8] sm:$0xff]  ;;  %v1356_v37 = vpack.c.bf16 %v431_v29, %v430_v28  ;;  %v1358_v39 = vpack.c.bf16 %v449_v34, %v448_v33  ;;  %v1485_v29 = vmov (!%p1059_p7), 0.0|0.0  }
  0x3e   : > { %1373 = vmatpush3.bf16.msra.mxu1 %v1372_v52  ;;  %1343 = vmatprep.subr.bf16.mxu0 %v1342_v53  ;;  %v1388_v38 = vpack.c.bf16 %v463_v32, %v462_v30  ;;  %v432_v40 = vld [vmem:[%s1558_s14 + $0x250] sm:$0xff]  ;;  %v433_v41 = vld [vmem:[%s1558_s14 + $0x258] sm:$0xff]  ;;  %v1390_v43 = vpack.c.bf16 %v481_v36, %v480_v35  ;;  %v450_v45 = vld [vmem:[%s1558_s14 + $0x2e0] sm:$0xff]  ;;  %v1487_v32 = vmov (!%p1059_p7), 0.0  }
  0x3f   : > { %1375 = vmatprep.subr.bf16.mxu1 %v1374_v57  ;;  %690 = vmatprep.mubr.f32.mxu0 %v355_v24  ;;  %v464_v42 = vld [vmem:[%s1558_s14 + $0x350] sm:$0xff]  ;;  %v465_v44 = vld [vmem:[%s1558_s14 + $0x358] sm:$0xff]  ;;  %v451_v46 = vld [vmem:[%s1558_s14 + $0x2e8] sm:$0xff]  ;;  %v1360_v49 = vpack.c.bf16 %v433_v41, %v432_v40 }
  0x40   : > { %760 = vmatprep.mubr.f32.mxu1 %v357_v25  ;;  %v482_v47 = vld [vmem:[%s1558_s14 + $0x3e0] sm:$0xff]  ;;  %v483_v48 = vld [vmem:[%s1558_s14 + $0x3e8] sm:$0xff]  ;;  %v1392_v50 = vpack.c.bf16 %v465_v44, %v464_v42  ;;  %v1362_v51 = vpack.c.bf16 %v451_v46, %v450_v45  ;;  %v452_v57 = vld [vmem:[%s1558_s14 + $0x2f0] sm:$0xff] }
  0x41   : > { %1345 = vmatpush3.bf16.msra.mxu0 %v1344_v63  ;;  %v434_v52 = vld [vmem:[%s1558_s14 + $0x260] sm:$0xff]  ;;  %v435_v53 = vld [vmem:[%s1558_s14 + $0x268] sm:$0xff]  ;;  %v1394_v55 = vpack.c.bf16 %v483_v48, %v482_v47  ;;  %v453_v58 = vld [vmem:[%s1558_s14 + $0x2f8] sm:$0xff] }
  0x42   : > { %1377 = vmatpush3.bf16.msra.mxu1 %v1376_v0  ;;  %1347 = vmatprep.subr.bf16.mxu0 %v1346_v1  ;;  %v466_v54 = vld [vmem:[%s1558_s14 + $0x360] sm:$0xff]  ;;  %v467_v56 = vld [vmem:[%s1558_s14 + $0x368] sm:$0xff]  ;;  %v484_v59 = vld [vmem:[%s1558_s14 + $0x3f0] sm:$0xff]  ;;  %v1364_v61 = vpack.c.bf16 %v435_v53, %v434_v52  ;;  %v1366_v63 = vpack.c.bf16 %v453_v58, %v452_v57 }
  0x43   : > { %1379 = vmatprep.subr.bf16.mxu1 %v1378_v5  ;;  %v485_v60 = vld [vmem:[%s1558_s14 + $0x3f8] sm:$0xff]  ;;  %v1396_v62 = vpack.c.bf16 %v467_v56, %v466_v54  ;;  %v436_v0 = vld [vmem:[%s1558_s14 + $0x270] sm:$0xff]  ;;  %v354_v7 = vld [vmem:[%s1553_s10 + $0x20] sm:$0xff] }
  0x44   : > { %v437_v1 = vld [vmem:[%s1558_s14 + $0x278] sm:$0xff]  ;;  %v1398_v2 = vpack.c.bf16 %v485_v60, %v484_v59  ;;  %v468_v3 = vld [vmem:[%s1558_s14 + $0x370] sm:$0xff]  ;;  %v862_v33 = vld [vmem:[%s1796_s5] sm:$0xff] (!%p1059_p7) }
  0x45   : > { %1349 = vmatpush3.bf16.msra.mxu0 %v1348_v11  ;;  %v469_v4 = vld [vmem:[%s1558_s14 + $0x378] sm:$0xff]  ;;  %v1368_v5 = vpack.c.bf16 %v437_v1, %v436_v0  ;;  %v356_v8 = vld [vmem:[%s1553_s10 + $0x30] sm:$0xff]  ;;  %v863_v34 = vld [vmem:[%s1796_s5 + $0x8] sm:$0xff] (!%p1059_p7) }
  0x46   : > { %1381 = vmatpush3.bf16.msra.mxu1 %v1380_v12  ;;  %1351 = vmatprep.subr.bf16.mxu0 %v1350_v13  ;;  %v1400_v6 = vpack.c.bf16 %v469_v4, %v468_v3  ;;  %v776_v28 = vld [vmem:[%s1794_s3 + $0x10] sm:$0xff] (!%p1059_p7)  ;;  %v865_v36 = vld [vmem:[%s1796_s5 + $0x18] sm:$0xff] (!%p1059_p7)  ;;  %v866_v40 = vld [vmem:[%s1796_s5 + $0x20] sm:$0xff] (!%p1059_p7) }
  0x47   : > { %1383 = vmatprep.subr.bf16.mxu1 %v1382_v17  ;;  %v864_v35 = vld [vmem:[%s1796_s5 + $0x10] sm:$0xff] (!%p1059_p7)  ;;  %v867_v41 = vld [vmem:[%s1796_s5 + $0x28] sm:$0xff] (!%p1059_p7)  ;;  %v773_v42 = vld [vmem:[%s1793_s2] sm:$0xff] (!%p1059_p7) }
  0x48   : > { %v868_v44 = vld [vmem:[%s1796_s5 + $0x30] sm:$0xff] (!%p1059_p7)  ;;  %v869_v45 = vld [vmem:[%s1796_s5 + $0x38] sm:$0xff] (!%p1059_p7)  ;;  %v870_v47 = vld [vmem:[%s1796_s5 + $0x40] sm:$0xff] (!%p1059_p7) }
  0x49   : > { %1353 = vmatpush3.bf16.msra.mxu0 %v1352_v23  ;;  %v349_v23 = vld [vmem:[%s1798_s7] sm:$0xff]  ;;  %v1418_v46 = vpack.c.bf16 (!%p1059_p7), %v869_v45, %v868_v44  ;;  %v871_v48 = vld [vmem:[%s1796_s5 + $0x48] sm:$0xff] (!%p1059_p7)  ;;  %v876_v56 = vld [vmem:[%s1796_s5 + $0x70] sm:$0xff] (!%p1059_p7) }
  0x4a   : > { %1385 = vmatpush3.bf16.msra.mxu1 %v1384_v26  ;;  %1355 = vmatprep.subr.bf16.mxu0 %v1354_v27  ;;  %v774_v26 = vld [vmem:[%s1794_s3] sm:$0xff] (!%p1059_p7)  ;;  %v775_v27 = vld [vmem:[%s1794_s3 + $0x8] sm:$0xff] (!%p1059_p7)  ;;  %v877_v57 = vld [vmem:[%s1796_s5 + $0x78] sm:$0xff] (!%p1059_p7) }
  0x4b   : > { %1387 = vmatprep.subr.bf16.mxu1 %v1386_v31  ;;  %v1403_v30 = vpack.c.bf16 (!%p1059_p7), %v775_v27, %v774_v26  ;;  %v777_v31 = vld [vmem:[%s1794_s3 + $0x18] sm:$0xff] (!%p1059_p7)  ;;  %v874_v53 = vld [vmem:[%s1796_s5 + $0x60] sm:$0xff] (!%p1059_p7)  ;;  %v875_v54 = vld [vmem:[%s1796_s5 + $0x68] sm:$0xff] (!%p1059_p7)  ;;  %v1430_v58 = vpack.c.bf16 (!%p1059_p7), %v877_v57, %v876_v56 }
  0x4d   : > { %1357 = vmatpush3.bf16.msra.mxu0 %v1356_v37  ;;  %v1406_v37 = vpack.c.bf16 (!%p1059_p7), %v777_v31, %v776_v28 }
  0x4e   : > { %1389 = vmatpush3.bf16.msra.mxu1 %v1388_v38  ;;  %1359 = vmatprep.subr.bf16.mxu0 %v1358_v39  ;;  %v1409_v38 = vpack.c.bf16 (!%p1059_p7), %v863_v34, %v862_v33  ;;  %v1412_v39 = vpack.c.bf16 (!%p1059_p7), %v865_v36, %v864_v35 }
  0x4f   : > { %1391 = vmatprep.subr.bf16.mxu1 %v1390_v43  ;;  %v1415_v43 = vpack.c.bf16 (!%p1059_p7), %v867_v41, %v866_v40 }
  0x51   : > { %1361 = vmatpush3.bf16.msra.mxu0 %v1360_v49  ;;  %v1421_v49 = vpack.c.bf16 (!%p1059_p7), %v871_v48, %v870_v47 }
  0x52   : > { %1393 = vmatpush3.bf16.msra.mxu1 %v1392_v50  ;;  %1363 = vmatprep.subr.bf16.mxu0 %v1362_v51  ;;  %v872_v50 = vld [vmem:[%s1796_s5 + $0x50] sm:$0xff] (!%p1059_p7)  ;;  %v873_v51 = vld [vmem:[%s1796_s5 + $0x58] sm:$0xff] (!%p1059_p7) }
  0x53   : > { %1395 = vmatprep.subr.bf16.mxu1 %v1394_v55  ;;  %v1424_v52 = vpack.c.bf16 (!%p1059_p7), %v873_v51, %v872_v50  ;;  %v1427_v55 = vpack.c.bf16 (!%p1059_p7), %v875_v54, %v874_v53 }
  0x55   : > { %1365 = vmatpush3.bf16.msra.mxu0 %v1364_v61  ;;  %v1061_v61 = vld [vmem:[%s1795_s4] ss:$0 sm:$0xff] (!%p1059_p7) }
  0x56   : > { %1397 = vmatpush3.bf16.msra.mxu1 %v1396_v62  ;;  %1367 = vmatprep.subr.bf16.mxu0 %v1366_v63 }
  0x57   : > { %1399 = vmatprep.subr.bf16.mxu1 %v1398_v2  ;;  %v1062_v2 = vld [vmem:[%s1797_s6] ss:$0 sm:$0xff] (!%p1059_p7) }
  0x59   : > { %1369 = vmatpush3.bf16.msra.mxu0 %v1368_v5 }
  0x5a   : > { %1401 = vmatpush3.bf16.msra.mxu1 %v1400_v6  ;;  %1402 = vmatprep.subr.bf16.mxu0 (!%p1059_p7), %v1485_v29 }
  0x5b   : > { %1408 = vmatprep.subr.bf16.mxu1 (!%p1059_p7), %v1485_v29 }
  0x5c   : > { %691 = vmatmul.mubr.f32.vlgmr.msra.gmra.mrb[2].mxu0 %v354_v7 }
  0x5d   : > { %761 = vmatmul.mubr.f32.vlgmr.msra.gmra.mrb[2].mxu1 %v356_v8  ;;  %1236 = vmatprep.mubr.msk.f32.mxu0 (!%p1059_p7), %vm1486_vm0, %v1487_v32 }
  0x5e   : > { %1271 = vmatprep.mubr.msk.f32.mxu1 (!%p1059_p7), %vm1486_vm0, %v1487_v32  ;;  %1404 = vmatpush3.bf16.msra.mxu0 (!%p1059_p7), %v1403_v30 }
  0x5f   : > { %1405 = vmatprep.subr.bf16.mxu0 (!%p1059_p7), %v1485_v29  ;;  %1410 = vmatpush3.bf16.msra.mxu1 (!%p1059_p7), %v1409_v38 }
  0x60   : > { %1411 = vmatprep.subr.bf16.mxu1 (!%p1059_p7), %v1485_v29 }
  0x62   : > { %1407 = vmatpush3.bf16.msra.mxu0 (!%p1059_p7), %v1406_v37 }
  0x63   : > { %1413 = vmatpush3.bf16.msra.mxu1 (!%p1059_p7), %v1412_v39 }
  0x64   : > { %1414 = vmatprep.subr.bf16.mxu1 (!%p1059_p7), %v1485_v29 }
  0x67   : > { %1416 = vmatpush3.bf16.msra.mxu1 (!%p1059_p7), %v1415_v43 }
  0x68   : > { %1417 = vmatprep.subr.bf16.mxu1 (!%p1059_p7), %v1485_v29 }
  0x6b   : > { %1419 = vmatpush3.bf16.msra.mxu1 (!%p1059_p7), %v1418_v46 }
  0x6c   : > { %1420 = vmatprep.subr.bf16.mxu1 (!%p1059_p7), %v1485_v29 }
  0x6f   : > { %1422 = vmatpush3.bf16.msra.mxu1 (!%p1059_p7), %v1421_v49 }
  0x70   : > { %1423 = vmatprep.subr.bf16.mxu1 (!%p1059_p7), %v1485_v29 }
  0x73   : > { %1425 = vmatpush3.bf16.msra.mxu1 (!%p1059_p7), %v1424_v52 }
  0x74   : > { %1426 = vmatprep.subr.bf16.mxu1 (!%p1059_p7), %v1485_v29 }
  0x77   : > { %1428 = vmatpush3.bf16.msra.mxu1 (!%p1059_p7), %v1427_v55 }
  0x78   : > { %1429 = vmatprep.subr.bf16.mxu1 (!%p1059_p7), %v1485_v29 }
  0x7b   : > { %1431 = vmatpush3.bf16.msra.mxu1 (!%p1059_p7), %v1430_v58 }
 0x10f   : > { %v1098_v9 = vpop.f32.mrb[0].mxu0 }
 0x110   : > { %v1133_v10 = vpop.f32.mrb[0].mxu1  ;;  %v1099_v11 = vpop.f32.mrb[1].mxu0  ;;  %1237 = vmatmul.mubr.msk.f32.vlgmr.msra.gmra.mrb[0].mxu0 (!%p1059_p7), %vm778_vm1, %v773_v42 }
 0x111   : > { %v1100_v12 = vadd.f32 %v1099_v11, %v1098_v9  ;;  %v1134_v13 = vpop.f32.mrb[1].mxu1 }
 0x112   : > { %v1135_v14 = vadd.f32 %v1134_v13, %v1133_v10 }
 0x114   : > { %v623_v15 = vadd.f32 %v1135_v14, %v1100_v12 }
 0x12f   : > { %v1168_v16 = vpop.f32.mrb[2].mxu0 }
 0x130   : > { %v1169_v17 = vpop.f32.mrb[3].mxu0  ;;  %v1203_v18 = vpop.f32.mrb[2].mxu1 }
 0x131   : > { %v1170_v19 = vadd.f32 %v1169_v17, %v1168_v16  ;;  %v1204_v20 = vpop.f32.mrb[3].mxu1 }
 0x132   : > { %v1205_v21 = vadd.f32 %v1204_v20, %v1203_v18 }
 0x133   : > { %v693_v22 = vadd.f32 %v1170_v19, %v623_v15  ;;  %771 = sbr.rel (%p1059_p7) target bundleno = 707 (0x2c3), region = 56 }
 0x135   : > { %v763_v24 = vadd.f32 %v1205_v21, %v693_v22 }
 0x137   : > { %v766_v25 = vadd.f32 %v763_v24, %v349_v23 }
 0x139   : > { %767 = vst [vmem:[%s1798_s7] sm:$0xff] %v766_v25 }
 0x140   : > { %v772_v59 = vld [vmem:[%s1798_s7] sm:$0xff] }
 0x1e3   : > { %v848_v60 = vpop.f32.mrb[0].mxu0 }
 0x1e4   : > { %v852_v62 = vadd.f32 %v848_v60, %v772_v59  ;;  %v1238_v63 = vpop.f32.mrb[1].mxu0 }
 0x1e6   : > { %v860_v0 = vadd.f32 %v1061_v61, %v852_v62 }
 0x1e8   : > { %v861_v1 = vmax.f32 %v860_v0, 0.0 }
 0x1ea   : > { %1272 = vmatmul.mubr.f32.vlgmr.msra.gmra.mrb[0].mxu1 %v861_v1 }
 0x2bd   : > { %v951_v3 = vpop.f32.mrb[0].mxu1 }
 0x2be   : > { %v952_v4 = vadd.f32 %v1062_v2, %v951_v3  ;;  %v1273_v5 = vpop.f32.mrb[1].mxu1 }
 0x2c0   : > { %v955_v6 = vmax.f32 %v952_v4, 0.0 }
 0x2c2   : > { %956 = vst [vmem:[%s1798_s7] sm:$0xff] %v955_v6 }
 0x2c3 PF: > { %s17_s26 = sadd.s32 1, %s1482_s26   ;;  %s1799_s24 = smov %s1478_s25 }
 0x2c4   : > { %p14_p8 = scmp.ge.s32.totalorder %s17_s26, 4   ;;  %s1800_s25 = smov %s1802_s27 }
 0x2c6   :  { %16 = sbr.rel (!%p14_p8) target bundleno = 2 (0x2), region = 92 }

</bundles_post_ra>
